<compile_context>
chip_gen: v7x
topology: tpu7x:2x2x1
jax: 0.10.0
libtpu: 0.0.40
codegen_flags: <defaults>
</compile_context>

<pallas_src>
import functools

import jax
import jax.numpy as jnp
from jax import lax
from jax.experimental import pallas as pl
from jax.experimental.pallas import tpu as pltpu

KSIZE = 3
# tap offsets (dy, dx) in the same (ky, kx) row-major order as the weight layout
OFFSETS = tuple((dy, dx) for dy in (-1, 0, 1) for dx in (-1, 0, 1))


def fused_conv3_kernel(x_ref, w_ref, b_ref, o_ref, buf_ref, *,
                       n_layers, C, H, W, pad):
    """Three fused 3x3 'same' convolutions (cross-correlation, like PyTorch).

    x_ref  : (C, N, H*W)           f32 VMEM  channel-major flattened NCHW input
    w_ref  : (L*C*C*9,)            f32 SMEM  weights, layout [l, co, ci, ky, kx]
    b_ref  : (L*C,)                f32 SMEM  biases,  layout [l, co]
    o_ref  : (N, C*H*W)            f32 VMEM  lane-dense flattened NCHW output
    buf_ref: (C, N, pad+H*W+pad)   f32 VMEM  flat activations with zeroed,
                                             128-aligned borders (in-kernel pad)
    """
    N = x_ref.shape[1]
    HW = H * W
    K2 = KSIZE * KSIZE

    # ---- in-kernel "same" zero padding: zero scratch once; borders stay zero ---
    buf_ref[...] = jnp.zeros(buf_ref.shape, jnp.float32)
    for ci in range(C):
        buf_ref[ci, :, pl.ds(pad, HW)] = x_ref[ci]        # 128-aligned store

    # ---- dx-only column masks (row overflow already reads the zero border) -----
    col = lax.broadcasted_iota(jnp.int32, (N, HW), 1) % W
    mask_l = (col >= 1).astype(jnp.float32)               # for taps with dx = -1
    mask_r = (col <= W - 2).astype(jnp.float32)           # for taps with dx = +1

    # ---- the three conv layers, intermediates resident in VMEM scratch ---------
    for l in range(n_layers):
        acc = [jnp.full((N, HW), b_ref[l * C + co], jnp.float32)
               for co in range(C)]
        for ci in range(C):
            v = buf_ref[ci]                                # (N, pad+HW+pad) load
            for t, (dy, dx) in enumerate(OFFSETS):
                start = pad + dy * W + dx
                s = v[:, start:start + HW]                 # static in-bounds slice
                if dx == -1:
                    s = s * mask_l
                elif dx == 1:
                    s = s * mask_r
                # Each tap is consumed immediately by all C output channels:
                # small live set, no spills; tap computed exactly once per layer.
                wbase = (l * C * C + ci) * K2 + t
                for co in range(C):
                    acc[co] = acc[co] + w_ref[wbase + co * C * K2] * s
        if l + 1 < n_layers:
            for co in range(C):                            # 128-aligned writebacks
                buf_ref[co, :, pl.ds(pad, HW)] = acc[co]
        else:
            # single unmasked, lane-dense store of the whole output row
            o_ref[...] = jnp.concatenate(acc, axis=1)


@jax.jit
def example_model_forward(x, w_all, b_all):
    """x: (N, C, H, W) f32; w_all: (3*C*C*9,) f32; b_all: (3*C,) f32."""
    N, C, H, W = x.shape
    L = b_all.shape[0] // C
    HW = H * W
    pad = max(128, ((W + 1 + 127) // 128) * 128)   # >= W+1 shift and lane-aligned
    padf = pad + HW + pad
    kernel = functools.partial(fused_conv3_kernel,
                               n_layers=L, C=C, H=H, W=W, pad=pad)
    x_cnq = jnp.transpose(x.astype(jnp.float32), (1, 0, 2, 3)).reshape(C, N, HW)
    out_flat = pl.pallas_call(
        kernel,
        out_shape=jax.ShapeDtypeStruct((N, C * HW), jnp.float32),
        in_specs=[
            pl.BlockSpec(memory_space=pltpu.MemorySpace.VMEM),   # activations
            pl.BlockSpec(memory_space=pltpu.MemorySpace.SMEM),   # weights (scalars)
            pl.BlockSpec(memory_space=pltpu.MemorySpace.SMEM),   # biases  (scalars)
        ],
        out_specs=pl.BlockSpec(memory_space=pltpu.MemorySpace.VMEM),
        scratch_shapes=[pltpu.VMEM((C, N, padf), jnp.float32)],
    )(x_cnq, w_all, b_all)
    return out_flat.reshape(N, C, H, W)


def init_params(key, n_layers=3, c=3, k=KSIZE):
    """Deterministic params matching PyTorch's default Conv2d init ranges."""
    ws, bs = [], []
    for i in range(n_layers):
        kw, kb = jax.random.split(jax.random.fold_in(key, i))
        fan_in = c * k * k
        bound = 1.0 / (fan_in ** 0.5)
        ws.append(jax.random.uniform(kw, (c, c, k, k), jnp.float32, -bound, bound))
        bs.append(jax.random.uniform(kb, (c,), jnp.float32, -bound, bound))
    w_all = jnp.concatenate([w.reshape(-1) for w in ws])   # [l, co, ci, ky, kx]
    b_all = jnp.concatenate(bs)                            # [l, co]
    return ws, bs, w_all, b_all


def reference_forward(x, ws, bs):
    """Pure-JAX reference (identical semantics to 3x Conv2d padding='same')."""
    y = x
    for w, b in zip(ws, bs):
        y = lax.conv_general_dilated(
            y, w, window_strides=(1, 1), padding="SAME",
            dimension_numbers=("NCHW", "OIHW", "NCHW"),
            precision=lax.Precision.HIGHEST) + b[None, :, None, None]
    return y


if __name__ == "__main__":
    key = jax.random.PRNGKey(0)
    kx, kp = jax.random.split(key)
    x = jax.random.normal(kx, (2, 3, 16, 16), jnp.float32)   # NCHW, module implies C=3
    ws, bs, w_all, b_all = init_params(kp)

    out = jax.block_until_ready(example_model_forward(x, w_all, b_all))
    assert out.shape == (2, 3, 16, 16)
    assert out.dtype == jnp.float32

    ref = jax.block_until_ready(reference_forward(x, ws, bs))
    max_err = float(jnp.max(jnp.abs(out - ref)))
    assert jnp.allclose(out, ref, rtol=1e-4, atol=1e-4), max_err

    print("KERNEL_OK")
</pallas_src>

<mosaic_0001>
module attributes {stable_mosaic.version = 11 : i64} {
  func.func @fused_conv3_kernel(%arg0: memref<3x2x256xf32, #tpu.memory_space<vmem>>, %arg1: memref<243xf32, #tpu.memory_space<smem>>, %arg2: memref<9xf32, #tpu.memory_space<smem>>, %arg3: memref<2x768xf32, #tpu.memory_space<vmem>>, %arg4: memref<3x2x512xf32, #tpu.memory_space<vmem>>) attributes {dimension_semantics = [], scalar_prefetch = 0 : i64, scratch_operands = 1 : i64, tpu.core_type = #tpu.core_type<tc>} {
    %cst = arith.constant 0.000000e+00 : f32
    %0 = vector.broadcast %cst : f32 to vector<3x2x512xf32>
    %c0 = arith.constant 0 : index
    %c0_0 = arith.constant 0 : index
    %c0_1 = arith.constant 0 : index
    %1 = vector.load %arg4[%c0, %c0_0, %c0_1] : memref<3x2x512xf32, #tpu.memory_space<vmem>>, vector<3x2x512xf32>
    tpu.vector_store %arg4[%c0, %c0_0, %c0_1], %0 {strides = array<i32>} : memref<3x2x512xf32, #tpu.memory_space<vmem>>, vector<3x2x512xf32>,
    %c0_2 = arith.constant 0 : index
    %c0_3 = arith.constant 0 : index
    %c0_4 = arith.constant 0 : index
    %2 = vector.load %arg0[%c0_2, %c0_3, %c0_4] : memref<3x2x256xf32, #tpu.memory_space<vmem>>, vector<1x2x256xf32>
    %3 = vector.shape_cast %2 : vector<1x2x256xf32> to vector<2x256xf32>
    %c0_5 = arith.constant 0 : index
    %c0_6 = arith.constant 0 : index
    %c128 = arith.constant 128 : index
    %4 = vector.load %arg4[%c0_5, %c0_6, %c128] : memref<3x2x512xf32, #tpu.memory_space<vmem>>, vector<1x2x256xf32>
    %5 = vector.shape_cast %4 : vector<1x2x256xf32> to vector<2x256xf32>
    %6 = vector.shape_cast %3 : vector<2x256xf32> to vector<1x2x256xf32>
    tpu.vector_store %arg4[%c0_5, %c0_6, %c128], %6 {strides = array<i32>} : memref<3x2x512xf32, #tpu.memory_space<vmem>>, vector<1x2x256xf32>,
    %c1 = arith.constant 1 : index
    %c0_7 = arith.constant 0 : index
    %c0_8 = arith.constant 0 : index
    %7 = vector.load %arg0[%c1, %c0_7, %c0_8] : memref<3x2x256xf32, #tpu.memory_space<vmem>>, vector<1x2x256xf32>
    %8 = vector.shape_cast %7 : vector<1x2x256xf32> to vector<2x256xf32>
    %c1_9 = arith.constant 1 : index
    %c0_10 = arith.constant 0 : index
    %c128_11 = arith.constant 128 : index
    %9 = vector.load %arg4[%c1_9, %c0_10, %c128_11] : memref<3x2x512xf32, #tpu.memory_space<vmem>>, vector<1x2x256xf32>
    %10 = vector.shape_cast %9 : vector<1x2x256xf32> to vector<2x256xf32>
    %11 = vector.shape_cast %8 : vector<2x256xf32> to vector<1x2x256xf32>
    tpu.vector_store %arg4[%c1_9, %c0_10, %c128_11], %11 {strides = array<i32>} : memref<3x2x512xf32, #tpu.memory_space<vmem>>, vector<1x2x256xf32>,
    %c2 = arith.constant 2 : index
    %c0_12 = arith.constant 0 : index
    %c0_13 = arith.constant 0 : index
    %12 = vector.load %arg0[%c2, %c0_12, %c0_13] : memref<3x2x256xf32, #tpu.memory_space<vmem>>, vector<1x2x256xf32>
    %13 = vector.shape_cast %12 : vector<1x2x256xf32> to vector<2x256xf32>
    %c2_14 = arith.constant 2 : index
    %c0_15 = arith.constant 0 : index
    %c128_16 = arith.constant 128 : index
    %14 = vector.load %arg4[%c2_14, %c0_15, %c128_16] : memref<3x2x512xf32, #tpu.memory_space<vmem>>, vector<1x2x256xf32>
    %15 = vector.shape_cast %14 : vector<1x2x256xf32> to vector<2x256xf32>
    %16 = vector.shape_cast %13 : vector<2x256xf32> to vector<1x2x256xf32>
    tpu.vector_store %arg4[%c2_14, %c0_15, %c128_16], %16 {strides = array<i32>} : memref<3x2x512xf32, #tpu.memory_space<vmem>>, vector<1x2x256xf32>,
    %17 = tpu.iota {dimensions = array<i32: 1>} : vector<2x256xi32>
    %c16_i32 = arith.constant 16 : i32
    %c0_i32 = arith.constant 0 : i32
    %18 = arith.cmpi eq, %c16_i32, %c0_i32 : i32
    %c1_i32 = arith.constant 1 : i32
    %19 = arith.select %18, %c1_i32, %c16_i32 : i32
    %20 = vector.broadcast %19 : i32 to vector<2x256xi32>
    %21 = arith.remsi %17, %20 : vector<2x256xi32>
    %c0_i32_17 = arith.constant 0 : i32
    %22 = vector.broadcast %c0_i32_17 : i32 to vector<2x256xi32>
    %23 = arith.cmpi ne, %21, %22 : vector<2x256xi32>
    %c0_i32_18 = arith.constant 0 : i32
    %24 = vector.broadcast %c0_i32_18 : i32 to vector<2x256xi32>
    %25 = arith.cmpi slt, %21, %24 : vector<2x256xi32>
    %c0_i32_19 = arith.constant 0 : i32
    %26 = arith.cmpi slt, %19, %c0_i32_19 : i32
    %27 = vector.broadcast %26 : i1 to vector<2x256xi1>
    %28 = vector.broadcast %27 : vector<2x256xi1> to vector<2x256xi1>
    %29 = arith.xori %25, %28 : vector<2x256xi1>
    %30 = arith.andi %29, %23 : vector<2x256xi1>
    %31 = vector.broadcast %19 : i32 to vector<2x256xi32>
    %32 = arith.addi %21, %31 : vector<2x256xi32>
    %33 = arith.select %30, %32, %21 : vector<2x256xi1>, vector<2x256xi32>
    %c1_i32_20 = arith.constant 1 : i32
    %34 = vector.broadcast %c1_i32_20 : i32 to vector<2x256xi32>
    %35 = arith.cmpi sge, %33, %34 : vector<2x256xi32>
    %36 = arith.extui %35 : vector<2x256xi1> to vector<2x256xi32>
    %37 = arith.sitofp %36 : vector<2x256xi32> to vector<2x256xf32>
    %c14_i32 = arith.constant 14 : i32
    %38 = vector.broadcast %c14_i32 : i32 to vector<2x256xi32>
    %39 = arith.cmpi sle, %33, %38 : vector<2x256xi32>
    %40 = arith.extui %39 : vector<2x256xi1> to vector<2x256xi32>
    %41 = arith.sitofp %40 : vector<2x256xi32> to vector<2x256xf32>
    %c0_21 = arith.constant 0 : index
    %42 = memref.load %arg2[%c0_21] : memref<9xf32, #tpu.memory_space<smem>>
    %43 = vector.broadcast %42 : f32 to vector<2x256xf32>
    %c1_22 = arith.constant 1 : index
    %44 = memref.load %arg2[%c1_22] : memref<9xf32, #tpu.memory_space<smem>>
    %45 = vector.broadcast %44 : f32 to vector<2x256xf32>
    %c2_23 = arith.constant 2 : index
    %46 = memref.load %arg2[%c2_23] : memref<9xf32, #tpu.memory_space<smem>>
    %47 = vector.broadcast %46 : f32 to vector<2x256xf32>
    %c0_24 = arith.constant 0 : index
    %c0_25 = arith.constant 0 : index
    %c0_26 = arith.constant 0 : index
    %48 = vector.load %arg4[%c0_24, %c0_25, %c0_26] : memref<3x2x512xf32, #tpu.memory_space<vmem>>, vector<1x2x512xf32>
    %49 = vector.shape_cast %48 : vector<1x2x512xf32> to vector<2x512xf32>
    %50 = vector.extract_strided_slice %49 {offsets = [0, 111], sizes = [2, 256], strides = [1, 1]} : vector<2x512xf32> to vector<2x256xf32>
    %51 = arith.mulf %50, %37 : vector<2x256xf32>
    %c0_27 = arith.constant 0 : index
    %52 = memref.load %arg1[%c0_27] : memref<243xf32, #tpu.memory_space<smem>>
    %53 = vector.broadcast %52 : f32 to vector<2x256xf32>
    %54 = arith.mulf %53, %51 : vector<2x256xf32>
    %55 = arith.addf %43, %54 : vector<2x256xf32>
    %c27 = arith.constant 27 : index
    %56 = memref.load %arg1[%c27] : memref<243xf32, #tpu.memory_space<smem>>
    %57 = vector.broadcast %56 : f32 to vector<2x256xf32>
    %58 = arith.mulf %57, %51 : vector<2x256xf32>
    %59 = arith.addf %45, %58 : vector<2x256xf32>
    %c54 = arith.constant 54 : index
    %60 = memref.load %arg1[%c54] : memref<243xf32, #tpu.memory_space<smem>>
    %61 = vector.broadcast %60 : f32 to vector<2x256xf32>
    %62 = arith.mulf %61, %51 : vector<2x256xf32>
    %63 = arith.addf %47, %62 : vector<2x256xf32>
    %64 = vector.extract_strided_slice %49 {offsets = [0, 112], sizes = [2, 256], strides = [1, 1]} : vector<2x512xf32> to vector<2x256xf32>
    %c1_28 = arith.constant 1 : index
    %65 = memref.load %arg1[%c1_28] : memref<243xf32, #tpu.memory_space<smem>>
    %66 = vector.broadcast %65 : f32 to vector<2x256xf32>
    %67 = arith.mulf %66, %64 : vector<2x256xf32>
    %68 = arith.addf %55, %67 : vector<2x256xf32>
    %c28 = arith.constant 28 : index
    %69 = memref.load %arg1[%c28] : memref<243xf32, #tpu.memory_space<smem>>
    %70 = vector.broadcast %69 : f32 to vector<2x256xf32>
    %71 = arith.mulf %70, %64 : vector<2x256xf32>
    %72 = arith.addf %59, %71 : vector<2x256xf32>
    %c55 = arith.constant 55 : index
    %73 = memref.load %arg1[%c55] : memref<243xf32, #tpu.memory_space<smem>>
    %74 = vector.broadcast %73 : f32 to vector<2x256xf32>
    %75 = arith.mulf %74, %64 : vector<2x256xf32>
    %76 = arith.addf %63, %75 : vector<2x256xf32>
    %77 = vector.extract_strided_slice %49 {offsets = [0, 113], sizes = [2, 256], strides = [1, 1]} : vector<2x512xf32> to vector<2x256xf32>
    %78 = arith.mulf %77, %41 : vector<2x256xf32>
    %c2_29 = arith.constant 2 : index
    %79 = memref.load %arg1[%c2_29] : memref<243xf32, #tpu.memory_space<smem>>
    %80 = vector.broadcast %79 : f32 to vector<2x256xf32>
    %81 = arith.mulf %80, %78 : vector<2x256xf32>
    %82 = arith.addf %68, %81 : vector<2x256xf32>
    %c29 = arith.constant 29 : index
    %83 = memref.load %arg1[%c29] : memref<243xf32, #tpu.memory_space<smem>>
    %84 = vector.broadcast %83 : f32 to vector<2x256xf32>
    %85 = arith.mulf %84, %78 : vector<2x256xf32>
    %86 = arith.addf %72, %85 : vector<2x256xf32>
    %c56 = arith.constant 56 : index
    %87 = memref.load %arg1[%c56] : memref<243xf32, #tpu.memory_space<smem>>
    %88 = vector.broadcast %87 : f32 to vector<2x256xf32>
    %89 = arith.mulf %88, %78 : vector<2x256xf32>
    %90 = arith.addf %76, %89 : vector<2x256xf32>
    %91 = vector.extract_strided_slice %49 {offsets = [0, 127], sizes = [2, 256], strides = [1, 1]} : vector<2x512xf32> to vector<2x256xf32>
    %92 = arith.mulf %91, %37 : vector<2x256xf32>
    %c3 = arith.constant 3 : index
    %93 = memref.load %arg1[%c3] : memref<243xf32, #tpu.memory_space<smem>>
    %94 = vector.broadcast %93 : f32 to vector<2x256xf32>
    %95 = arith.mulf %94, %92 : vector<2x256xf32>
    %96 = arith.addf %82, %95 : vector<2x256xf32>
    %c30 = arith.constant 30 : index
    %97 = memref.load %arg1[%c30] : memref<243xf32, #tpu.memory_space<smem>>
    %98 = vector.broadcast %97 : f32 to vector<2x256xf32>
    %99 = arith.mulf %98, %92 : vector<2x256xf32>
    %100 = arith.addf %86, %99 : vector<2x256xf32>
    %c57 = arith.constant 57 : index
    %101 = memref.load %arg1[%c57] : memref<243xf32, #tpu.memory_space<smem>>
    %102 = vector.broadcast %101 : f32 to vector<2x256xf32>
    %103 = arith.mulf %102, %92 : vector<2x256xf32>
    %104 = arith.addf %90, %103 : vector<2x256xf32>
    %105 = vector.extract_strided_slice %49 {offsets = [0, 128], sizes = [2, 256], strides = [1, 1]} : vector<2x512xf32> to vector<2x256xf32>
    %c4 = arith.constant 4 : index
    %106 = memref.load %arg1[%c4] : memref<243xf32, #tpu.memory_space<smem>>
    %107 = vector.broadcast %106 : f32 to vector<2x256xf32>
    %108 = arith.mulf %107, %105 : vector<2x256xf32>
    %109 = arith.addf %96, %108 : vector<2x256xf32>
    %c31 = arith.constant 31 : index
    %110 = memref.load %arg1[%c31] : memref<243xf32, #tpu.memory_space<smem>>
    %111 = vector.broadcast %110 : f32 to vector<2x256xf32>
    %112 = arith.mulf %111, %105 : vector<2x256xf32>
    %113 = arith.addf %100, %112 : vector<2x256xf32>
    %c58 = arith.constant 58 : index
    %114 = memref.load %arg1[%c58] : memref<243xf32, #tpu.memory_space<smem>>
    %115 = vector.broadcast %114 : f32 to vector<2x256xf32>
    %116 = arith.mulf %115, %105 : vector<2x256xf32>
    %117 = arith.addf %104, %116 : vector<2x256xf32>
    %118 = vector.extract_strided_slice %49 {offsets = [0, 129], sizes = [2, 256], strides = [1, 1]} : vector<2x512xf32> to vector<2x256xf32>
    %119 = arith.mulf %118, %41 : vector<2x256xf32>
    %c5 = arith.constant 5 : index
    %120 = memref.load %arg1[%c5] : memref<243xf32, #tpu.memory_space<smem>>
    %121 = vector.broadcast %120 : f32 to vector<2x256xf32>
    %122 = arith.mulf %121, %119 : vector<2x256xf32>
    %123 = arith.addf %109, %122 : vector<2x256xf32>
    %c32 = arith.constant 32 : index
    %124 = memref.load %arg1[%c32] : memref<243xf32, #tpu.memory_space<smem>>
    %125 = vector.broadcast %124 : f32 to vector<2x256xf32>
    %126 = arith.mulf %125, %119 : vector<2x256xf32>
    %127 = arith.addf %113, %126 : vector<2x256xf32>
    %c59 = arith.constant 59 : index
    %128 = memref.load %arg1[%c59] : memref<243xf32, #tpu.memory_space<smem>>
    %129 = vector.broadcast %128 : f32 to vector<2x256xf32>
    %130 = arith.mulf %129, %119 : vector<2x256xf32>
    %131 = arith.addf %117, %130 : vector<2x256xf32>
    %132 = vector.extract_strided_slice %49 {offsets = [0, 143], sizes = [2, 256], strides = [1, 1]} : vector<2x512xf32> to vector<2x256xf32>
    %133 = arith.mulf %132, %37 : vector<2x256xf32>
    %c6 = arith.constant 6 : index
    %134 = memref.load %arg1[%c6] : memref<243xf32, #tpu.memory_space<smem>>
    %135 = vector.broadcast %134 : f32 to vector<2x256xf32>
    %136 = arith.mulf %135, %133 : vector<2x256xf32>
    %137 = arith.addf %123, %136 : vector<2x256xf32>
    %c33 = arith.constant 33 : index
    %138 = memref.load %arg1[%c33] : memref<243xf32, #tpu.memory_space<smem>>
    %139 = vector.broadcast %138 : f32 to vector<2x256xf32>
    %140 = arith.mulf %139, %133 : vector<2x256xf32>
    %141 = arith.addf %127, %140 : vector<2x256xf32>
    %c60 = arith.constant 60 : index
    %142 = memref.load %arg1[%c60] : memref<243xf32, #tpu.memory_space<smem>>
    %143 = vector.broadcast %142 : f32 to vector<2x256xf32>
    %144 = arith.mulf %143, %133 : vector<2x256xf32>
    %145 = arith.addf %131, %144 : vector<2x256xf32>
    %146 = vector.extract_strided_slice %49 {offsets = [0, 144], sizes = [2, 256], strides = [1, 1]} : vector<2x512xf32> to vector<2x256xf32>
    %c7 = arith.constant 7 : index
    %147 = memref.load %arg1[%c7] : memref<243xf32, #tpu.memory_space<smem>>
    %148 = vector.broadcast %147 : f32 to vector<2x256xf32>
    %149 = arith.mulf %148, %146 : vector<2x256xf32>
    %150 = arith.addf %137, %149 : vector<2x256xf32>
    %c34 = arith.constant 34 : index
    %151 = memref.load %arg1[%c34] : memref<243xf32, #tpu.memory_space<smem>>
    %152 = vector.broadcast %151 : f32 to vector<2x256xf32>
    %153 = arith.mulf %152, %146 : vector<2x256xf32>
    %154 = arith.addf %141, %153 : vector<2x256xf32>
    %c61 = arith.constant 61 : index
    %155 = memref.load %arg1[%c61] : memref<243xf32, #tpu.memory_space<smem>>
    %156 = vector.broadcast %155 : f32 to vector<2x256xf32>
    %157 = arith.mulf %156, %146 : vector<2x256xf32>
    %158 = arith.addf %145, %157 : vector<2x256xf32>
    %159 = vector.extract_strided_slice %49 {offsets = [0, 145], sizes = [2, 256], strides = [1, 1]} : vector<2x512xf32> to vector<2x256xf32>
    %160 = arith.mulf %159, %41 : vector<2x256xf32>
    %c8 = arith.constant 8 : index
    %161 = memref.load %arg1[%c8] : memref<243xf32, #tpu.memory_space<smem>>
    %162 = vector.broadcast %161 : f32 to vector<2x256xf32>
    %163 = arith.mulf %162, %160 : vector<2x256xf32>
    %164 = arith.addf %150, %163 : vector<2x256xf32>
    %c35 = arith.constant 35 : index
    %165 = memref.load %arg1[%c35] : memref<243xf32, #tpu.memory_space<smem>>
    %166 = vector.broadcast %165 : f32 to vector<2x256xf32>
    %167 = arith.mulf %166, %160 : vector<2x256xf32>
    %168 = arith.addf %154, %167 : vector<2x256xf32>
    %c62 = arith.constant 62 : index
    %169 = memref.load %arg1[%c62] : memref<243xf32, #tpu.memory_space<smem>>
    %170 = vector.broadcast %169 : f32 to vector<2x256xf32>
    %171 = arith.mulf %170, %160 : vector<2x256xf32>
    %172 = arith.addf %158, %171 : vector<2x256xf32>
    %c1_30 = arith.constant 1 : index
    %c0_31 = arith.constant 0 : index
    %c0_32 = arith.constant 0 : index
    %173 = vector.load %arg4[%c1_30, %c0_31, %c0_32] : memref<3x2x512xf32, #tpu.memory_space<vmem>>, vector<1x2x512xf32>
    %174 = vector.shape_cast %173 : vector<1x2x512xf32> to vector<2x512xf32>
    %175 = vector.extract_strided_slice %174 {offsets = [0, 111], sizes = [2, 256], strides = [1, 1]} : vector<2x512xf32> to vector<2x256xf32>
    %176 = arith.mulf %175, %37 : vector<2x256xf32>
    %c9 = arith.constant 9 : index
    %177 = memref.load %arg1[%c9] : memref<243xf32, #tpu.memory_space<smem>>
    %178 = vector.broadcast %177 : f32 to vector<2x256xf32>
    %179 = arith.mulf %178, %176 : vector<2x256xf32>
    %180 = arith.addf %164, %179 : vector<2x256xf32>
    %c36 = arith.constant 36 : index
    %181 = memref.load %arg1[%c36] : memref<243xf32, #tpu.memory_space<smem>>
    %182 = vector.broadcast %181 : f32 to vector<2x256xf32>
    %183 = arith.mulf %182, %176 : vector<2x256xf32>
    %184 = arith.addf %168, %183 : vector<2x256xf32>
    %c63 = arith.constant 63 : index
    %185 = memref.load %arg1[%c63] : memref<243xf32, #tpu.memory_space<smem>>
    %186 = vector.broadcast %185 : f32 to vector<2x256xf32>
    %187 = arith.mulf %186, %176 : vector<2x256xf32>
    %188 = arith.addf %172, %187 : vector<2x256xf32>
    %189 = vector.extract_strided_slice %174 {offsets = [0, 112], sizes = [2, 256], strides = [1, 1]} : vector<2x512xf32> to vector<2x256xf32>
    %c10 = arith.constant 10 : index
    %190 = memref.load %arg1[%c10] : memref<243xf32, #tpu.memory_space<smem>>
    %191 = vector.broadcast %190 : f32 to vector<2x256xf32>
    %192 = arith.mulf %191, %189 : vector<2x256xf32>
    %193 = arith.addf %180, %192 : vector<2x256xf32>
    %c37 = arith.constant 37 : index
    %194 = memref.load %arg1[%c37] : memref<243xf32, #tpu.memory_space<smem>>
    %195 = vector.broadcast %194 : f32 to vector<2x256xf32>
    %196 = arith.mulf %195, %189 : vector<2x256xf32>
    %197 = arith.addf %184, %196 : vector<2x256xf32>
    %c64 = arith.constant 64 : index
    %198 = memref.load %arg1[%c64] : memref<243xf32, #tpu.memory_space<smem>>
    %199 = vector.broadcast %198 : f32 to vector<2x256xf32>
    %200 = arith.mulf %199, %189 : vector<2x256xf32>
    %201 = arith.addf %188, %200 : vector<2x256xf32>
    %202 = vector.extract_strided_slice %174 {offsets = [0, 113], sizes = [2, 256], strides = [1, 1]} : vector<2x512xf32> to vector<2x256xf32>
    %203 = arith.mulf %202, %41 : vector<2x256xf32>
    %c11 = arith.constant 11 : index
    %204 = memref.load %arg1[%c11] : memref<243xf32, #tpu.memory_space<smem>>
    %205 = vector.broadcast %204 : f32 to vector<2x256xf32>
    %206 = arith.mulf %205, %203 : vector<2x256xf32>
    %207 = arith.addf %193, %206 : vector<2x256xf32>
    %c38 = arith.constant 38 : index
    %208 = memref.load %arg1[%c38] : memref<243xf32, #tpu.memory_space<smem>>
    %209 = vector.broadcast %208 : f32 to vector<2x256xf32>
    %210 = arith.mulf %209, %203 : vector<2x256xf32>
    %211 = arith.addf %197, %210 : vector<2x256xf32>
    %c65 = arith.constant 65 : index
    %212 = memref.load %arg1[%c65] : memref<243xf32, #tpu.memory_space<smem>>
    %213 = vector.broadcast %212 : f32 to vector<2x256xf32>
    %214 = arith.mulf %213, %203 : vector<2x256xf32>
    %215 = arith.addf %201, %214 : vector<2x256xf32>
    %216 = vector.extract_strided_slice %174 {offsets = [0, 127], sizes = [2, 256], strides = [1, 1]} : vector<2x512xf32> to vector<2x256xf32>
    %217 = arith.mulf %216, %37 : vector<2x256xf32>
    %c12 = arith.constant 12 : index
    %218 = memref.load %arg1[%c12] : memref<243xf32, #tpu.memory_space<smem>>
    %219 = vector.broadcast %218 : f32 to vector<2x256xf32>
    %220 = arith.mulf %219, %217 : vector<2x256xf32>
    %221 = arith.addf %207, %220 : vector<2x256xf32>
    %c39 = arith.constant 39 : index
    %222 = memref.load %arg1[%c39] : memref<243xf32, #tpu.memory_space<smem>>
    %223 = vector.broadcast %222 : f32 to vector<2x256xf32>
    %224 = arith.mulf %223, %217 : vector<2x256xf32>
    %225 = arith.addf %211, %224 : vector<2x256xf32>
    %c66 = arith.constant 66 : index
    %226 = memref.load %arg1[%c66] : memref<243xf32, #tpu.memory_space<smem>>
    %227 = vector.broadcast %226 : f32 to vector<2x256xf32>
    %228 = arith.mulf %227, %217 : vector<2x256xf32>
    %229 = arith.addf %215, %228 : vector<2x256xf32>
    %230 = vector.extract_strided_slice %174 {offsets = [0, 128], sizes = [2, 256], strides = [1, 1]} : vector<2x512xf32> to vector<2x256xf32>
    %c13 = arith.constant 13 : index
    %231 = memref.load %arg1[%c13] : memref<243xf32, #tpu.memory_space<smem>>
    %232 = vector.broadcast %231 : f32 to vector<2x256xf32>
    %233 = arith.mulf %232, %230 : vector<2x256xf32>
    %234 = arith.addf %221, %233 : vector<2x256xf32>
    %c40 = arith.constant 40 : index
    %235 = memref.load %arg1[%c40] : memref<243xf32, #tpu.memory_space<smem>>
    %236 = vector.broadcast %235 : f32 to vector<2x256xf32>
    %237 = arith.mulf %236, %230 : vector<2x256xf32>
    %238 = arith.addf %225, %237 : vector<2x256xf32>
    %c67 = arith.constant 67 : index
    %239 = memref.load %arg1[%c67] : memref<243xf32, #tpu.memory_space<smem>>
    %240 = vector.broadcast %239 : f32 to vector<2x256xf32>
    %241 = arith.mulf %240, %230 : vector<2x256xf32>
    %242 = arith.addf %229, %241 : vector<2x256xf32>
    %243 = vector.extract_strided_slice %174 {offsets = [0, 129], sizes = [2, 256], strides = [1, 1]} : vector<2x512xf32> to vector<2x256xf32>
    %244 = arith.mulf %243, %41 : vector<2x256xf32>
    %c14 = arith.constant 14 : index
    %245 = memref.load %arg1[%c14] : memref<243xf32, #tpu.memory_space<smem>>
    %246 = vector.broadcast %245 : f32 to vector<2x256xf32>
    %247 = arith.mulf %246, %244 : vector<2x256xf32>
    %248 = arith.addf %234, %247 : vector<2x256xf32>
    %c41 = arith.constant 41 : index
    %249 = memref.load %arg1[%c41] : memref<243xf32, #tpu.memory_space<smem>>
    %250 = vector.broadcast %249 : f32 to vector<2x256xf32>
    %251 = arith.mulf %250, %244 : vector<2x256xf32>
    %252 = arith.addf %238, %251 : vector<2x256xf32>
    %c68 = arith.constant 68 : index
    %253 = memref.load %arg1[%c68] : memref<243xf32, #tpu.memory_space<smem>>
    %254 = vector.broadcast %253 : f32 to vector<2x256xf32>
    %255 = arith.mulf %254, %244 : vector<2x256xf32>
    %256 = arith.addf %242, %255 : vector<2x256xf32>
    %257 = vector.extract_strided_slice %174 {offsets = [0, 143], sizes = [2, 256], strides = [1, 1]} : vector<2x512xf32> to vector<2x256xf32>
    %258 = arith.mulf %257, %37 : vector<2x256xf32>
    %c15 = arith.constant 15 : index
    %259 = memref.load %arg1[%c15] : memref<243xf32, #tpu.memory_space<smem>>
    %260 = vector.broadcast %259 : f32 to vector<2x256xf32>
    %261 = arith.mulf %260, %258 : vector<2x256xf32>
    %262 = arith.addf %248, %261 : vector<2x256xf32>
    %c42 = arith.constant 42 : index
    %263 = memref.load %arg1[%c42] : memref<243xf32, #tpu.memory_space<smem>>
    %264 = vector.broadcast %263 : f32 to vector<2x256xf32>
    %265 = arith.mulf %264, %258 : vector<2x256xf32>
    %266 = arith.addf %252, %265 : vector<2x256xf32>
    %c69 = arith.constant 69 : index
    %267 = memref.load %arg1[%c69] : memref<243xf32, #tpu.memory_space<smem>>
    %268 = vector.broadcast %267 : f32 to vector<2x256xf32>
    %269 = arith.mulf %268, %258 : vector<2x256xf32>
    %270 = arith.addf %256, %269 : vector<2x256xf32>
    %271 = vector.extract_strided_slice %174 {offsets = [0, 144], sizes = [2, 256], strides = [1, 1]} : vector<2x512xf32> to vector<2x256xf32>
    %c16 = arith.constant 16 : index
    %272 = memref.load %arg1[%c16] : memref<243xf32, #tpu.memory_space<smem>>
    %273 = vector.broadcast %272 : f32 to vector<2x256xf32>
    %274 = arith.mulf %273, %271 : vector<2x256xf32>
    %275 = arith.addf %262, %274 : vector<2x256xf32>
    %c43 = arith.constant 43 : index
    %276 = memref.load %arg1[%c43] : memref<243xf32, #tpu.memory_space<smem>>
    %277 = vector.broadcast %276 : f32 to vector<2x256xf32>
    %278 = arith.mulf %277, %271 : vector<2x256xf32>
    %279 = arith.addf %266, %278 : vector<2x256xf32>
    %c70 = arith.constant 70 : index
    %280 = memref.load %arg1[%c70] : memref<243xf32, #tpu.memory_space<smem>>
    %281 = vector.broadcast %280 : f32 to vector<2x256xf32>
    %282 = arith.mulf %281, %271 : vector<2x256xf32>
    %283 = arith.addf %270, %282 : vector<2x256xf32>
    %284 = vector.extract_strided_slice %174 {offsets = [0, 145], sizes = [2, 256], strides = [1, 1]} : vector<2x512xf32> to vector<2x256xf32>
    %285 = arith.mulf %284, %41 : vector<2x256xf32>
    %c17 = arith.constant 17 : index
    %286 = memref.load %arg1[%c17] : memref<243xf32, #tpu.memory_space<smem>>
    %287 = vector.broadcast %286 : f32 to vector<2x256xf32>
    %288 = arith.mulf %287, %285 : vector<2x256xf32>
    %289 = arith.addf %275, %288 : vector<2x256xf32>
    %c44 = arith.constant 44 : index
    %290 = memref.load %arg1[%c44] : memref<243xf32, #tpu.memory_space<smem>>
    %291 = vector.broadcast %290 : f32 to vector<2x256xf32>
    %292 = arith.mulf %291, %285 : vector<2x256xf32>
    %293 = arith.addf %279, %292 : vector<2x256xf32>
    %c71 = arith.constant 71 : index
    %294 = memref.load %arg1[%c71] : memref<243xf32, #tpu.memory_space<smem>>
    %295 = vector.broadcast %294 : f32 to vector<2x256xf32>
    %296 = arith.mulf %295, %285 : vector<2x256xf32>
    %297 = arith.addf %283, %296 : vector<2x256xf32>
    %c2_33 = arith.constant 2 : index
    %c0_34 = arith.constant 0 : index
    %c0_35 = arith.constant 0 : index
    %298 = vector.load %arg4[%c2_33, %c0_34, %c0_35] : memref<3x2x512xf32, #tpu.memory_space<vmem>>, vector<1x2x512xf32>
    %299 = vector.shape_cast %298 : vector<1x2x512xf32> to vector<2x512xf32>
    %300 = vector.extract_strided_slice %299 {offsets = [0, 111], sizes = [2, 256], strides = [1, 1]} : vector<2x512xf32> to vector<2x256xf32>
    %301 = arith.mulf %300, %37 : vector<2x256xf32>
    %c18 = arith.constant 18 : index
    %302 = memref.load %arg1[%c18] : memref<243xf32, #tpu.memory_space<smem>>
    %303 = vector.broadcast %302 : f32 to vector<2x256xf32>
    %304 = arith.mulf %303, %301 : vector<2x256xf32>
    %305 = arith.addf %289, %304 : vector<2x256xf32>
    %c45 = arith.constant 45 : index
    %306 = memref.load %arg1[%c45] : memref<243xf32, #tpu.memory_space<smem>>
    %307 = vector.broadcast %306 : f32 to vector<2x256xf32>
    %308 = arith.mulf %307, %301 : vector<2x256xf32>
    %309 = arith.addf %293, %308 : vector<2x256xf32>
    %c72 = arith.constant 72 : index
    %310 = memref.load %arg1[%c72] : memref<243xf32, #tpu.memory_space<smem>>
    %311 = vector.broadcast %310 : f32 to vector<2x256xf32>
    %312 = arith.mulf %311, %301 : vector<2x256xf32>
    %313 = arith.addf %297, %312 : vector<2x256xf32>
    %314 = vector.extract_strided_slice %299 {offsets = [0, 112], sizes = [2, 256], strides = [1, 1]} : vector<2x512xf32> to vector<2x256xf32>
    %c19 = arith.constant 19 : index
    %315 = memref.load %arg1[%c19] : memref<243xf32, #tpu.memory_space<smem>>
    %316 = vector.broadcast %315 : f32 to vector<2x256xf32>
    %317 = arith.mulf %316, %314 : vector<2x256xf32>
    %318 = arith.addf %305, %317 : vector<2x256xf32>
    %c46 = arith.constant 46 : index
    %319 = memref.load %arg1[%c46] : memref<243xf32, #tpu.memory_space<smem>>
    %320 = vector.broadcast %319 : f32 to vector<2x256xf32>
    %321 = arith.mulf %320, %314 : vector<2x256xf32>
    %322 = arith.addf %309, %321 : vector<2x256xf32>
    %c73 = arith.constant 73 : index
    %323 = memref.load %arg1[%c73] : memref<243xf32, #tpu.memory_space<smem>>
    %324 = vector.broadcast %323 : f32 to vector<2x256xf32>
    %325 = arith.mulf %324, %314 : vector<2x256xf32>
    %326 = arith.addf %313, %325 : vector<2x256xf32>
    %327 = vector.extract_strided_slice %299 {offsets = [0, 113], sizes = [2, 256], strides = [1, 1]} : vector<2x512xf32> to vector<2x256xf32>
    %328 = arith.mulf %327, %41 : vector<2x256xf32>
    %c20 = arith.constant 20 : index
    %329 = memref.load %arg1[%c20] : memref<243xf32, #tpu.memory_space<smem>>
    %330 = vector.broadcast %329 : f32 to vector<2x256xf32>
    %331 = arith.mulf %330, %328 : vector<2x256xf32>
    %332 = arith.addf %318, %331 : vector<2x256xf32>
    %c47 = arith.constant 47 : index
    %333 = memref.load %arg1[%c47] : memref<243xf32, #tpu.memory_space<smem>>
    %334 = vector.broadcast %333 : f32 to vector<2x256xf32>
    %335 = arith.mulf %334, %328 : vector<2x256xf32>
    %336 = arith.addf %322, %335 : vector<2x256xf32>
    %c74 = arith.constant 74 : index
    %337 = memref.load %arg1[%c74] : memref<243xf32, #tpu.memory_space<smem>>
    %338 = vector.broadcast %337 : f32 to vector<2x256xf32>
    %339 = arith.mulf %338, %328 : vector<2x256xf32>
    %340 = arith.addf %326, %339 : vector<2x256xf32>
    %341 = vector.extract_strided_slice %299 {offsets = [0, 127], sizes = [2, 256], strides = [1, 1]} : vector<2x512xf32> to vector<2x256xf32>
    %342 = arith.mulf %341, %37 : vector<2x256xf32>
    %c21 = arith.constant 21 : index
    %343 = memref.load %arg1[%c21] : memref<243xf32, #tpu.memory_space<smem>>
    %344 = vector.broadcast %343 : f32 to vector<2x256xf32>
    %345 = arith.mulf %344, %342 : vector<2x256xf32>
    %346 = arith.addf %332, %345 : vector<2x256xf32>
    %c48 = arith.constant 48 : index
    %347 = memref.load %arg1[%c48] : memref<243xf32, #tpu.memory_space<smem>>
    %348 = vector.broadcast %347 : f32 to vector<2x256xf32>
    %349 = arith.mulf %348, %342 : vector<2x256xf32>
    %350 = arith.addf %336, %349 : vector<2x256xf32>
    %c75 = arith.constant 75 : index
    %351 = memref.load %arg1[%c75] : memref<243xf32, #tpu.memory_space<smem>>
    %352 = vector.broadcast %351 : f32 to vector<2x256xf32>
    %353 = arith.mulf %352, %342 : vector<2x256xf32>
    %354 = arith.addf %340, %353 : vector<2x256xf32>
    %355 = vector.extract_strided_slice %299 {offsets = [0, 128], sizes = [2, 256], strides = [1, 1]} : vector<2x512xf32> to vector<2x256xf32>
    %c22 = arith.constant 22 : index
    %356 = memref.load %arg1[%c22] : memref<243xf32, #tpu.memory_space<smem>>
    %357 = vector.broadcast %356 : f32 to vector<2x256xf32>
    %358 = arith.mulf %357, %355 : vector<2x256xf32>
    %359 = arith.addf %346, %358 : vector<2x256xf32>
    %c49 = arith.constant 49 : index
    %360 = memref.load %arg1[%c49] : memref<243xf32, #tpu.memory_space<smem>>
    %361 = vector.broadcast %360 : f32 to vector<2x256xf32>
    %362 = arith.mulf %361, %355 : vector<2x256xf32>
    %363 = arith.addf %350, %362 : vector<2x256xf32>
    %c76 = arith.constant 76 : index
    %364 = memref.load %arg1[%c76] : memref<243xf32, #tpu.memory_space<smem>>
    %365 = vector.broadcast %364 : f32 to vector<2x256xf32>
    %366 = arith.mulf %365, %355 : vector<2x256xf32>
    %367 = arith.addf %354, %366 : vector<2x256xf32>
    %368 = vector.extract_strided_slice %299 {offsets = [0, 129], sizes = [2, 256], strides = [1, 1]} : vector<2x512xf32> to vector<2x256xf32>
    %369 = arith.mulf %368, %41 : vector<2x256xf32>
    %c23 = arith.constant 23 : index
    %370 = memref.load %arg1[%c23] : memref<243xf32, #tpu.memory_space<smem>>
    %371 = vector.broadcast %370 : f32 to vector<2x256xf32>
    %372 = arith.mulf %371, %369 : vector<2x256xf32>
    %373 = arith.addf %359, %372 : vector<2x256xf32>
    %c50 = arith.constant 50 : index
    %374 = memref.load %arg1[%c50] : memref<243xf32, #tpu.memory_space<smem>>
    %375 = vector.broadcast %374 : f32 to vector<2x256xf32>
    %376 = arith.mulf %375, %369 : vector<2x256xf32>
    %377 = arith.addf %363, %376 : vector<2x256xf32>
    %c77 = arith.constant 77 : index
    %378 = memref.load %arg1[%c77] : memref<243xf32, #tpu.memory_space<smem>>
    %379 = vector.broadcast %378 : f32 to vector<2x256xf32>
    %380 = arith.mulf %379, %369 : vector<2x256xf32>
    %381 = arith.addf %367, %380 : vector<2x256xf32>
    %382 = vector.extract_strided_slice %299 {offsets = [0, 143], sizes = [2, 256], strides = [1, 1]} : vector<2x512xf32> to vector<2x256xf32>
    %383 = arith.mulf %382, %37 : vector<2x256xf32>
    %c24 = arith.constant 24 : index
    %384 = memref.load %arg1[%c24] : memref<243xf32, #tpu.memory_space<smem>>
    %385 = vector.broadcast %384 : f32 to vector<2x256xf32>
    %386 = arith.mulf %385, %383 : vector<2x256xf32>
    %387 = arith.addf %373, %386 : vector<2x256xf32>
    %c51 = arith.constant 51 : index
    %388 = memref.load %arg1[%c51] : memref<243xf32, #tpu.memory_space<smem>>
    %389 = vector.broadcast %388 : f32 to vector<2x256xf32>
    %390 = arith.mulf %389, %383 : vector<2x256xf32>
    %391 = arith.addf %377, %390 : vector<2x256xf32>
    %c78 = arith.constant 78 : index
    %392 = memref.load %arg1[%c78] : memref<243xf32, #tpu.memory_space<smem>>
    %393 = vector.broadcast %392 : f32 to vector<2x256xf32>
    %394 = arith.mulf %393, %383 : vector<2x256xf32>
    %395 = arith.addf %381, %394 : vector<2x256xf32>
    %396 = vector.extract_strided_slice %299 {offsets = [0, 144], sizes = [2, 256], strides = [1, 1]} : vector<2x512xf32> to vector<2x256xf32>
    %c25 = arith.constant 25 : index
    %397 = memref.load %arg1[%c25] : memref<243xf32, #tpu.memory_space<smem>>
    %398 = vector.broadcast %397 : f32 to vector<2x256xf32>
    %399 = arith.mulf %398, %396 : vector<2x256xf32>
    %400 = arith.addf %387, %399 : vector<2x256xf32>
    %c52 = arith.constant 52 : index
    %401 = memref.load %arg1[%c52] : memref<243xf32, #tpu.memory_space<smem>>
    %402 = vector.broadcast %401 : f32 to vector<2x256xf32>
    %403 = arith.mulf %402, %396 : vector<2x256xf32>
    %404 = arith.addf %391, %403 : vector<2x256xf32>
    %c79 = arith.constant 79 : index
    %405 = memref.load %arg1[%c79] : memref<243xf32, #tpu.memory_space<smem>>
    %406 = vector.broadcast %405 : f32 to vector<2x256xf32>
    %407 = arith.mulf %406, %396 : vector<2x256xf32>
    %408 = arith.addf %395, %407 : vector<2x256xf32>
    %409 = vector.extract_strided_slice %299 {offsets = [0, 145], sizes = [2, 256], strides = [1, 1]} : vector<2x512xf32> to vector<2x256xf32>
    %410 = arith.mulf %409, %41 : vector<2x256xf32>
    %c26 = arith.constant 26 : index
    %411 = memref.load %arg1[%c26] : memref<243xf32, #tpu.memory_space<smem>>
    %412 = vector.broadcast %411 : f32 to vector<2x256xf32>
    %413 = arith.mulf %412, %410 : vector<2x256xf32>
    %414 = arith.addf %400, %413 : vector<2x256xf32>
    %c53 = arith.constant 53 : index
    %415 = memref.load %arg1[%c53] : memref<243xf32, #tpu.memory_space<smem>>
    %416 = vector.broadcast %415 : f32 to vector<2x256xf32>
    %417 = arith.mulf %416, %410 : vector<2x256xf32>
    %418 = arith.addf %404, %417 : vector<2x256xf32>
    %c80 = arith.constant 80 : index
    %419 = memref.load %arg1[%c80] : memref<243xf32, #tpu.memory_space<smem>>
    %420 = vector.broadcast %419 : f32 to vector<2x256xf32>
    %421 = arith.mulf %420, %410 : vector<2x256xf32>
    %422 = arith.addf %408, %421 : vector<2x256xf32>
    %c0_36 = arith.constant 0 : index
    %c0_37 = arith.constant 0 : index
    %c128_38 = arith.constant 128 : index
    %423 = vector.load %arg4[%c0_36, %c0_37, %c128_38] : memref<3x2x512xf32, #tpu.memory_space<vmem>>, vector<1x2x256xf32>
    %424 = vector.shape_cast %423 : vector<1x2x256xf32> to vector<2x256xf32>
    %425 = vector.shape_cast %414 : vector<2x256xf32> to vector<1x2x256xf32>
    tpu.vector_store %arg4[%c0_36, %c0_37, %c128_38], %425 {strides = array<i32>} : memref<3x2x512xf32, #tpu.memory_space<vmem>>, vector<1x2x256xf32>,
    %c1_39 = arith.constant 1 : index
    %c0_40 = arith.constant 0 : index
    %c128_41 = arith.constant 128 : index
    %426 = vector.load %arg4[%c1_39, %c0_40, %c128_41] : memref<3x2x512xf32, #tpu.memory_space<vmem>>, vector<1x2x256xf32>
    %427 = vector.shape_cast %426 : vector<1x2x256xf32> to vector<2x256xf32>
    %428 = vector.shape_cast %418 : vector<2x256xf32> to vector<1x2x256xf32>
    tpu.vector_store %arg4[%c1_39, %c0_40, %c128_41], %428 {strides = array<i32>} : memref<3x2x512xf32, #tpu.memory_space<vmem>>, vector<1x2x256xf32>,
    %c2_42 = arith.constant 2 : index
    %c0_43 = arith.constant 0 : index
    %c128_44 = arith.constant 128 : index
    %429 = vector.load %arg4[%c2_42, %c0_43, %c128_44] : memref<3x2x512xf32, #tpu.memory_space<vmem>>, vector<1x2x256xf32>
    %430 = vector.shape_cast %429 : vector<1x2x256xf32> to vector<2x256xf32>
    %431 = vector.shape_cast %422 : vector<2x256xf32> to vector<1x2x256xf32>
    tpu.vector_store %arg4[%c2_42, %c0_43, %c128_44], %431 {strides = array<i32>} : memref<3x2x512xf32, #tpu.memory_space<vmem>>, vector<1x2x256xf32>,
    %c3_45 = arith.constant 3 : index
    %432 = memref.load %arg2[%c3_45] : memref<9xf32, #tpu.memory_space<smem>>
    %433 = vector.broadcast %432 : f32 to vector<2x256xf32>
    %c4_46 = arith.constant 4 : index
    %434 = memref.load %arg2[%c4_46] : memref<9xf32, #tpu.memory_space<smem>>
    %435 = vector.broadcast %434 : f32 to vector<2x256xf32>
    %c5_47 = arith.constant 5 : index
    %436 = memref.load %arg2[%c5_47] : memref<9xf32, #tpu.memory_space<smem>>
    %437 = vector.broadcast %436 : f32 to vector<2x256xf32>
    %c0_48 = arith.constant 0 : index
    %c0_49 = arith.constant 0 : index
    %c0_50 = arith.constant 0 : index
    %438 = vector.load %arg4[%c0_48, %c0_49, %c0_50] : memref<3x2x512xf32, #tpu.memory_space<vmem>>, vector<1x2x512xf32>
    %439 = vector.shape_cast %438 : vector<1x2x512xf32> to vector<2x512xf32>
    %440 = vector.extract_strided_slice %439 {offsets = [0, 111], sizes = [2, 256], strides = [1, 1]} : vector<2x512xf32> to vector<2x256xf32>
    %441 = arith.mulf %440, %37 : vector<2x256xf32>
    %c81 = arith.constant 81 : index
    %442 = memref.load %arg1[%c81] : memref<243xf32, #tpu.memory_space<smem>>
    %443 = vector.broadcast %442 : f32 to vector<2x256xf32>
    %444 = arith.mulf %443, %441 : vector<2x256xf32>
    %445 = arith.addf %433, %444 : vector<2x256xf32>
    %c108 = arith.constant 108 : index
    %446 = memref.load %arg1[%c108] : memref<243xf32, #tpu.memory_space<smem>>
    %447 = vector.broadcast %446 : f32 to vector<2x256xf32>
    %448 = arith.mulf %447, %441 : vector<2x256xf32>
    %449 = arith.addf %435, %448 : vector<2x256xf32>
    %c135 = arith.constant 135 : index
    %450 = memref.load %arg1[%c135] : memref<243xf32, #tpu.memory_space<smem>>
    %451 = vector.broadcast %450 : f32 to vector<2x256xf32>
    %452 = arith.mulf %451, %441 : vector<2x256xf32>
    %453 = arith.addf %437, %452 : vector<2x256xf32>
    %454 = vector.extract_strided_slice %439 {offsets = [0, 112], sizes = [2, 256], strides = [1, 1]} : vector<2x512xf32> to vector<2x256xf32>
    %c82 = arith.constant 82 : index
    %455 = memref.load %arg1[%c82] : memref<243xf32, #tpu.memory_space<smem>>
    %456 = vector.broadcast %455 : f32 to vector<2x256xf32>
    %457 = arith.mulf %456, %454 : vector<2x256xf32>
    %458 = arith.addf %445, %457 : vector<2x256xf32>
    %c109 = arith.constant 109 : index
    %459 = memref.load %arg1[%c109] : memref<243xf32, #tpu.memory_space<smem>>
    %460 = vector.broadcast %459 : f32 to vector<2x256xf32>
    %461 = arith.mulf %460, %454 : vector<2x256xf32>
    %462 = arith.addf %449, %461 : vector<2x256xf32>
    %c136 = arith.constant 136 : index
    %463 = memref.load %arg1[%c136] : memref<243xf32, #tpu.memory_space<smem>>
    %464 = vector.broadcast %463 : f32 to vector<2x256xf32>
    %465 = arith.mulf %464, %454 : vector<2x256xf32>
    %466 = arith.addf %453, %465 : vector<2x256xf32>
    %467 = vector.extract_strided_slice %439 {offsets = [0, 113], sizes = [2, 256], strides = [1, 1]} : vector<2x512xf32> to vector<2x256xf32>
    %468 = arith.mulf %467, %41 : vector<2x256xf32>
    %c83 = arith.constant 83 : index
    %469 = memref.load %arg1[%c83] : memref<243xf32, #tpu.memory_space<smem>>
    %470 = vector.broadcast %469 : f32 to vector<2x256xf32>
    %471 = arith.mulf %470, %468 : vector<2x256xf32>
    %472 = arith.addf %458, %471 : vector<2x256xf32>
    %c110 = arith.constant 110 : index
    %473 = memref.load %arg1[%c110] : memref<243xf32, #tpu.memory_space<smem>>
    %474 = vector.broadcast %473 : f32 to vector<2x256xf32>
    %475 = arith.mulf %474, %468 : vector<2x256xf32>
    %476 = arith.addf %462, %475 : vector<2x256xf32>
    %c137 = arith.constant 137 : index
    %477 = memref.load %arg1[%c137] : memref<243xf32, #tpu.memory_space<smem>>
    %478 = vector.broadcast %477 : f32 to vector<2x256xf32>
    %479 = arith.mulf %478, %468 : vector<2x256xf32>
    %480 = arith.addf %466, %479 : vector<2x256xf32>
    %481 = vector.extract_strided_slice %439 {offsets = [0, 127], sizes = [2, 256], strides = [1, 1]} : vector<2x512xf32> to vector<2x256xf32>
    %482 = arith.mulf %481, %37 : vector<2x256xf32>
    %c84 = arith.constant 84 : index
    %483 = memref.load %arg1[%c84] : memref<243xf32, #tpu.memory_space<smem>>
    %484 = vector.broadcast %483 : f32 to vector<2x256xf32>
    %485 = arith.mulf %484, %482 : vector<2x256xf32>
    %486 = arith.addf %472, %485 : vector<2x256xf32>
    %c111 = arith.constant 111 : index
    %487 = memref.load %arg1[%c111] : memref<243xf32, #tpu.memory_space<smem>>
    %488 = vector.broadcast %487 : f32 to vector<2x256xf32>
    %489 = arith.mulf %488, %482 : vector<2x256xf32>
    %490 = arith.addf %476, %489 : vector<2x256xf32>
    %c138 = arith.constant 138 : index
    %491 = memref.load %arg1[%c138] : memref<243xf32, #tpu.memory_space<smem>>
    %492 = vector.broadcast %491 : f32 to vector<2x256xf32>
    %493 = arith.mulf %492, %482 : vector<2x256xf32>
    %494 = arith.addf %480, %493 : vector<2x256xf32>
    %495 = vector.extract_strided_slice %439 {offsets = [0, 128], sizes = [2, 256], strides = [1, 1]} : vector<2x512xf32> to vector<2x256xf32>
    %c85 = arith.constant 85 : index
    %496 = memref.load %arg1[%c85] : memref<243xf32, #tpu.memory_space<smem>>
    %497 = vector.broadcast %496 : f32 to vector<2x256xf32>
    %498 = arith.mulf %497, %495 : vector<2x256xf32>
    %499 = arith.addf %486, %498 : vector<2x256xf32>
    %c112 = arith.constant 112 : index
    %500 = memref.load %arg1[%c112] : memref<243xf32, #tpu.memory_space<smem>>
    %501 = vector.broadcast %500 : f32 to vector<2x256xf32>
    %502 = arith.mulf %501, %495 : vector<2x256xf32>
    %503 = arith.addf %490, %502 : vector<2x256xf32>
    %c139 = arith.constant 139 : index
    %504 = memref.load %arg1[%c139] : memref<243xf32, #tpu.memory_space<smem>>
    %505 = vector.broadcast %504 : f32 to vector<2x256xf32>
    %506 = arith.mulf %505, %495 : vector<2x256xf32>
    %507 = arith.addf %494, %506 : vector<2x256xf32>
    %508 = vector.extract_strided_slice %439 {offsets = [0, 129], sizes = [2, 256], strides = [1, 1]} : vector<2x512xf32> to vector<2x256xf32>
    %509 = arith.mulf %508, %41 : vector<2x256xf32>
    %c86 = arith.constant 86 : index
    %510 = memref.load %arg1[%c86] : memref<243xf32, #tpu.memory_space<smem>>
    %511 = vector.broadcast %510 : f32 to vector<2x256xf32>
    %512 = arith.mulf %511, %509 : vector<2x256xf32>
    %513 = arith.addf %499, %512 : vector<2x256xf32>
    %c113 = arith.constant 113 : index
    %514 = memref.load %arg1[%c113] : memref<243xf32, #tpu.memory_space<smem>>
    %515 = vector.broadcast %514 : f32 to vector<2x256xf32>
    %516 = arith.mulf %515, %509 : vector<2x256xf32>
    %517 = arith.addf %503, %516 : vector<2x256xf32>
    %c140 = arith.constant 140 : index
    %518 = memref.load %arg1[%c140] : memref<243xf32, #tpu.memory_space<smem>>
    %519 = vector.broadcast %518 : f32 to vector<2x256xf32>
    %520 = arith.mulf %519, %509 : vector<2x256xf32>
    %521 = arith.addf %507, %520 : vector<2x256xf32>
    %522 = vector.extract_strided_slice %439 {offsets = [0, 143], sizes = [2, 256], strides = [1, 1]} : vector<2x512xf32> to vector<2x256xf32>
    %523 = arith.mulf %522, %37 : vector<2x256xf32>
    %c87 = arith.constant 87 : index
    %524 = memref.load %arg1[%c87] : memref<243xf32, #tpu.memory_space<smem>>
    %525 = vector.broadcast %524 : f32 to vector<2x256xf32>
    %526 = arith.mulf %525, %523 : vector<2x256xf32>
    %527 = arith.addf %513, %526 : vector<2x256xf32>
    %c114 = arith.constant 114 : index
    %528 = memref.load %arg1[%c114] : memref<243xf32, #tpu.memory_space<smem>>
    %529 = vector.broadcast %528 : f32 to vector<2x256xf32>
    %530 = arith.mulf %529, %523 : vector<2x256xf32>
    %531 = arith.addf %517, %530 : vector<2x256xf32>
    %c141 = arith.constant 141 : index
    %532 = memref.load %arg1[%c141] : memref<243xf32, #tpu.memory_space<smem>>
    %533 = vector.broadcast %532 : f32 to vector<2x256xf32>
    %534 = arith.mulf %533, %523 : vector<2x256xf32>
    %535 = arith.addf %521, %534 : vector<2x256xf32>
    %536 = vector.extract_strided_slice %439 {offsets = [0, 144], sizes = [2, 256], strides = [1, 1]} : vector<2x512xf32> to vector<2x256xf32>
    %c88 = arith.constant 88 : index
    %537 = memref.load %arg1[%c88] : memref<243xf32, #tpu.memory_space<smem>>
    %538 = vector.broadcast %537 : f32 to vector<2x256xf32>
    %539 = arith.mulf %538, %536 : vector<2x256xf32>
    %540 = arith.addf %527, %539 : vector<2x256xf32>
    %c115 = arith.constant 115 : index
    %541 = memref.load %arg1[%c115] : memref<243xf32, #tpu.memory_space<smem>>
    %542 = vector.broadcast %541 : f32 to vector<2x256xf32>
    %543 = arith.mulf %542, %536 : vector<2x256xf32>
    %544 = arith.addf %531, %543 : vector<2x256xf32>
    %c142 = arith.constant 142 : index
    %545 = memref.load %arg1[%c142] : memref<243xf32, #tpu.memory_space<smem>>
    %546 = vector.broadcast %545 : f32 to vector<2x256xf32>
    %547 = arith.mulf %546, %536 : vector<2x256xf32>
    %548 = arith.addf %535, %547 : vector<2x256xf32>
    %549 = vector.extract_strided_slice %439 {offsets = [0, 145], sizes = [2, 256], strides = [1, 1]} : vector<2x512xf32> to vector<2x256xf32>
    %550 = arith.mulf %549, %41 : vector<2x256xf32>
    %c89 = arith.constant 89 : index
    %551 = memref.load %arg1[%c89] : memref<243xf32, #tpu.memory_space<smem>>
    %552 = vector.broadcast %551 : f32 to vector<2x256xf32>
    %553 = arith.mulf %552, %550 : vector<2x256xf32>
    %554 = arith.addf %540, %553 : vector<2x256xf32>
    %c116 = arith.constant 116 : index
    %555 = memref.load %arg1[%c116] : memref<243xf32, #tpu.memory_space<smem>>
    %556 = vector.broadcast %555 : f32 to vector<2x256xf32>
    %557 = arith.mulf %556, %550 : vector<2x256xf32>
    %558 = arith.addf %544, %557 : vector<2x256xf32>
    %c143 = arith.constant 143 : index
    %559 = memref.load %arg1[%c143] : memref<243xf32, #tpu.memory_space<smem>>
    %560 = vector.broadcast %559 : f32 to vector<2x256xf32>
    %561 = arith.mulf %560, %550 : vector<2x256xf32>
    %562 = arith.addf %548, %561 : vector<2x256xf32>
    %c1_51 = arith.constant 1 : index
    %c0_52 = arith.constant 0 : index
    %c0_53 = arith.constant 0 : index
    %563 = vector.load %arg4[%c1_51, %c0_52, %c0_53] : memref<3x2x512xf32, #tpu.memory_space<vmem>>, vector<1x2x512xf32>
    %564 = vector.shape_cast %563 : vector<1x2x512xf32> to vector<2x512xf32>
    %565 = vector.extract_strided_slice %564 {offsets = [0, 111], sizes = [2, 256], strides = [1, 1]} : vector<2x512xf32> to vector<2x256xf32>
    %566 = arith.mulf %565, %37 : vector<2x256xf32>
    %c90 = arith.constant 90 : index
    %567 = memref.load %arg1[%c90] : memref<243xf32, #tpu.memory_space<smem>>
    %568 = vector.broadcast %567 : f32 to vector<2x256xf32>
    %569 = arith.mulf %568, %566 : vector<2x256xf32>
    %570 = arith.addf %554, %569 : vector<2x256xf32>
    %c117 = arith.constant 117 : index
    %571 = memref.load %arg1[%c117] : memref<243xf32, #tpu.memory_space<smem>>
    %572 = vector.broadcast %571 : f32 to vector<2x256xf32>
    %573 = arith.mulf %572, %566 : vector<2x256xf32>
    %574 = arith.addf %558, %573 : vector<2x256xf32>
    %c144 = arith.constant 144 : index
    %575 = memref.load %arg1[%c144] : memref<243xf32, #tpu.memory_space<smem>>
    %576 = vector.broadcast %575 : f32 to vector<2x256xf32>
    %577 = arith.mulf %576, %566 : vector<2x256xf32>
    %578 = arith.addf %562, %577 : vector<2x256xf32>
    %579 = vector.extract_strided_slice %564 {offsets = [0, 112], sizes = [2, 256], strides = [1, 1]} : vector<2x512xf32> to vector<2x256xf32>
    %c91 = arith.constant 91 : index
    %580 = memref.load %arg1[%c91] : memref<243xf32, #tpu.memory_space<smem>>
    %581 = vector.broadcast %580 : f32 to vector<2x256xf32>
    %582 = arith.mulf %581, %579 : vector<2x256xf32>
    %583 = arith.addf %570, %582 : vector<2x256xf32>
    %c118 = arith.constant 118 : index
    %584 = memref.load %arg1[%c118] : memref<243xf32, #tpu.memory_space<smem>>
    %585 = vector.broadcast %584 : f32 to vector<2x256xf32>
    %586 = arith.mulf %585, %579 : vector<2x256xf32>
    %587 = arith.addf %574, %586 : vector<2x256xf32>
    %c145 = arith.constant 145 : index
    %588 = memref.load %arg1[%c145] : memref<243xf32, #tpu.memory_space<smem>>
    %589 = vector.broadcast %588 : f32 to vector<2x256xf32>
    %590 = arith.mulf %589, %579 : vector<2x256xf32>
    %591 = arith.addf %578, %590 : vector<2x256xf32>
    %592 = vector.extract_strided_slice %564 {offsets = [0, 113], sizes = [2, 256], strides = [1, 1]} : vector<2x512xf32> to vector<2x256xf32>
    %593 = arith.mulf %592, %41 : vector<2x256xf32>
    %c92 = arith.constant 92 : index
    %594 = memref.load %arg1[%c92] : memref<243xf32, #tpu.memory_space<smem>>
    %595 = vector.broadcast %594 : f32 to vector<2x256xf32>
    %596 = arith.mulf %595, %593 : vector<2x256xf32>
    %597 = arith.addf %583, %596 : vector<2x256xf32>
    %c119 = arith.constant 119 : index
    %598 = memref.load %arg1[%c119] : memref<243xf32, #tpu.memory_space<smem>>
    %599 = vector.broadcast %598 : f32 to vector<2x256xf32>
    %600 = arith.mulf %599, %593 : vector<2x256xf32>
    %601 = arith.addf %587, %600 : vector<2x256xf32>
    %c146 = arith.constant 146 : index
    %602 = memref.load %arg1[%c146] : memref<243xf32, #tpu.memory_space<smem>>
    %603 = vector.broadcast %602 : f32 to vector<2x256xf32>
    %604 = arith.mulf %603, %593 : vector<2x256xf32>
    %605 = arith.addf %591, %604 : vector<2x256xf32>
    %606 = vector.extract_strided_slice %564 {offsets = [0, 127], sizes = [2, 256], strides = [1, 1]} : vector<2x512xf32> to vector<2x256xf32>
    %607 = arith.mulf %606, %37 : vector<2x256xf32>
    %c93 = arith.constant 93 : index
    %608 = memref.load %arg1[%c93] : memref<243xf32, #tpu.memory_space<smem>>
    %609 = vector.broadcast %608 : f32 to vector<2x256xf32>
    %610 = arith.mulf %609, %607 : vector<2x256xf32>
    %611 = arith.addf %597, %610 : vector<2x256xf32>
    %c120 = arith.constant 120 : index
    %612 = memref.load %arg1[%c120] : memref<243xf32, #tpu.memory_space<smem>>
    %613 = vector.broadcast %612 : f32 to vector<2x256xf32>
    %614 = arith.mulf %613, %607 : vector<2x256xf32>
    %615 = arith.addf %601, %614 : vector<2x256xf32>
    %c147 = arith.constant 147 : index
    %616 = memref.load %arg1[%c147] : memref<243xf32, #tpu.memory_space<smem>>
    %617 = vector.broadcast %616 : f32 to vector<2x256xf32>
    %618 = arith.mulf %617, %607 : vector<2x256xf32>
    %619 = arith.addf %605, %618 : vector<2x256xf32>
    %620 = vector.extract_strided_slice %564 {offsets = [0, 128], sizes = [2, 256], strides = [1, 1]} : vector<2x512xf32> to vector<2x256xf32>
    %c94 = arith.constant 94 : index
    %621 = memref.load %arg1[%c94] : memref<243xf32, #tpu.memory_space<smem>>
    %622 = vector.broadcast %621 : f32 to vector<2x256xf32>
    %623 = arith.mulf %622, %620 : vector<2x256xf32>
    %624 = arith.addf %611, %623 : vector<2x256xf32>
    %c121 = arith.constant 121 : index
    %625 = memref.load %arg1[%c121] : memref<243xf32, #tpu.memory_space<smem>>
    %626 = vector.broadcast %625 : f32 to vector<2x256xf32>
    %627 = arith.mulf %626, %620 : vector<2x256xf32>
    %628 = arith.addf %615, %627 : vector<2x256xf32>
    %c148 = arith.constant 148 : index
    %629 = memref.load %arg1[%c148] : memref<243xf32, #tpu.memory_space<smem>>
    %630 = vector.broadcast %629 : f32 to vector<2x256xf32>
    %631 = arith.mulf %630, %620 : vector<2x256xf32>
    %632 = arith.addf %619, %631 : vector<2x256xf32>
    %633 = vector.extract_strided_slice %564 {offsets = [0, 129], sizes = [2, 256], strides = [1, 1]} : vector<2x512xf32> to vector<2x256xf32>
    %634 = arith.mulf %633, %41 : vector<2x256xf32>
    %c95 = arith.constant 95 : index
    %635 = memref.load %arg1[%c95] : memref<243xf32, #tpu.memory_space<smem>>
    %636 = vector.broadcast %635 : f32 to vector<2x256xf32>
    %637 = arith.mulf %636, %634 : vector<2x256xf32>
    %638 = arith.addf %624, %637 : vector<2x256xf32>
    %c122 = arith.constant 122 : index
    %639 = memref.load %arg1[%c122] : memref<243xf32, #tpu.memory_space<smem>>
    %640 = vector.broadcast %639 : f32 to vector<2x256xf32>
    %641 = arith.mulf %640, %634 : vector<2x256xf32>
    %642 = arith.addf %628, %641 : vector<2x256xf32>
    %c149 = arith.constant 149 : index
    %643 = memref.load %arg1[%c149] : memref<243xf32, #tpu.memory_space<smem>>
    %644 = vector.broadcast %643 : f32 to vector<2x256xf32>
    %645 = arith.mulf %644, %634 : vector<2x256xf32>
    %646 = arith.addf %632, %645 : vector<2x256xf32>
    %647 = vector.extract_strided_slice %564 {offsets = [0, 143], sizes = [2, 256], strides = [1, 1]} : vector<2x512xf32> to vector<2x256xf32>
    %648 = arith.mulf %647, %37 : vector<2x256xf32>
    %c96 = arith.constant 96 : index
    %649 = memref.load %arg1[%c96] : memref<243xf32, #tpu.memory_space<smem>>
    %650 = vector.broadcast %649 : f32 to vector<2x256xf32>
    %651 = arith.mulf %650, %648 : vector<2x256xf32>
    %652 = arith.addf %638, %651 : vector<2x256xf32>
    %c123 = arith.constant 123 : index
    %653 = memref.load %arg1[%c123] : memref<243xf32, #tpu.memory_space<smem>>
    %654 = vector.broadcast %653 : f32 to vector<2x256xf32>
    %655 = arith.mulf %654, %648 : vector<2x256xf32>
    %656 = arith.addf %642, %655 : vector<2x256xf32>
    %c150 = arith.constant 150 : index
    %657 = memref.load %arg1[%c150] : memref<243xf32, #tpu.memory_space<smem>>
    %658 = vector.broadcast %657 : f32 to vector<2x256xf32>
    %659 = arith.mulf %658, %648 : vector<2x256xf32>
    %660 = arith.addf %646, %659 : vector<2x256xf32>
    %661 = vector.extract_strided_slice %564 {offsets = [0, 144], sizes = [2, 256], strides = [1, 1]} : vector<2x512xf32> to vector<2x256xf32>
    %c97 = arith.constant 97 : index
    %662 = memref.load %arg1[%c97] : memref<243xf32, #tpu.memory_space<smem>>
    %663 = vector.broadcast %662 : f32 to vector<2x256xf32>
    %664 = arith.mulf %663, %661 : vector<2x256xf32>
    %665 = arith.addf %652, %664 : vector<2x256xf32>
    %c124 = arith.constant 124 : index
    %666 = memref.load %arg1[%c124] : memref<243xf32, #tpu.memory_space<smem>>
    %667 = vector.broadcast %666 : f32 to vector<2x256xf32>
    %668 = arith.mulf %667, %661 : vector<2x256xf32>
    %669 = arith.addf %656, %668 : vector<2x256xf32>
    %c151 = arith.constant 151 : index
    %670 = memref.load %arg1[%c151] : memref<243xf32, #tpu.memory_space<smem>>
    %671 = vector.broadcast %670 : f32 to vector<2x256xf32>
    %672 = arith.mulf %671, %661 : vector<2x256xf32>
    %673 = arith.addf %660, %672 : vector<2x256xf32>
    %674 = vector.extract_strided_slice %564 {offsets = [0, 145], sizes = [2, 256], strides = [1, 1]} : vector<2x512xf32> to vector<2x256xf32>
    %675 = arith.mulf %674, %41 : vector<2x256xf32>
    %c98 = arith.constant 98 : index
    %676 = memref.load %arg1[%c98] : memref<243xf32, #tpu.memory_space<smem>>
    %677 = vector.broadcast %676 : f32 to vector<2x256xf32>
    %678 = arith.mulf %677, %675 : vector<2x256xf32>
    %679 = arith.addf %665, %678 : vector<2x256xf32>
    %c125 = arith.constant 125 : index
    %680 = memref.load %arg1[%c125] : memref<243xf32, #tpu.memory_space<smem>>
    %681 = vector.broadcast %680 : f32 to vector<2x256xf32>
    %682 = arith.mulf %681, %675 : vector<2x256xf32>
    %683 = arith.addf %669, %682 : vector<2x256xf32>
    %c152 = arith.constant 152 : index
    %684 = memref.load %arg1[%c152] : memref<243xf32, #tpu.memory_space<smem>>
    %685 = vector.broadcast %684 : f32 to vector<2x256xf32>
    %686 = arith.mulf %685, %675 : vector<2x256xf32>
    %687 = arith.addf %673, %686 : vector<2x256xf32>
    %c2_54 = arith.constant 2 : index
    %c0_55 = arith.constant 0 : index
    %c0_56 = arith.constant 0 : index
    %688 = vector.load %arg4[%c2_54, %c0_55, %c0_56] : memref<3x2x512xf32, #tpu.memory_space<vmem>>, vector<1x2x512xf32>
    %689 = vector.shape_cast %688 : vector<1x2x512xf32> to vector<2x512xf32>
    %690 = vector.extract_strided_slice %689 {offsets = [0, 111], sizes = [2, 256], strides = [1, 1]} : vector<2x512xf32> to vector<2x256xf32>
    %691 = arith.mulf %690, %37 : vector<2x256xf32>
    %c99 = arith.constant 99 : index
    %692 = memref.load %arg1[%c99] : memref<243xf32, #tpu.memory_space<smem>>
    %693 = vector.broadcast %692 : f32 to vector<2x256xf32>
    %694 = arith.mulf %693, %691 : vector<2x256xf32>
    %695 = arith.addf %679, %694 : vector<2x256xf32>
    %c126 = arith.constant 126 : index
    %696 = memref.load %arg1[%c126] : memref<243xf32, #tpu.memory_space<smem>>
    %697 = vector.broadcast %696 : f32 to vector<2x256xf32>
    %698 = arith.mulf %697, %691 : vector<2x256xf32>
    %699 = arith.addf %683, %698 : vector<2x256xf32>
    %c153 = arith.constant 153 : index
    %700 = memref.load %arg1[%c153] : memref<243xf32, #tpu.memory_space<smem>>
    %701 = vector.broadcast %700 : f32 to vector<2x256xf32>
    %702 = arith.mulf %701, %691 : vector<2x256xf32>
    %703 = arith.addf %687, %702 : vector<2x256xf32>
    %704 = vector.extract_strided_slice %689 {offsets = [0, 112], sizes = [2, 256], strides = [1, 1]} : vector<2x512xf32> to vector<2x256xf32>
    %c100 = arith.constant 100 : index
    %705 = memref.load %arg1[%c100] : memref<243xf32, #tpu.memory_space<smem>>
    %706 = vector.broadcast %705 : f32 to vector<2x256xf32>
    %707 = arith.mulf %706, %704 : vector<2x256xf32>
    %708 = arith.addf %695, %707 : vector<2x256xf32>
    %c127 = arith.constant 127 : index
    %709 = memref.load %arg1[%c127] : memref<243xf32, #tpu.memory_space<smem>>
    %710 = vector.broadcast %709 : f32 to vector<2x256xf32>
    %711 = arith.mulf %710, %704 : vector<2x256xf32>
    %712 = arith.addf %699, %711 : vector<2x256xf32>
    %c154 = arith.constant 154 : index
    %713 = memref.load %arg1[%c154] : memref<243xf32, #tpu.memory_space<smem>>
    %714 = vector.broadcast %713 : f32 to vector<2x256xf32>
    %715 = arith.mulf %714, %704 : vector<2x256xf32>
    %716 = arith.addf %703, %715 : vector<2x256xf32>
    %717 = vector.extract_strided_slice %689 {offsets = [0, 113], sizes = [2, 256], strides = [1, 1]} : vector<2x512xf32> to vector<2x256xf32>
    %718 = arith.mulf %717, %41 : vector<2x256xf32>
    %c101 = arith.constant 101 : index
    %719 = memref.load %arg1[%c101] : memref<243xf32, #tpu.memory_space<smem>>
    %720 = vector.broadcast %719 : f32 to vector<2x256xf32>
    %721 = arith.mulf %720, %718 : vector<2x256xf32>
    %722 = arith.addf %708, %721 : vector<2x256xf32>
    %c128_57 = arith.constant 128 : index
    %723 = memref.load %arg1[%c128_57] : memref<243xf32, #tpu.memory_space<smem>>
    %724 = vector.broadcast %723 : f32 to vector<2x256xf32>
    %725 = arith.mulf %724, %718 : vector<2x256xf32>
    %726 = arith.addf %712, %725 : vector<2x256xf32>
    %c155 = arith.constant 155 : index
    %727 = memref.load %arg1[%c155] : memref<243xf32, #tpu.memory_space<smem>>
    %728 = vector.broadcast %727 : f32 to vector<2x256xf32>
    %729 = arith.mulf %728, %718 : vector<2x256xf32>
    %730 = arith.addf %716, %729 : vector<2x256xf32>
    %731 = vector.extract_strided_slice %689 {offsets = [0, 127], sizes = [2, 256], strides = [1, 1]} : vector<2x512xf32> to vector<2x256xf32>
    %732 = arith.mulf %731, %37 : vector<2x256xf32>
    %c102 = arith.constant 102 : index
    %733 = memref.load %arg1[%c102] : memref<243xf32, #tpu.memory_space<smem>>
    %734 = vector.broadcast %733 : f32 to vector<2x256xf32>
    %735 = arith.mulf %734, %732 : vector<2x256xf32>
    %736 = arith.addf %722, %735 : vector<2x256xf32>
    %c129 = arith.constant 129 : index
    %737 = memref.load %arg1[%c129] : memref<243xf32, #tpu.memory_space<smem>>
    %738 = vector.broadcast %737 : f32 to vector<2x256xf32>
    %739 = arith.mulf %738, %732 : vector<2x256xf32>
    %740 = arith.addf %726, %739 : vector<2x256xf32>
    %c156 = arith.constant 156 : index
    %741 = memref.load %arg1[%c156] : memref<243xf32, #tpu.memory_space<smem>>
    %742 = vector.broadcast %741 : f32 to vector<2x256xf32>
    %743 = arith.mulf %742, %732 : vector<2x256xf32>
    %744 = arith.addf %730, %743 : vector<2x256xf32>
    %745 = vector.extract_strided_slice %689 {offsets = [0, 128], sizes = [2, 256], strides = [1, 1]} : vector<2x512xf32> to vector<2x256xf32>
    %c103 = arith.constant 103 : index
    %746 = memref.load %arg1[%c103] : memref<243xf32, #tpu.memory_space<smem>>
    %747 = vector.broadcast %746 : f32 to vector<2x256xf32>
    %748 = arith.mulf %747, %745 : vector<2x256xf32>
    %749 = arith.addf %736, %748 : vector<2x256xf32>
    %c130 = arith.constant 130 : index
    %750 = memref.load %arg1[%c130] : memref<243xf32, #tpu.memory_space<smem>>
    %751 = vector.broadcast %750 : f32 to vector<2x256xf32>
    %752 = arith.mulf %751, %745 : vector<2x256xf32>
    %753 = arith.addf %740, %752 : vector<2x256xf32>
    %c157 = arith.constant 157 : index
    %754 = memref.load %arg1[%c157] : memref<243xf32, #tpu.memory_space<smem>>
    %755 = vector.broadcast %754 : f32 to vector<2x256xf32>
    %756 = arith.mulf %755, %745 : vector<2x256xf32>
    %757 = arith.addf %744, %756 : vector<2x256xf32>
    %758 = vector.extract_strided_slice %689 {offsets = [0, 129], sizes = [2, 256], strides = [1, 1]} : vector<2x512xf32> to vector<2x256xf32>
    %759 = arith.mulf %758, %41 : vector<2x256xf32>
    %c104 = arith.constant 104 : index
    %760 = memref.load %arg1[%c104] : memref<243xf32, #tpu.memory_space<smem>>
    %761 = vector.broadcast %760 : f32 to vector<2x256xf32>
    %762 = arith.mulf %761, %759 : vector<2x256xf32>
    %763 = arith.addf %749, %762 : vector<2x256xf32>
    %c131 = arith.constant 131 : index
    %764 = memref.load %arg1[%c131] : memref<243xf32, #tpu.memory_space<smem>>
    %765 = vector.broadcast %764 : f32 to vector<2x256xf32>
    %766 = arith.mulf %765, %759 : vector<2x256xf32>
    %767 = arith.addf %753, %766 : vector<2x256xf32>
    %c158 = arith.constant 158 : index
    %768 = memref.load %arg1[%c158] : memref<243xf32, #tpu.memory_space<smem>>
    %769 = vector.broadcast %768 : f32 to vector<2x256xf32>
    %770 = arith.mulf %769, %759 : vector<2x256xf32>
    %771 = arith.addf %757, %770 : vector<2x256xf32>
    %772 = vector.extract_strided_slice %689 {offsets = [0, 143], sizes = [2, 256], strides = [1, 1]} : vector<2x512xf32> to vector<2x256xf32>
    %773 = arith.mulf %772, %37 : vector<2x256xf32>
    %c105 = arith.constant 105 : index
    %774 = memref.load %arg1[%c105] : memref<243xf32, #tpu.memory_space<smem>>
    %775 = vector.broadcast %774 : f32 to vector<2x256xf32>
    %776 = arith.mulf %775, %773 : vector<2x256xf32>
    %777 = arith.addf %763, %776 : vector<2x256xf32>
    %c132 = arith.constant 132 : index
    %778 = memref.load %arg1[%c132] : memref<243xf32, #tpu.memory_space<smem>>
    %779 = vector.broadcast %778 : f32 to vector<2x256xf32>
    %780 = arith.mulf %779, %773 : vector<2x256xf32>
    %781 = arith.addf %767, %780 : vector<2x256xf32>
    %c159 = arith.constant 159 : index
    %782 = memref.load %arg1[%c159] : memref<243xf32, #tpu.memory_space<smem>>
    %783 = vector.broadcast %782 : f32 to vector<2x256xf32>
    %784 = arith.mulf %783, %773 : vector<2x256xf32>
    %785 = arith.addf %771, %784 : vector<2x256xf32>
    %786 = vector.extract_strided_slice %689 {offsets = [0, 144], sizes = [2, 256], strides = [1, 1]} : vector<2x512xf32> to vector<2x256xf32>
    %c106 = arith.constant 106 : index
    %787 = memref.load %arg1[%c106] : memref<243xf32, #tpu.memory_space<smem>>
    %788 = vector.broadcast %787 : f32 to vector<2x256xf32>
    %789 = arith.mulf %788, %786 : vector<2x256xf32>
    %790 = arith.addf %777, %789 : vector<2x256xf32>
    %c133 = arith.constant 133 : index
    %791 = memref.load %arg1[%c133] : memref<243xf32, #tpu.memory_space<smem>>
    %792 = vector.broadcast %791 : f32 to vector<2x256xf32>
    %793 = arith.mulf %792, %786 : vector<2x256xf32>
    %794 = arith.addf %781, %793 : vector<2x256xf32>
    %c160 = arith.constant 160 : index
    %795 = memref.load %arg1[%c160] : memref<243xf32, #tpu.memory_space<smem>>
    %796 = vector.broadcast %795 : f32 to vector<2x256xf32>
    %797 = arith.mulf %796, %786 : vector<2x256xf32>
    %798 = arith.addf %785, %797 : vector<2x256xf32>
    %799 = vector.extract_strided_slice %689 {offsets = [0, 145], sizes = [2, 256], strides = [1, 1]} : vector<2x512xf32> to vector<2x256xf32>
    %800 = arith.mulf %799, %41 : vector<2x256xf32>
    %c107 = arith.constant 107 : index
    %801 = memref.load %arg1[%c107] : memref<243xf32, #tpu.memory_space<smem>>
    %802 = vector.broadcast %801 : f32 to vector<2x256xf32>
    %803 = arith.mulf %802, %800 : vector<2x256xf32>
    %804 = arith.addf %790, %803 : vector<2x256xf32>
    %c134 = arith.constant 134 : index
    %805 = memref.load %arg1[%c134] : memref<243xf32, #tpu.memory_space<smem>>
    %806 = vector.broadcast %805 : f32 to vector<2x256xf32>
    %807 = arith.mulf %806, %800 : vector<2x256xf32>
    %808 = arith.addf %794, %807 : vector<2x256xf32>
    %c161 = arith.constant 161 : index
    %809 = memref.load %arg1[%c161] : memref<243xf32, #tpu.memory_space<smem>>
    %810 = vector.broadcast %809 : f32 to vector<2x256xf32>
    %811 = arith.mulf %810, %800 : vector<2x256xf32>
    %812 = arith.addf %798, %811 : vector<2x256xf32>
    %c0_58 = arith.constant 0 : index
    %c0_59 = arith.constant 0 : index
    %c128_60 = arith.constant 128 : index
    %813 = vector.load %arg4[%c0_58, %c0_59, %c128_60] : memref<3x2x512xf32, #tpu.memory_space<vmem>>, vector<1x2x256xf32>
    %814 = vector.shape_cast %813 : vector<1x2x256xf32> to vector<2x256xf32>
    %815 = vector.shape_cast %804 : vector<2x256xf32> to vector<1x2x256xf32>
    tpu.vector_store %arg4[%c0_58, %c0_59, %c128_60], %815 {strides = array<i32>} : memref<3x2x512xf32, #tpu.memory_space<vmem>>, vector<1x2x256xf32>,
    %c1_61 = arith.constant 1 : index
    %c0_62 = arith.constant 0 : index
    %c128_63 = arith.constant 128 : index
    %816 = vector.load %arg4[%c1_61, %c0_62, %c128_63] : memref<3x2x512xf32, #tpu.memory_space<vmem>>, vector<1x2x256xf32>
    %817 = vector.shape_cast %816 : vector<1x2x256xf32> to vector<2x256xf32>
    %818 = vector.shape_cast %808 : vector<2x256xf32> to vector<1x2x256xf32>
    tpu.vector_store %arg4[%c1_61, %c0_62, %c128_63], %818 {strides = array<i32>} : memref<3x2x512xf32, #tpu.memory_space<vmem>>, vector<1x2x256xf32>,
    %c2_64 = arith.constant 2 : index
    %c0_65 = arith.constant 0 : index
    %c128_66 = arith.constant 128 : index
    %819 = vector.load %arg4[%c2_64, %c0_65, %c128_66] : memref<3x2x512xf32, #tpu.memory_space<vmem>>, vector<1x2x256xf32>
    %820 = vector.shape_cast %819 : vector<1x2x256xf32> to vector<2x256xf32>
    %821 = vector.shape_cast %812 : vector<2x256xf32> to vector<1x2x256xf32>
    tpu.vector_store %arg4[%c2_64, %c0_65, %c128_66], %821 {strides = array<i32>} : memref<3x2x512xf32, #tpu.memory_space<vmem>>, vector<1x2x256xf32>,
    %c6_67 = arith.constant 6 : index
    %822 = memref.load %arg2[%c6_67] : memref<9xf32, #tpu.memory_space<smem>>
    %823 = vector.broadcast %822 : f32 to vector<2x256xf32>
    %c7_68 = arith.constant 7 : index
    %824 = memref.load %arg2[%c7_68] : memref<9xf32, #tpu.memory_space<smem>>
    %825 = vector.broadcast %824 : f32 to vector<2x256xf32>
    %c8_69 = arith.constant 8 : index
    %826 = memref.load %arg2[%c8_69] : memref<9xf32, #tpu.memory_space<smem>>
    %827 = vector.broadcast %826 : f32 to vector<2x256xf32>
    %c0_70 = arith.constant 0 : index
    %c0_71 = arith.constant 0 : index
    %c0_72 = arith.constant 0 : index
    %828 = vector.load %arg4[%c0_70, %c0_71, %c0_72] : memref<3x2x512xf32, #tpu.memory_space<vmem>>, vector<1x2x512xf32>
    %829 = vector.shape_cast %828 : vector<1x2x512xf32> to vector<2x512xf32>
    %830 = vector.extract_strided_slice %829 {offsets = [0, 111], sizes = [2, 256], strides = [1, 1]} : vector<2x512xf32> to vector<2x256xf32>
    %831 = arith.mulf %830, %37 : vector<2x256xf32>
    %c162 = arith.constant 162 : index
    %832 = memref.load %arg1[%c162] : memref<243xf32, #tpu.memory_space<smem>>
    %833 = vector.broadcast %832 : f32 to vector<2x256xf32>
    %834 = arith.mulf %833, %831 : vector<2x256xf32>
    %835 = arith.addf %823, %834 : vector<2x256xf32>
    %c189 = arith.constant 189 : index
    %836 = memref.load %arg1[%c189] : memref<243xf32, #tpu.memory_space<smem>>
    %837 = vector.broadcast %836 : f32 to vector<2x256xf32>
    %838 = arith.mulf %837, %831 : vector<2x256xf32>
    %839 = arith.addf %825, %838 : vector<2x256xf32>
    %c216 = arith.constant 216 : index
    %840 = memref.load %arg1[%c216] : memref<243xf32, #tpu.memory_space<smem>>
    %841 = vector.broadcast %840 : f32 to vector<2x256xf32>
    %842 = arith.mulf %841, %831 : vector<2x256xf32>
    %843 = arith.addf %827, %842 : vector<2x256xf32>
    %844 = vector.extract_strided_slice %829 {offsets = [0, 112], sizes = [2, 256], strides = [1, 1]} : vector<2x512xf32> to vector<2x256xf32>
    %c163 = arith.constant 163 : index
    %845 = memref.load %arg1[%c163] : memref<243xf32, #tpu.memory_space<smem>>
    %846 = vector.broadcast %845 : f32 to vector<2x256xf32>
    %847 = arith.mulf %846, %844 : vector<2x256xf32>
    %848 = arith.addf %835, %847 : vector<2x256xf32>
    %c190 = arith.constant 190 : index
    %849 = memref.load %arg1[%c190] : memref<243xf32, #tpu.memory_space<smem>>
    %850 = vector.broadcast %849 : f32 to vector<2x256xf32>
    %851 = arith.mulf %850, %844 : vector<2x256xf32>
    %852 = arith.addf %839, %851 : vector<2x256xf32>
    %c217 = arith.constant 217 : index
    %853 = memref.load %arg1[%c217] : memref<243xf32, #tpu.memory_space<smem>>
    %854 = vector.broadcast %853 : f32 to vector<2x256xf32>
    %855 = arith.mulf %854, %844 : vector<2x256xf32>
    %856 = arith.addf %843, %855 : vector<2x256xf32>
    %857 = vector.extract_strided_slice %829 {offsets = [0, 113], sizes = [2, 256], strides = [1, 1]} : vector<2x512xf32> to vector<2x256xf32>
    %858 = arith.mulf %857, %41 : vector<2x256xf32>
    %c164 = arith.constant 164 : index
    %859 = memref.load %arg1[%c164] : memref<243xf32, #tpu.memory_space<smem>>
    %860 = vector.broadcast %859 : f32 to vector<2x256xf32>
    %861 = arith.mulf %860, %858 : vector<2x256xf32>
    %862 = arith.addf %848, %861 : vector<2x256xf32>
    %c191 = arith.constant 191 : index
    %863 = memref.load %arg1[%c191] : memref<243xf32, #tpu.memory_space<smem>>
    %864 = vector.broadcast %863 : f32 to vector<2x256xf32>
    %865 = arith.mulf %864, %858 : vector<2x256xf32>
    %866 = arith.addf %852, %865 : vector<2x256xf32>
    %c218 = arith.constant 218 : index
    %867 = memref.load %arg1[%c218] : memref<243xf32, #tpu.memory_space<smem>>
    %868 = vector.broadcast %867 : f32 to vector<2x256xf32>
    %869 = arith.mulf %868, %858 : vector<2x256xf32>
    %870 = arith.addf %856, %869 : vector<2x256xf32>
    %871 = vector.extract_strided_slice %829 {offsets = [0, 127], sizes = [2, 256], strides = [1, 1]} : vector<2x512xf32> to vector<2x256xf32>
    %872 = arith.mulf %871, %37 : vector<2x256xf32>
    %c165 = arith.constant 165 : index
    %873 = memref.load %arg1[%c165] : memref<243xf32, #tpu.memory_space<smem>>
    %874 = vector.broadcast %873 : f32 to vector<2x256xf32>
    %875 = arith.mulf %874, %872 : vector<2x256xf32>
    %876 = arith.addf %862, %875 : vector<2x256xf32>
    %c192 = arith.constant 192 : index
    %877 = memref.load %arg1[%c192] : memref<243xf32, #tpu.memory_space<smem>>
    %878 = vector.broadcast %877 : f32 to vector<2x256xf32>
    %879 = arith.mulf %878, %872 : vector<2x256xf32>
    %880 = arith.addf %866, %879 : vector<2x256xf32>
    %c219 = arith.constant 219 : index
    %881 = memref.load %arg1[%c219] : memref<243xf32, #tpu.memory_space<smem>>
    %882 = vector.broadcast %881 : f32 to vector<2x256xf32>
    %883 = arith.mulf %882, %872 : vector<2x256xf32>
    %884 = arith.addf %870, %883 : vector<2x256xf32>
    %885 = vector.extract_strided_slice %829 {offsets = [0, 128], sizes = [2, 256], strides = [1, 1]} : vector<2x512xf32> to vector<2x256xf32>
    %c166 = arith.constant 166 : index
    %886 = memref.load %arg1[%c166] : memref<243xf32, #tpu.memory_space<smem>>
    %887 = vector.broadcast %886 : f32 to vector<2x256xf32>
    %888 = arith.mulf %887, %885 : vector<2x256xf32>
    %889 = arith.addf %876, %888 : vector<2x256xf32>
    %c193 = arith.constant 193 : index
    %890 = memref.load %arg1[%c193] : memref<243xf32, #tpu.memory_space<smem>>
    %891 = vector.broadcast %890 : f32 to vector<2x256xf32>
    %892 = arith.mulf %891, %885 : vector<2x256xf32>
    %893 = arith.addf %880, %892 : vector<2x256xf32>
    %c220 = arith.constant 220 : index
    %894 = memref.load %arg1[%c220] : memref<243xf32, #tpu.memory_space<smem>>
    %895 = vector.broadcast %894 : f32 to vector<2x256xf32>
    %896 = arith.mulf %895, %885 : vector<2x256xf32>
    %897 = arith.addf %884, %896 : vector<2x256xf32>
    %898 = vector.extract_strided_slice %829 {offsets = [0, 129], sizes = [2, 256], strides = [1, 1]} : vector<2x512xf32> to vector<2x256xf32>
    %899 = arith.mulf %898, %41 : vector<2x256xf32>
    %c167 = arith.constant 167 : index
    %900 = memref.load %arg1[%c167] : memref<243xf32, #tpu.memory_space<smem>>
    %901 = vector.broadcast %900 : f32 to vector<2x256xf32>
    %902 = arith.mulf %901, %899 : vector<2x256xf32>
    %903 = arith.addf %889, %902 : vector<2x256xf32>
    %c194 = arith.constant 194 : index
    %904 = memref.load %arg1[%c194] : memref<243xf32, #tpu.memory_space<smem>>
    %905 = vector.broadcast %904 : f32 to vector<2x256xf32>
    %906 = arith.mulf %905, %899 : vector<2x256xf32>
    %907 = arith.addf %893, %906 : vector<2x256xf32>
    %c221 = arith.constant 221 : index
    %908 = memref.load %arg1[%c221] : memref<243xf32, #tpu.memory_space<smem>>
    %909 = vector.broadcast %908 : f32 to vector<2x256xf32>
    %910 = arith.mulf %909, %899 : vector<2x256xf32>
    %911 = arith.addf %897, %910 : vector<2x256xf32>
    %912 = vector.extract_strided_slice %829 {offsets = [0, 143], sizes = [2, 256], strides = [1, 1]} : vector<2x512xf32> to vector<2x256xf32>
    %913 = arith.mulf %912, %37 : vector<2x256xf32>
    %c168 = arith.constant 168 : index
    %914 = memref.load %arg1[%c168] : memref<243xf32, #tpu.memory_space<smem>>
    %915 = vector.broadcast %914 : f32 to vector<2x256xf32>
    %916 = arith.mulf %915, %913 : vector<2x256xf32>
    %917 = arith.addf %903, %916 : vector<2x256xf32>
    %c195 = arith.constant 195 : index
    %918 = memref.load %arg1[%c195] : memref<243xf32, #tpu.memory_space<smem>>
    %919 = vector.broadcast %918 : f32 to vector<2x256xf32>
    %920 = arith.mulf %919, %913 : vector<2x256xf32>
    %921 = arith.addf %907, %920 : vector<2x256xf32>
    %c222 = arith.constant 222 : index
    %922 = memref.load %arg1[%c222] : memref<243xf32, #tpu.memory_space<smem>>
    %923 = vector.broadcast %922 : f32 to vector<2x256xf32>
    %924 = arith.mulf %923, %913 : vector<2x256xf32>
    %925 = arith.addf %911, %924 : vector<2x256xf32>
    %926 = vector.extract_strided_slice %829 {offsets = [0, 144], sizes = [2, 256], strides = [1, 1]} : vector<2x512xf32> to vector<2x256xf32>
    %c169 = arith.constant 169 : index
    %927 = memref.load %arg1[%c169] : memref<243xf32, #tpu.memory_space<smem>>
    %928 = vector.broadcast %927 : f32 to vector<2x256xf32>
    %929 = arith.mulf %928, %926 : vector<2x256xf32>
    %930 = arith.addf %917, %929 : vector<2x256xf32>
    %c196 = arith.constant 196 : index
    %931 = memref.load %arg1[%c196] : memref<243xf32, #tpu.memory_space<smem>>
    %932 = vector.broadcast %931 : f32 to vector<2x256xf32>
    %933 = arith.mulf %932, %926 : vector<2x256xf32>
    %934 = arith.addf %921, %933 : vector<2x256xf32>
    %c223 = arith.constant 223 : index
    %935 = memref.load %arg1[%c223] : memref<243xf32, #tpu.memory_space<smem>>
    %936 = vector.broadcast %935 : f32 to vector<2x256xf32>
    %937 = arith.mulf %936, %926 : vector<2x256xf32>
    %938 = arith.addf %925, %937 : vector<2x256xf32>
    %939 = vector.extract_strided_slice %829 {offsets = [0, 145], sizes = [2, 256], strides = [1, 1]} : vector<2x512xf32> to vector<2x256xf32>
    %940 = arith.mulf %939, %41 : vector<2x256xf32>
    %c170 = arith.constant 170 : index
    %941 = memref.load %arg1[%c170] : memref<243xf32, #tpu.memory_space<smem>>
    %942 = vector.broadcast %941 : f32 to vector<2x256xf32>
    %943 = arith.mulf %942, %940 : vector<2x256xf32>
    %944 = arith.addf %930, %943 : vector<2x256xf32>
    %c197 = arith.constant 197 : index
    %945 = memref.load %arg1[%c197] : memref<243xf32, #tpu.memory_space<smem>>
    %946 = vector.broadcast %945 : f32 to vector<2x256xf32>
    %947 = arith.mulf %946, %940 : vector<2x256xf32>
    %948 = arith.addf %934, %947 : vector<2x256xf32>
    %c224 = arith.constant 224 : index
    %949 = memref.load %arg1[%c224] : memref<243xf32, #tpu.memory_space<smem>>
    %950 = vector.broadcast %949 : f32 to vector<2x256xf32>
    %951 = arith.mulf %950, %940 : vector<2x256xf32>
    %952 = arith.addf %938, %951 : vector<2x256xf32>
    %c1_73 = arith.constant 1 : index
    %c0_74 = arith.constant 0 : index
    %c0_75 = arith.constant 0 : index
    %953 = vector.load %arg4[%c1_73, %c0_74, %c0_75] : memref<3x2x512xf32, #tpu.memory_space<vmem>>, vector<1x2x512xf32>
    %954 = vector.shape_cast %953 : vector<1x2x512xf32> to vector<2x512xf32>
    %955 = vector.extract_strided_slice %954 {offsets = [0, 111], sizes = [2, 256], strides = [1, 1]} : vector<2x512xf32> to vector<2x256xf32>
    %956 = arith.mulf %955, %37 : vector<2x256xf32>
    %c171 = arith.constant 171 : index
    %957 = memref.load %arg1[%c171] : memref<243xf32, #tpu.memory_space<smem>>
    %958 = vector.broadcast %957 : f32 to vector<2x256xf32>
    %959 = arith.mulf %958, %956 : vector<2x256xf32>
    %960 = arith.addf %944, %959 : vector<2x256xf32>
    %c198 = arith.constant 198 : index
    %961 = memref.load %arg1[%c198] : memref<243xf32, #tpu.memory_space<smem>>
    %962 = vector.broadcast %961 : f32 to vector<2x256xf32>
    %963 = arith.mulf %962, %956 : vector<2x256xf32>
    %964 = arith.addf %948, %963 : vector<2x256xf32>
    %c225 = arith.constant 225 : index
    %965 = memref.load %arg1[%c225] : memref<243xf32, #tpu.memory_space<smem>>
    %966 = vector.broadcast %965 : f32 to vector<2x256xf32>
    %967 = arith.mulf %966, %956 : vector<2x256xf32>
    %968 = arith.addf %952, %967 : vector<2x256xf32>
    %969 = vector.extract_strided_slice %954 {offsets = [0, 112], sizes = [2, 256], strides = [1, 1]} : vector<2x512xf32> to vector<2x256xf32>
    %c172 = arith.constant 172 : index
    %970 = memref.load %arg1[%c172] : memref<243xf32, #tpu.memory_space<smem>>
    %971 = vector.broadcast %970 : f32 to vector<2x256xf32>
    %972 = arith.mulf %971, %969 : vector<2x256xf32>
    %973 = arith.addf %960, %972 : vector<2x256xf32>
    %c199 = arith.constant 199 : index
    %974 = memref.load %arg1[%c199] : memref<243xf32, #tpu.memory_space<smem>>
    %975 = vector.broadcast %974 : f32 to vector<2x256xf32>
    %976 = arith.mulf %975, %969 : vector<2x256xf32>
    %977 = arith.addf %964, %976 : vector<2x256xf32>
    %c226 = arith.constant 226 : index
    %978 = memref.load %arg1[%c226] : memref<243xf32, #tpu.memory_space<smem>>
    %979 = vector.broadcast %978 : f32 to vector<2x256xf32>
    %980 = arith.mulf %979, %969 : vector<2x256xf32>
    %981 = arith.addf %968, %980 : vector<2x256xf32>
    %982 = vector.extract_strided_slice %954 {offsets = [0, 113], sizes = [2, 256], strides = [1, 1]} : vector<2x512xf32> to vector<2x256xf32>
    %983 = arith.mulf %982, %41 : vector<2x256xf32>
    %c173 = arith.constant 173 : index
    %984 = memref.load %arg1[%c173] : memref<243xf32, #tpu.memory_space<smem>>
    %985 = vector.broadcast %984 : f32 to vector<2x256xf32>
    %986 = arith.mulf %985, %983 : vector<2x256xf32>
    %987 = arith.addf %973, %986 : vector<2x256xf32>
    %c200 = arith.constant 200 : index
    %988 = memref.load %arg1[%c200] : memref<243xf32, #tpu.memory_space<smem>>
    %989 = vector.broadcast %988 : f32 to vector<2x256xf32>
    %990 = arith.mulf %989, %983 : vector<2x256xf32>
    %991 = arith.addf %977, %990 : vector<2x256xf32>
    %c227 = arith.constant 227 : index
    %992 = memref.load %arg1[%c227] : memref<243xf32, #tpu.memory_space<smem>>
    %993 = vector.broadcast %992 : f32 to vector<2x256xf32>
    %994 = arith.mulf %993, %983 : vector<2x256xf32>
    %995 = arith.addf %981, %994 : vector<2x256xf32>
    %996 = vector.extract_strided_slice %954 {offsets = [0, 127], sizes = [2, 256], strides = [1, 1]} : vector<2x512xf32> to vector<2x256xf32>
    %997 = arith.mulf %996, %37 : vector<2x256xf32>
    %c174 = arith.constant 174 : index
    %998 = memref.load %arg1[%c174] : memref<243xf32, #tpu.memory_space<smem>>
    %999 = vector.broadcast %998 : f32 to vector<2x256xf32>
    %1000 = arith.mulf %999, %997 : vector<2x256xf32>
    %1001 = arith.addf %987, %1000 : vector<2x256xf32>
    %c201 = arith.constant 201 : index
    %1002 = memref.load %arg1[%c201] : memref<243xf32, #tpu.memory_space<smem>>
    %1003 = vector.broadcast %1002 : f32 to vector<2x256xf32>
    %1004 = arith.mulf %1003, %997 : vector<2x256xf32>
    %1005 = arith.addf %991, %1004 : vector<2x256xf32>
    %c228 = arith.constant 228 : index
    %1006 = memref.load %arg1[%c228] : memref<243xf32, #tpu.memory_space<smem>>
    %1007 = vector.broadcast %1006 : f32 to vector<2x256xf32>
    %1008 = arith.mulf %1007, %997 : vector<2x256xf32>
    %1009 = arith.addf %995, %1008 : vector<2x256xf32>
    %1010 = vector.extract_strided_slice %954 {offsets = [0, 128], sizes = [2, 256], strides = [1, 1]} : vector<2x512xf32> to vector<2x256xf32>
    %c175 = arith.constant 175 : index
    %1011 = memref.load %arg1[%c175] : memref<243xf32, #tpu.memory_space<smem>>
    %1012 = vector.broadcast %1011 : f32 to vector<2x256xf32>
    %1013 = arith.mulf %1012, %1010 : vector<2x256xf32>
    %1014 = arith.addf %1001, %1013 : vector<2x256xf32>
    %c202 = arith.constant 202 : index
    %1015 = memref.load %arg1[%c202] : memref<243xf32, #tpu.memory_space<smem>>
    %1016 = vector.broadcast %1015 : f32 to vector<2x256xf32>
    %1017 = arith.mulf %1016, %1010 : vector<2x256xf32>
    %1018 = arith.addf %1005, %1017 : vector<2x256xf32>
    %c229 = arith.constant 229 : index
    %1019 = memref.load %arg1[%c229] : memref<243xf32, #tpu.memory_space<smem>>
    %1020 = vector.broadcast %1019 : f32 to vector<2x256xf32>
    %1021 = arith.mulf %1020, %1010 : vector<2x256xf32>
    %1022 = arith.addf %1009, %1021 : vector<2x256xf32>
    %1023 = vector.extract_strided_slice %954 {offsets = [0, 129], sizes = [2, 256], strides = [1, 1]} : vector<2x512xf32> to vector<2x256xf32>
    %1024 = arith.mulf %1023, %41 : vector<2x256xf32>
    %c176 = arith.constant 176 : index
    %1025 = memref.load %arg1[%c176] : memref<243xf32, #tpu.memory_space<smem>>
    %1026 = vector.broadcast %1025 : f32 to vector<2x256xf32>
    %1027 = arith.mulf %1026, %1024 : vector<2x256xf32>
    %1028 = arith.addf %1014, %1027 : vector<2x256xf32>
    %c203 = arith.constant 203 : index
    %1029 = memref.load %arg1[%c203] : memref<243xf32, #tpu.memory_space<smem>>
    %1030 = vector.broadcast %1029 : f32 to vector<2x256xf32>
    %1031 = arith.mulf %1030, %1024 : vector<2x256xf32>
    %1032 = arith.addf %1018, %1031 : vector<2x256xf32>
    %c230 = arith.constant 230 : index
    %1033 = memref.load %arg1[%c230] : memref<243xf32, #tpu.memory_space<smem>>
    %1034 = vector.broadcast %1033 : f32 to vector<2x256xf32>
    %1035 = arith.mulf %1034, %1024 : vector<2x256xf32>
    %1036 = arith.addf %1022, %1035 : vector<2x256xf32>
    %1037 = vector.extract_strided_slice %954 {offsets = [0, 143], sizes = [2, 256], strides = [1, 1]} : vector<2x512xf32> to vector<2x256xf32>
    %1038 = arith.mulf %1037, %37 : vector<2x256xf32>
    %c177 = arith.constant 177 : index
    %1039 = memref.load %arg1[%c177] : memref<243xf32, #tpu.memory_space<smem>>
    %1040 = vector.broadcast %1039 : f32 to vector<2x256xf32>
    %1041 = arith.mulf %1040, %1038 : vector<2x256xf32>
    %1042 = arith.addf %1028, %1041 : vector<2x256xf32>
    %c204 = arith.constant 204 : index
    %1043 = memref.load %arg1[%c204] : memref<243xf32, #tpu.memory_space<smem>>
    %1044 = vector.broadcast %1043 : f32 to vector<2x256xf32>
    %1045 = arith.mulf %1044, %1038 : vector<2x256xf32>
    %1046 = arith.addf %1032, %1045 : vector<2x256xf32>
    %c231 = arith.constant 231 : index
    %1047 = memref.load %arg1[%c231] : memref<243xf32, #tpu.memory_space<smem>>
    %1048 = vector.broadcast %1047 : f32 to vector<2x256xf32>
    %1049 = arith.mulf %1048, %1038 : vector<2x256xf32>
    %1050 = arith.addf %1036, %1049 : vector<2x256xf32>
    %1051 = vector.extract_strided_slice %954 {offsets = [0, 144], sizes = [2, 256], strides = [1, 1]} : vector<2x512xf32> to vector<2x256xf32>
    %c178 = arith.constant 178 : index
    %1052 = memref.load %arg1[%c178] : memref<243xf32, #tpu.memory_space<smem>>
    %1053 = vector.broadcast %1052 : f32 to vector<2x256xf32>
    %1054 = arith.mulf %1053, %1051 : vector<2x256xf32>
    %1055 = arith.addf %1042, %1054 : vector<2x256xf32>
    %c205 = arith.constant 205 : index
    %1056 = memref.load %arg1[%c205] : memref<243xf32, #tpu.memory_space<smem>>
    %1057 = vector.broadcast %1056 : f32 to vector<2x256xf32>
    %1058 = arith.mulf %1057, %1051 : vector<2x256xf32>
    %1059 = arith.addf %1046, %1058 : vector<2x256xf32>
    %c232 = arith.constant 232 : index
    %1060 = memref.load %arg1[%c232] : memref<243xf32, #tpu.memory_space<smem>>
    %1061 = vector.broadcast %1060 : f32 to vector<2x256xf32>
    %1062 = arith.mulf %1061, %1051 : vector<2x256xf32>
    %1063 = arith.addf %1050, %1062 : vector<2x256xf32>
    %1064 = vector.extract_strided_slice %954 {offsets = [0, 145], sizes = [2, 256], strides = [1, 1]} : vector<2x512xf32> to vector<2x256xf32>
    %1065 = arith.mulf %1064, %41 : vector<2x256xf32>
    %c179 = arith.constant 179 : index
    %1066 = memref.load %arg1[%c179] : memref<243xf32, #tpu.memory_space<smem>>
    %1067 = vector.broadcast %1066 : f32 to vector<2x256xf32>
    %1068 = arith.mulf %1067, %1065 : vector<2x256xf32>
    %1069 = arith.addf %1055, %1068 : vector<2x256xf32>
    %c206 = arith.constant 206 : index
    %1070 = memref.load %arg1[%c206] : memref<243xf32, #tpu.memory_space<smem>>
    %1071 = vector.broadcast %1070 : f32 to vector<2x256xf32>
    %1072 = arith.mulf %1071, %1065 : vector<2x256xf32>
    %1073 = arith.addf %1059, %1072 : vector<2x256xf32>
    %c233 = arith.constant 233 : index
    %1074 = memref.load %arg1[%c233] : memref<243xf32, #tpu.memory_space<smem>>
    %1075 = vector.broadcast %1074 : f32 to vector<2x256xf32>
    %1076 = arith.mulf %1075, %1065 : vector<2x256xf32>
    %1077 = arith.addf %1063, %1076 : vector<2x256xf32>
    %c2_76 = arith.constant 2 : index
    %c0_77 = arith.constant 0 : index
    %c0_78 = arith.constant 0 : index
    %1078 = vector.load %arg4[%c2_76, %c0_77, %c0_78] : memref<3x2x512xf32, #tpu.memory_space<vmem>>, vector<1x2x512xf32>
    %1079 = vector.shape_cast %1078 : vector<1x2x512xf32> to vector<2x512xf32>
    %1080 = vector.extract_strided_slice %1079 {offsets = [0, 111], sizes = [2, 256], strides = [1, 1]} : vector<2x512xf32> to vector<2x256xf32>
    %1081 = arith.mulf %1080, %37 : vector<2x256xf32>
    %c180 = arith.constant 180 : index
    %1082 = memref.load %arg1[%c180] : memref<243xf32, #tpu.memory_space<smem>>
    %1083 = vector.broadcast %1082 : f32 to vector<2x256xf32>
    %1084 = arith.mulf %1083, %1081 : vector<2x256xf32>
    %1085 = arith.addf %1069, %1084 : vector<2x256xf32>
    %c207 = arith.constant 207 : index
    %1086 = memref.load %arg1[%c207] : memref<243xf32, #tpu.memory_space<smem>>
    %1087 = vector.broadcast %1086 : f32 to vector<2x256xf32>
    %1088 = arith.mulf %1087, %1081 : vector<2x256xf32>
    %1089 = arith.addf %1073, %1088 : vector<2x256xf32>
    %c234 = arith.constant 234 : index
    %1090 = memref.load %arg1[%c234] : memref<243xf32, #tpu.memory_space<smem>>
    %1091 = vector.broadcast %1090 : f32 to vector<2x256xf32>
    %1092 = arith.mulf %1091, %1081 : vector<2x256xf32>
    %1093 = arith.addf %1077, %1092 : vector<2x256xf32>
    %1094 = vector.extract_strided_slice %1079 {offsets = [0, 112], sizes = [2, 256], strides = [1, 1]} : vector<2x512xf32> to vector<2x256xf32>
    %c181 = arith.constant 181 : index
    %1095 = memref.load %arg1[%c181] : memref<243xf32, #tpu.memory_space<smem>>
    %1096 = vector.broadcast %1095 : f32 to vector<2x256xf32>
    %1097 = arith.mulf %1096, %1094 : vector<2x256xf32>
    %1098 = arith.addf %1085, %1097 : vector<2x256xf32>
    %c208 = arith.constant 208 : index
    %1099 = memref.load %arg1[%c208] : memref<243xf32, #tpu.memory_space<smem>>
    %1100 = vector.broadcast %1099 : f32 to vector<2x256xf32>
    %1101 = arith.mulf %1100, %1094 : vector<2x256xf32>
    %1102 = arith.addf %1089, %1101 : vector<2x256xf32>
    %c235 = arith.constant 235 : index
    %1103 = memref.load %arg1[%c235] : memref<243xf32, #tpu.memory_space<smem>>
    %1104 = vector.broadcast %1103 : f32 to vector<2x256xf32>
    %1105 = arith.mulf %1104, %1094 : vector<2x256xf32>
    %1106 = arith.addf %1093, %1105 : vector<2x256xf32>
    %1107 = vector.extract_strided_slice %1079 {offsets = [0, 113], sizes = [2, 256], strides = [1, 1]} : vector<2x512xf32> to vector<2x256xf32>
    %1108 = arith.mulf %1107, %41 : vector<2x256xf32>
    %c182 = arith.constant 182 : index
    %1109 = memref.load %arg1[%c182] : memref<243xf32, #tpu.memory_space<smem>>
    %1110 = vector.broadcast %1109 : f32 to vector<2x256xf32>
    %1111 = arith.mulf %1110, %1108 : vector<2x256xf32>
    %1112 = arith.addf %1098, %1111 : vector<2x256xf32>
    %c209 = arith.constant 209 : index
    %1113 = memref.load %arg1[%c209] : memref<243xf32, #tpu.memory_space<smem>>
    %1114 = vector.broadcast %1113 : f32 to vector<2x256xf32>
    %1115 = arith.mulf %1114, %1108 : vector<2x256xf32>
    %1116 = arith.addf %1102, %1115 : vector<2x256xf32>
    %c236 = arith.constant 236 : index
    %1117 = memref.load %arg1[%c236] : memref<243xf32, #tpu.memory_space<smem>>
    %1118 = vector.broadcast %1117 : f32 to vector<2x256xf32>
    %1119 = arith.mulf %1118, %1108 : vector<2x256xf32>
    %1120 = arith.addf %1106, %1119 : vector<2x256xf32>
    %1121 = vector.extract_strided_slice %1079 {offsets = [0, 127], sizes = [2, 256], strides = [1, 1]} : vector<2x512xf32> to vector<2x256xf32>
    %1122 = arith.mulf %1121, %37 : vector<2x256xf32>
    %c183 = arith.constant 183 : index
    %1123 = memref.load %arg1[%c183] : memref<243xf32, #tpu.memory_space<smem>>
    %1124 = vector.broadcast %1123 : f32 to vector<2x256xf32>
    %1125 = arith.mulf %1124, %1122 : vector<2x256xf32>
    %1126 = arith.addf %1112, %1125 : vector<2x256xf32>
    %c210 = arith.constant 210 : index
    %1127 = memref.load %arg1[%c210] : memref<243xf32, #tpu.memory_space<smem>>
    %1128 = vector.broadcast %1127 : f32 to vector<2x256xf32>
    %1129 = arith.mulf %1128, %1122 : vector<2x256xf32>
    %1130 = arith.addf %1116, %1129 : vector<2x256xf32>
    %c237 = arith.constant 237 : index
    %1131 = memref.load %arg1[%c237] : memref<243xf32, #tpu.memory_space<smem>>
    %1132 = vector.broadcast %1131 : f32 to vector<2x256xf32>
    %1133 = arith.mulf %1132, %1122 : vector<2x256xf32>
    %1134 = arith.addf %1120, %1133 : vector<2x256xf32>
    %1135 = vector.extract_strided_slice %1079 {offsets = [0, 128], sizes = [2, 256], strides = [1, 1]} : vector<2x512xf32> to vector<2x256xf32>
    %c184 = arith.constant 184 : index
    %1136 = memref.load %arg1[%c184] : memref<243xf32, #tpu.memory_space<smem>>
    %1137 = vector.broadcast %1136 : f32 to vector<2x256xf32>
    %1138 = arith.mulf %1137, %1135 : vector<2x256xf32>
    %1139 = arith.addf %1126, %1138 : vector<2x256xf32>
    %c211 = arith.constant 211 : index
    %1140 = memref.load %arg1[%c211] : memref<243xf32, #tpu.memory_space<smem>>
    %1141 = vector.broadcast %1140 : f32 to vector<2x256xf32>
    %1142 = arith.mulf %1141, %1135 : vector<2x256xf32>
    %1143 = arith.addf %1130, %1142 : vector<2x256xf32>
    %c238 = arith.constant 238 : index
    %1144 = memref.load %arg1[%c238] : memref<243xf32, #tpu.memory_space<smem>>
    %1145 = vector.broadcast %1144 : f32 to vector<2x256xf32>
    %1146 = arith.mulf %1145, %1135 : vector<2x256xf32>
    %1147 = arith.addf %1134, %1146 : vector<2x256xf32>
    %1148 = vector.extract_strided_slice %1079 {offsets = [0, 129], sizes = [2, 256], strides = [1, 1]} : vector<2x512xf32> to vector<2x256xf32>
    %1149 = arith.mulf %1148, %41 : vector<2x256xf32>
    %c185 = arith.constant 185 : index
    %1150 = memref.load %arg1[%c185] : memref<243xf32, #tpu.memory_space<smem>>
    %1151 = vector.broadcast %1150 : f32 to vector<2x256xf32>
    %1152 = arith.mulf %1151, %1149 : vector<2x256xf32>
    %1153 = arith.addf %1139, %1152 : vector<2x256xf32>
    %c212 = arith.constant 212 : index
    %1154 = memref.load %arg1[%c212] : memref<243xf32, #tpu.memory_space<smem>>
    %1155 = vector.broadcast %1154 : f32 to vector<2x256xf32>
    %1156 = arith.mulf %1155, %1149 : vector<2x256xf32>
    %1157 = arith.addf %1143, %1156 : vector<2x256xf32>
    %c239 = arith.constant 239 : index
    %1158 = memref.load %arg1[%c239] : memref<243xf32, #tpu.memory_space<smem>>
    %1159 = vector.broadcast %1158 : f32 to vector<2x256xf32>
    %1160 = arith.mulf %1159, %1149 : vector<2x256xf32>
    %1161 = arith.addf %1147, %1160 : vector<2x256xf32>
    %1162 = vector.extract_strided_slice %1079 {offsets = [0, 143], sizes = [2, 256], strides = [1, 1]} : vector<2x512xf32> to vector<2x256xf32>
    %1163 = arith.mulf %1162, %37 : vector<2x256xf32>
    %c186 = arith.constant 186 : index
    %1164 = memref.load %arg1[%c186] : memref<243xf32, #tpu.memory_space<smem>>
    %1165 = vector.broadcast %1164 : f32 to vector<2x256xf32>
    %1166 = arith.mulf %1165, %1163 : vector<2x256xf32>
    %1167 = arith.addf %1153, %1166 : vector<2x256xf32>
    %c213 = arith.constant 213 : index
    %1168 = memref.load %arg1[%c213] : memref<243xf32, #tpu.memory_space<smem>>
    %1169 = vector.broadcast %1168 : f32 to vector<2x256xf32>
    %1170 = arith.mulf %1169, %1163 : vector<2x256xf32>
    %1171 = arith.addf %1157, %1170 : vector<2x256xf32>
    %c240 = arith.constant 240 : index
    %1172 = memref.load %arg1[%c240] : memref<243xf32, #tpu.memory_space<smem>>
    %1173 = vector.broadcast %1172 : f32 to vector<2x256xf32>
    %1174 = arith.mulf %1173, %1163 : vector<2x256xf32>
    %1175 = arith.addf %1161, %1174 : vector<2x256xf32>
    %1176 = vector.extract_strided_slice %1079 {offsets = [0, 144], sizes = [2, 256], strides = [1, 1]} : vector<2x512xf32> to vector<2x256xf32>
    %c187 = arith.constant 187 : index
    %1177 = memref.load %arg1[%c187] : memref<243xf32, #tpu.memory_space<smem>>
    %1178 = vector.broadcast %1177 : f32 to vector<2x256xf32>
    %1179 = arith.mulf %1178, %1176 : vector<2x256xf32>
    %1180 = arith.addf %1167, %1179 : vector<2x256xf32>
    %c214 = arith.constant 214 : index
    %1181 = memref.load %arg1[%c214] : memref<243xf32, #tpu.memory_space<smem>>
    %1182 = vector.broadcast %1181 : f32 to vector<2x256xf32>
    %1183 = arith.mulf %1182, %1176 : vector<2x256xf32>
    %1184 = arith.addf %1171, %1183 : vector<2x256xf32>
    %c241 = arith.constant 241 : index
    %1185 = memref.load %arg1[%c241] : memref<243xf32, #tpu.memory_space<smem>>
    %1186 = vector.broadcast %1185 : f32 to vector<2x256xf32>
    %1187 = arith.mulf %1186, %1176 : vector<2x256xf32>
    %1188 = arith.addf %1175, %1187 : vector<2x256xf32>
    %1189 = vector.extract_strided_slice %1079 {offsets = [0, 145], sizes = [2, 256], strides = [1, 1]} : vector<2x512xf32> to vector<2x256xf32>
    %1190 = arith.mulf %1189, %41 : vector<2x256xf32>
    %c188 = arith.constant 188 : index
    %1191 = memref.load %arg1[%c188] : memref<243xf32, #tpu.memory_space<smem>>
    %1192 = vector.broadcast %1191 : f32 to vector<2x256xf32>
    %1193 = arith.mulf %1192, %1190 : vector<2x256xf32>
    %1194 = arith.addf %1180, %1193 : vector<2x256xf32>
    %c215 = arith.constant 215 : index
    %1195 = memref.load %arg1[%c215] : memref<243xf32, #tpu.memory_space<smem>>
    %1196 = vector.broadcast %1195 : f32 to vector<2x256xf32>
    %1197 = arith.mulf %1196, %1190 : vector<2x256xf32>
    %1198 = arith.addf %1184, %1197 : vector<2x256xf32>
    %c242 = arith.constant 242 : index
    %1199 = memref.load %arg1[%c242] : memref<243xf32, #tpu.memory_space<smem>>
    %1200 = vector.broadcast %1199 : f32 to vector<2x256xf32>
    %1201 = arith.mulf %1200, %1190 : vector<2x256xf32>
    %1202 = arith.addf %1188, %1201 : vector<2x256xf32>
    %1203 = tpu.concatenate %1194, %1198, %1202 in 1 : vector<2x256xf32>, vector<2x256xf32>, vector<2x256xf32> -> vector<2x768xf32>
    %c0_79 = arith.constant 0 : index
    %c0_80 = arith.constant 0 : index
    %1204 = vector.load %arg3[%c0_79, %c0_80] : memref<2x768xf32, #tpu.memory_space<vmem>>, vector<2x768xf32>
    tpu.vector_store %arg3[%c0_79, %c0_80], %1203 {strides = array<i32>} : memref<2x768xf32, #tpu.memory_space<vmem>>, vector<2x768xf32>,
    return
  }
}

</mosaic_0001>

<bundles_post_ra>
// kernel: example_model_forward.1
= control target key start
LH: loop header
LB: loop body
LE: loop exit
PB: predicated region body
PF: predicated region fallthrough
CT: control target
= control target key end

     0   :  { %8 = vsyncpa [#allocation4], 0  ;;  %s4969_s0 = inlined_call_operand.vmem [shape: f32[3,2,256], index: 0, kind: input, shape index: {}]   ;;  %s4970_s1 = inlined_call_operand.vmem [shape: f32[243], index: 1, kind: input, shape index: {}]   ;;  %s4971_s2 = inlined_call_operand.vmem [shape: f32[9], index: 2, kind: input, shape index: {}]   ;;  %s4972_s3 = inlined_call_operand.vmem [shape: f32[2,768], index: 3, kind: output, shape index: {}]  }
   0x1   :  { %s18_s14 = sshll.u32 %s4970_s1, 4  ;;  %s19_s14 = int_to_ptr.vmem [resolvable:$true] %s18_s14 }
   0x2   :  { %9 = vsyncpa [#allocation6], 0  ;;  %s28_s17 = sshll.u32 %s4971_s2, 4  ;;  %s3147_s18 = scalar_lea.vmem %s19_s14, 32  ;;  %s29_s17 = int_to_ptr.vmem [resolvable:$true] %s28_s17 }
   0x3   :  { %p3148_p0 = scmp.ne.s32.totalorder %s19_s14, %s3147_s18  ;;  %p3152_p1 = scmp.lt.s32.totalorder %s19_s14, %s19_s14 }
   0x4   :  { %p3153_p2 = scmp.lt.s32.totalorder %s3147_s18, %s3147_s18 }
   0x6   :  { %p3154_p3 = por %p3153_p2, %p3152_p1 }
   0x8   :  { %p3155_p4 = pnand %p3154_p3, %p3148_p0 }
   0xa   :  { %3158 = shalt.err (!%p3155_p4)
}
   0xb   :  { %s3175_s19 = smov [#allocation3]   ;;  %s3159_s20 = scalar_lea.vmem %s29_s17, 16 }
   0xc   :  { %21 = dma.vmem_to_smem %s19_s14, 32, %s3175_s19, [#allocation4]  }
   0xd   :  { %p3160_p5 = scmp.ne.s32.totalorder %s29_s17, %s3159_s20  ;;  %p3164_p6 = scmp.lt.s32.totalorder %s29_s17, %s29_s17 }
   0xe   :  { %p3165_p7 = scmp.lt.s32.totalorder %s3159_s20, %s3159_s20 }
  0x10   :  { %p3166_p8 = por %p3165_p7, %p3164_p6 }
  0x12   :  { %p3167_p9 = pnand %p3166_p8, %p3160_p5 }
  0x14   :  { %3170 = shalt.err (!%p3167_p9)
}
  0x15   :  { %s3176_s1 = smov [#allocation5]  }
  0x16   :  { %31 = dma.vmem_to_smem %s29_s17, 16, %s3176_s1, [#allocation6]  }
  0x17   :  { %3171 = dma.done.wait [#allocation4], 32  }
  0x18   :  { %3172 = vsyncadd [#allocation4], 4294967264 }
  0x19   :  { %3173 = dma.done.wait [#allocation6], 16  }
  0x1a   :  { %3174 = vsyncadd [#allocation6], 4294967280 }
  0x1b   :  { %38 = sfence }
  0x1c   :  { %v42_v0 = vld [vmem:[%s4969_s0] sm:$0xf]  ;;  %v52_v1 = vlaneseq  ;;  %v3177_v2 = vmov 0.0   ;;  %v2878_v3 = vld [vmem:[%s4969_s0 + $0x4] sm:$0xf]  ;;  %s3180_s26 = smov 127  }
  0x1d   :  { %39 = vst [vmem:[#allocation2] sm:$0xff] %v3177_v2  ;;  %40 = vst [vmem:[#allocation2 + $0x8] sm:$0xff] %v3177_v2  ;;  %v2879_v4 = vld [vmem:[%s4969_s0 + $0x8] sm:$0xf]  ;;  %v3178_v6 = vmov 1983009808  }
  0x1e   :  { %41 = vst [vmem:[#allocation2 + $0x10] sm:$0xff] %v3177_v2  ;;  %43 = vst [vmem:[#allocation2 + $0x2] sm:$0xf] %v42_v0  ;;  %v53_v5 = vand.u32 127, %v52_v1  ;;  %v102_v7 = vunpack.c.l.s4 %v3178_v6  ;;  %v105_v12 = vshrl.u32 %v52_v1, 7  ;;  %s3179_s0 = smov 112  }
  0x1f   :  { %47 = vst [vmem:[#allocation2 + $0xa] sm:$0xf] %v2878_v3  ;;  %51 = vst [vmem:[#allocation2 + $0x12] sm:$0xf] %v2879_v4  ;;  %s3181_s27 = smov 113   ;;  %s3182_s28 = smov 111  }
  0x20   :  { %v54_v8 = vadd.s32 128, %v53_v5  ;;  %v59_v9 = vand.u32 15, %v53_v5  ;;  %v103_v11 = vunpack.c.0.s8 %v102_v7  ;;  %s2888_s29 = sld [smem:[#allocation3 + $0x1]]  ;;  %s2889_s30 = sld [smem:[#allocation3 + $0x1c]]  ;;  %vm219_vm4 = vcmask 916480  }
  0x21   :  { %s2897_s4 = sld [smem:[#allocation3 + $0x4]]  ;;  %s2898_s5 = sld [smem:[#allocation3 + $0x1f]]  ;;  %vm134_vm5 = vcmask 1039360   ;;  %vm171_vm6 = vcmask 924672   ;;  %vm111_vm7 = vcmask 908288   ;;  %vm182_vm8 = vcmask 1031168  }
  0x22   :  { %v66_v10 = vand.u32 15, %v54_v8  ;;  %vm85_vm0 = vcmp.le.s32.totalorder %v59_v9, 14  ;;  %vm79_vm2 = vcmp.ge.s32.totalorder %v59_v9, 1  ;;  %v3222_v16 = vsub.s32 %v103_v11, %v105_v12  ;;  %s2915_s6 = sld [smem:[#allocation3 + $0xa]]  ;;  %s2890_s7 = sld [smem:[#allocation3 + $0x37]] }
  0x23   :  { %v2882_v13 = vsel %vm85_vm0, 1.0, %v3177_v2  ;;  %v2880_v19 = vsel %vm79_vm2, 1.0, %v3177_v2  ;;  %s2924_s8 = sld [smem:[#allocation3 + $0xd]]  ;;  %s2942_s9 = sld [smem:[#allocation3 + $0x13]]  ;;  %vm1001_vm9 = vcmask 138240  }
  0x24   :  { %vm86_vm1 = vcmp.le.s32.totalorder %v66_v10, 14  ;;  %vm80_vm3 = vcmp.ge.s32.totalorder %v66_v10, 1  ;;  %s2916_s10 = sld [smem:[#allocation3 + $0x25]]  ;;  %s2925_s11 = sld [smem:[#allocation3 + $0x28]] }
  0x25   :  { %v2883_v14 = vsel %vm86_vm1, 1.0, %v3177_v2  ;;  %v3220_v15 = vld [vmem:[#allocation2] sm:$0xff]  ;;  %v2881_v20 = vsel %vm80_vm3, 1.0, %v3177_v2  ;;  %s2899_s12 = sld [smem:[#allocation3 + $0x3a]]  ;;  %s2951_s13 = sld [smem:[#allocation3 + $0x16]] }
  0x26   :  { %v160_v17 = vcombine.low %v2882_v13, %v2883_v14  ;;  %354 = vrot.lane.b32.xlu0 %v3220_v15, %s3179_s0  ;;  %276 = vrot.lane.b32.xlu1 %v3220_v15, %s3180_s26  ;;  %v3228_v18 = vld [vmem:[#allocation2 + $0x8] sm:$0xff]  ;;  %v100_v22 = vcombine.low %v2880_v19, %v2881_v20  ;;  %v3252_v24 = vld [vmem:[#allocation2 + $0x10] sm:$0xff]  ;;  %v128_v25 = vstv %s2888_s29  ;;  %v139_v27 = vstv %s2889_s30  ;;  %s2906_s14 = sld [smem:[#allocation3 + $0x7]]  ;;  %s2907_s15 = sld [smem:[#allocation3 + $0x22]] }
  0x27   :  { %v129_v26 = vmul.f32 %v128_v25, %v3220_v15  ;;  %v244_v28 = vstv %s2897_s4  ;;  %v246_v29 = vrot.slane %v3220_v15, 2  ;;  %v140_v30 = vmul.f32 %v139_v27, %v3220_v15  ;;  %s2900_s16 = sld [smem:[#allocation3 + $0x5]]  ;;  %s2901_s17 = sld [smem:[#allocation3 + $0x20]] }
  0x28   :  { %v3231_v21 = vrot.slane %v160_v17, %v3222_v16  ;;  %v3240_v23 = vrot.slane %v100_v22, %v3222_v16  ;;  %v257_v32 = vstv %s2898_s5  ;;  %v440_v33 = vstv %s2915_s6  ;;  %s2904_s18 = sld [smem:[#allocation3 + $0x21]]  ;;  %s3306_s19 = sld [smem:[#allocation3 + $0x10]] }
  0x29   :  { %v248_v31 = vmul.f32 %v246_v29, %v244_v28  ;;  %v258_v34 = vmul.f32 %v257_v32, %v246_v29  ;;  %v441_v35 = vmul.f32 %v440_v33, %v3228_v18  ;;  %v149_v36 = vstv %s2890_s7  ;;  %s3311_s20 = sld [smem:[#allocation3 + $0x6]]  ;;  %s3313_s1 = sld [smem:[#allocation3 + $0x23]] }
  0x2a   :  { %564 = vrot.lane.b32.xlu0 %v3228_v18, %s3180_s26  ;;  %314 = vrot.lane.b32.xlu1 %v3220_v15, %s3181_s27  ;;  %v532_v37 = vstv %s2924_s8  ;;  %v3272_v38 = vrot.slane %v3228_v18, 2  ;;  %v150_v39 = vmul.f32 %v149_v36, %v3220_v15  ;;  %v726_v41 = vstv %s2942_s9  ;;  %s3323_s2 = sld [smem:[#allocation3 + $0x8]]  ;;  %s3326_s21 = sld [smem:[#allocation3 + $0x3b]] }
  0x2b   :  { %v450_v42 = vstv %s2916_s10  ;;  %v727_v43 = vmul.f32 %v726_v41, %v3252_v24  ;;  %v545_v45 = vstv %s2925_s11  ;;  %v267_v46 = vstv %s2899_s12  ;;  %s3338_s22 = sld [smem:[#allocation3 + $0x17]]  ;;  %s3343_s23 = sld [smem:[#allocation3 + $0xe]] }
  0x2c   :  { %v536_v40 = vmul.f32 %v3272_v38, %v532_v37  ;;  %v451_v44 = vmul.f32 %v450_v42, %v3228_v18  ;;  %v546_v47 = vmul.f32 %v545_v45, %v3272_v38  ;;  %v268_v48 = vmul.f32 %v267_v46, %v246_v29  ;;  %s3351_s24 = sld [smem:[#allocation3 + $0xf]]  ;;  %s3353_s25 = sld [smem:[#allocation3 + $0x2a]] }
  0x2d   :  { %v3286_v49 = vrot.slane %v3252_v24, 2  ;;  %v818_v50 = vstv %s2951_s13  ;;  %v353_v54 = vstv %s2906_s14  ;;  %v369_v0 = vstv %s2907_s15  ;;  %s3365_s29 = sld [smem:[#allocation3 + $0x11]]  ;;  %s2894_s30 = sld [smem:[#allocation3 + $0x3]] }
  0x2e   :  { %168 = vrot.lane.b32.xlu0 %v3231_v21, %s3181_s27  ;;  %388 = vrot.lane.b32.xlu1 %v3220_v15, %s3182_s28  ;;  %v285_v4 = vstv %s2900_s16  ;;  %v295_v12 = vstv %s2901_s17  ;;  %s3387_s4 = sld [smem:[#allocation3 + $0x29]]  ;;  %s3389_s5 = sld [smem:[#allocation3 + $0x3d]] }
  0x2f   :  { %v822_v51 = vmul.f32 %v3286_v49, %v818_v50  ;;  %v333_v20 = vstv %s2904_s18  ;;  %v639_v27 = vstv %s3306_s19  ;;  %v323_v32 = vstv %s3311_s20  ;;  %s3399_s6 = sld [smem:[#allocation3 + $0x19]]  ;;  %s2905_s7 = sld [smem:[#allocation3 + $0x3c]] }
  0x30   :  { %v406_v33 = vstv %s3313_s1  ;;  %v396_v46 = vstv %s3323_s2  ;;  %v305_v50 = vstv %s3326_s21  ;;  %s2891_s8 = sld [smem:[#allocation3 + $0x2]]  ;;  %s2892_s9 = sld [smem:[#allocation3 + $0x1d]] }
  0x31   :  { %s2957_s10 = sld [smem:[#allocation3 + $0x18]]  ;;  %s2895_s11 = sld [smem:[#allocation3 + $0x1e]] }
  0x32   :  { %206 = vrot.lane.b32.xlu0 %v3240_v23, %s3180_s26  ;;  %601 = vrot.lane.b32.xlu1 %v3228_v18, %s3181_s27  ;;  %s2934_s12 = sld [smem:[#allocation3 + $0x2b]]  ;;  %s2937_s13 = sld [smem:[#allocation3 + $0x2c]] }
  0x33   :  { %s2917_s14 = sld [smem:[#allocation3 + $0x40]]  ;;  %s2911_s15 = sld [smem:[#allocation3 + $0x3e]] }
  0x34   :  { %s3183_s16 = smov 126   ;;  %s2918_s17 = sld [smem:[#allocation3 + $0xb]] }
  0x35   :  { %s2919_s18 = sld [smem:[#allocation3 + $0x26]]  ;;  %s2921_s19 = sld [smem:[#allocation3 + $0xc]] }
  0x36   :  { %640 = vrot.lane.b32.xlu0 %v3228_v18, %s3179_s0  ;;  %674 = vrot.lane.b32.xlu1 %v3228_v18, %s3182_s28  ;;  %s2896_s20 = sld [smem:[#allocation3 + $0x39]]  ;;  %s2963_s1 = sld [smem:[#allocation3 + $0x1a]] }
  0x37   :  { %s2948_s2 = sld [smem:[#allocation3 + $0x15]]  ;;  %s2943_s21 = sld [smem:[#allocation3 + $0x2e]] }
  0x3a   :  { %850 = vrot.lane.b32.xlu0 %v3252_v24, %s3180_s26  ;;  %887 = vrot.lane.b32.xlu1 %v3252_v24, %s3181_s27 }
  0x3e   :  { %926 = vrot.lane.b32.xlu0 %v3252_v24, %s3179_s0  ;;  %960 = vrot.lane.b32.xlu1 %v3252_v24, %s3182_s28 }
  0x42   :  { %131 = vrot.lane.b32.xlu1 %v129_v26, %s3180_s26  ;;  %108 = vrot.lane.b32.xlu0 %v3240_v23, %s3182_s28 }
  0x46   :  { %142 = vrot.lane.b32.xlu1 %v140_v30, %s3180_s26  ;;  %250 = vrot.lane.b32.xlu0 %v248_v31, %s3182_s28 }
  0x4a   :  { %260 = vrot.lane.b32.xlu1 %v258_v34, %s3182_s28  ;;  %443 = vrot.lane.b32.xlu0 %v441_v35, %s3180_s26 }
  0x4e   :  { %152 = vrot.lane.b32.xlu1 %v150_v39, %s3180_s26  ;;  %538 = vrot.lane.b32.xlu0 %v536_v40, %s3182_s28 }
  0x52   :  { %729 = vrot.lane.b32.xlu1 %v727_v43, %s3180_s26  ;;  %453 = vrot.lane.b32.xlu0 %v451_v44, %s3180_s26 }
  0x56   :  { %548 = vrot.lane.b32.xlu1 %v546_v47, %s3182_s28  ;;  %270 = vrot.lane.b32.xlu0 %v268_v48, %s3182_s28 }
  0x5a   :  { %824 = vrot.lane.b32.xlu0 %v822_v51, %s3182_s28 }
  0x98   :  { %v355_v52 = vpop.permute.xlu0 %354  ;;  %v277_v53 = vpop.permute.xlu1 %276 }
  0x99   :  { %v356_v55 = vrot.slane %v355_v52, 2  ;;  %v357_v56 = vrot.slane %v355_v52, 4  ;;  %v278_v57 = vrot.slane %v277_v53, 2  ;;  %v279_v58 = vrot.slane %v277_v53, 4 }
  0x9b   :  { %v280_v59 = vsel %vm134_vm5, %v278_v57, %v279_v58  ;;  %v3294_v60 = vsel %vm219_vm4, %v356_v55, %v357_v56  ;;  %v858_v56 = vstv %s3338_s22  ;;  %s2926_s22 = sld [smem:[#allocation3 + $0x43]] }
  0x9c   :  { %v3296_v61 = vpop.permute.xlu0 %564  ;;  %v360_v62 = vmul.f32 %v3294_v60, %v353_v54  ;;  %v315_v63 = vpop.permute.xlu1 %314  ;;  %v3301_v1 = vmul.f32 %v280_v59, %v3231_v21  ;;  %v370_v6 = vmul.f32 %v369_v0, %v3294_v60 }
  0x9d   :  { %v316_v2 = vrot.slane %v315_v63, 2  ;;  %v317_v3 = vrot.slane %v315_v63, 4  ;;  %v566_v36 = vrot.slane %v3296_v61, 2  ;;  %v567_v37 = vrot.slane %v3296_v61, 4 }
  0x9e   :  { %362 = vrot.lane.b32.xlu1 %v360_v62, %s3182_s28  ;;  %v286_v8 = vmul.f32 %v285_v4, %v3301_v1  ;;  %v296_v14 = vmul.f32 %v295_v12, %v3301_v1  ;;  %v306_v57 = vmul.f32 %v305_v50, %v3301_v1  ;;  %v572_v61 = vstv %s3343_s23  ;;  %s2893_s23 = sld [smem:[#allocation3 + $0x38]] }
  0x9f   :  { %v318_v9 = vsel %vm171_vm6, %v316_v2, %v317_v3  ;;  %v568_v48 = vsel %vm134_vm5, %v566_v36, %v567_v37  ;;  %v609_v1 = vstv %s3351_s24  ;;  %v619_v2 = vstv %s3353_s25  ;;  %s2920_s24 = sld [smem:[#allocation3 + $0x41]]  ;;  %s2945_s25 = sld [smem:[#allocation3 + $0x14]] }
  0xa0   :  { %v3303_v5 = vpop.permute.xlu0 %168  ;;  %v389_v7 = vpop.permute.xlu1 %388  ;;  %v3320_v17 = vmul.f32 %v318_v9, %v3240_v23  ;;  %v3369_v58 = vmul.f32 %v568_v48, %v3231_v21  ;;  %v682_v9 = vstv %s3365_s29  ;;  %v213_v12 = vstv %s2894_s30  ;;  %s2923_s29 = sld [smem:[#allocation3 + $0x42]]  ;;  %s2922_s30 = sld [smem:[#allocation3 + $0x27]] }
  0xa1   :  { %v390_v10 = vrot.slane %v389_v7, 2  ;;  %v391_v11 = vrot.slane %v389_v7, 4  ;;  %v343_v37 = vstv %s2905_s7  ;;  %v655_v50 = vstv %s2934_s12  ;;  %s2949_s7 = sld [smem:[#allocation3 + $0x30]]  ;;  %s2955_s12 = sld [smem:[#allocation3 + $0x32]] }
  0xa2   :  { %372 = vrot.lane.b32.xlu1 %v370_v6, %s3182_s28  ;;  %v334_v28 = vmul.f32 %v333_v20, %v3320_v17  ;;  %v324_v41 = vmul.f32 %v323_v32, %v3320_v17  ;;  %v573_v3 = vmul.f32 %v572_v61, %v3369_v58  ;;  %v925_v32 = vstv %s3399_s6  ;;  %s2932_s6 = sld [smem:[#allocation3 + $0x45]] }
  0xa3   :  { %v392_v19 = vsel %vm111_vm7, %v390_v10, %v391_v11 }
  0xa4   :  { %v3315_v13 = vpop.permute.xlu0 %206  ;;  %v3331_v29 = vmul.f32 %v392_v19, %v3231_v21  ;;  %v602_v30 = vpop.permute.xlu1 %601 }
  0xa5   :  { %v603_v44 = vrot.slane %v602_v30, 2  ;;  %v604_v45 = vrot.slane %v602_v30, 4  ;;  %v208_v59 = vrot.slane %v3315_v13, 6 }
  0xa6   :  { %288 = vrot.lane.b32.xlu1 %v286_v8, %s3182_s28  ;;  %v407_v42 = vmul.f32 %v406_v33, %v3331_v29  ;;  %v397_v51 = vmul.f32 %v396_v46, %v3331_v29  ;;  %v224_v46 = vstv %s2895_s11  ;;  %s2944_s11 = sld [smem:[#allocation3 + $0x49]] }
  0xa7   :  { %v605_v53 = vsel %vm171_vm6, %v603_v44, %v604_v45  ;;  %v3385_v4 = vsel %vm134_vm5, %v208_v59, %v3315_v13  ;;  %v895_v44 = vstv %s2957_s10  ;;  %s2938_s10 = sld [smem:[#allocation3 + $0x47]] }
  0xa8   :  { %v641_v22 = vpop.permute.xlu0 %640  ;;  %v675_v47 = vpop.permute.xlu1 %674  ;;  %v3377_v63 = vmul.f32 %v605_v53, %v3240_v23  ;;  %v3403_v10 = vmul.f32 %v3385_v4, %v3220_v15  ;;  %v460_v53 = vstv %s2917_s14  ;;  %s2950_s14 = sld [smem:[#allocation3 + $0x4b]] }
  0xa9   :  { %v642_v25 = vrot.slane %v641_v22, 2  ;;  %v643_v26 = vrot.slane %v641_v22, 4  ;;  %v676_v54 = vrot.slane %v675_v47, 2  ;;  %v677_v55 = vrot.slane %v675_v47, 4 }
  0xaa   :  { %298 = vrot.lane.b32.xlu1 %v296_v14, %s3182_s28  ;;  %v610_v6 = vmul.f32 %v609_v1, %v3377_v63  ;;  %v620_v7 = vmul.f32 %v619_v2, %v3377_v63  ;;  %v214_v20 = vmul.f32 %v213_v12, %v3403_v10  ;;  %v225_v48 = vmul.f32 %v224_v46, %v3403_v10 }
  0xab   :  { %v3334_v31 = vsel %vm219_vm4, %v642_v25, %v643_v26  ;;  %v678_v0 = vsel %vm111_vm7, %v676_v54, %v677_v55  ;;  %v170_v25 = vrot.slane %v3303_v5, 6  ;;  %v582_v26 = vstv %s3387_s4  ;;  %s2929_s4 = sld [smem:[#allocation3 + $0x44]] }
  0xac   :  { %v646_v34 = vmul.f32 %v3334_v31, %v639_v27  ;;  %v851_v35 = vpop.permute.xlu0 %850  ;;  %v3396_v8 = vmul.f32 %v678_v0, %v3231_v21  ;;  %v888_v22 = vpop.permute.xlu1 %887  ;;  %v379_v27 = vstv %s3389_s5  ;;  %v656_v54 = vmul.f32 %v655_v50, %v3334_v31  ;;  %s2946_s5 = sld [smem:[#allocation3 + $0x2f]] }
  0xad   :  { %v852_v39 = vrot.slane %v851_v35, 2  ;;  %v853_v40 = vrot.slane %v851_v35, 4  ;;  %v890_v30 = vrot.slane %v888_v22, 4  ;;  %v380_v35 = vmul.f32 %v379_v27, %v3294_v60 }
  0xae   :  { %648 = vrot.lane.b32.xlu0 %v646_v34, %s3182_s28  ;;  %336 = vrot.lane.b32.xlu1 %v334_v28, %s3182_s28  ;;  %v683_v13 = vmul.f32 %v682_v9, %v3396_v8  ;;  %v889_v28 = vrot.slane %v888_v22, 2  ;;  %v583_v34 = vmul.f32 %v582_v26, %v3369_v58  ;;  %v3422_v36 = vsel %vm171_vm6, %v170_v25, %v3303_v5 }
  0xaf   :  { %v854_v43 = vsel %vm134_vm5, %v852_v39, %v853_v40  ;;  %v176_v60 = vstv %s2891_s8  ;;  %v461_v59 = vmul.f32 %v460_v53, %v3228_v18  ;;  %v469_v1 = vmul.f32 %v3228_v18, %v3422_v36  ;;  %s2935_s8 = sld [smem:[#allocation3 + $0x46]] }
  0xb0   :  { %v3361_v52 = vmul.f32 %v854_v43, %v3231_v21  ;;  %v927_v11 = vpop.permute.xlu0 %926  ;;  %v891_v40 = vsel %vm171_vm6, %v889_v28, %v890_v30  ;;  %v187_v43 = vstv %s2892_s9  ;;  %v471_v2 = vstv %s2918_s17  ;;  %s2952_s9 = sld [smem:[#allocation3 + $0x31]]  ;;  %s2956_s17 = sld [smem:[#allocation3 + $0x4d]] }
  0xb1   :  { %v928_v14 = vrot.slane %v927_v11, 2  ;;  %v929_v19 = vrot.slane %v927_v11, 4  ;;  %v3436_v5 = vmul.f32 %v891_v40, %v3240_v23  ;;  %v500_v11 = vmul.f32 %v3228_v18, %v3385_v4 }
  0xb2   :  { %326 = vrot.lane.b32.xlu0 %v324_v41, %s3182_s28  ;;  %409 = vrot.lane.b32.xlu1 %v407_v42, %s3182_s28  ;;  %v859_v62 = vmul.f32 %v858_v56, %v3361_v52  ;;  %v344_v41 = vmul.f32 %v343_v37, %v3320_v17  ;;  %v3431_v42 = vmul.f32 %v3422_v36, %v3220_v15  ;;  %v961_v56 = vpop.permute.xlu1 %960  ;;  %v234_v12 = vstv %s2896_s20  ;;  %s2947_s20 = sld [smem:[#allocation3 + $0x4a]] }
  0xb3   :  { %v3416_v33 = vsel %vm219_vm4, %v928_v14, %v929_v19  ;;  %v896_v47 = vmul.f32 %v895_v44, %v3436_v5  ;;  %v962_v61 = vrot.slane %v961_v56, 2  ;;  %v968_v14 = vstv %s2963_s1  ;;  %s2953_s1 = sld [smem:[#allocation3 + $0x4c]] }
  0xb4   :  { %v932_v39 = vmul.f32 %v3416_v33, %v925_v32  ;;  %v177_v45 = vmul.f32 %v176_v60, %v3431_v42  ;;  %v188_v17 = vmul.f32 %v187_v43, %v3431_v42  ;;  %v3467_v22 = vmul.f32 %v3252_v24, %v3385_v4 }
  0xb5   :  { %v788_v25 = vstv %s2948_s2  ;;  %v736_v27 = vstv %s2943_s21  ;;  %v555_v28 = vstv %s2926_s22  ;;  %v3482_v40 = vmul.f32 %v3252_v24, %v3422_v36  ;;  %s2959_s2 = sld [smem:[#allocation3 + $0x4e]]  ;;  %s2965_s21 = sld [smem:[#allocation3 + $0x50]] }
  0xb6   :  { %399 = vrot.lane.b32.xlu0 %v397_v51, %s3182_s28  ;;  %308 = vrot.lane.b32.xlu1 %v306_v57, %s3182_s28  ;;  %v692_v51 = vstv %s2937_s13  ;;  %v416_v57 = vstv %s2911_s15  ;;  %v789_v30 = vmul.f32 %v788_v25, %v3467_v22  ;;  %v556_v32 = vmul.f32 %v555_v28, %v3272_v38  ;;  %s2958_s13 = sld [smem:[#allocation3 + $0x33]]  ;;  %s2961_s15 = sld [smem:[#allocation3 + $0x34]] }
  0xb7   :  { %v693_v55 = vmul.f32 %v692_v51, %v3396_v8  ;;  %v417_v0 = vmul.f32 %v416_v57, %v3331_v29  ;;  %v502_v29 = vstv %s2921_s19  ;;  %v757_v60 = vstv %s2945_s25  ;;  %s2962_s19 = sld [smem:[#allocation3 + $0x4f]]  ;;  %s115_s22 = sld [smem:[#allocation3]] }
  0xb8   :  { %v503_v19 = vmul.f32 %v502_v29, %v500_v11  ;;  %v522_v43 = vstv %s2923_s29  ;;  %v758_v38 = vmul.f32 %v757_v60, %v3482_v40  ;;  %v629_v50 = vstv %s2932_s6  ;;  %s2884_s25 = sld [smem:[#allocation5 + $0x1]]  ;;  %s3668_s6 = sld [smem:[#allocation3 + $0x12]] }
  0xb9   :  { %v523_v44 = vmul.f32 %v522_v43, %v500_v11  ;;  %v630_v53 = vmul.f32 %v629_v50, %v3377_v63  ;;  %v831_v57 = vstv %s2952_s9  ;;  %s2912_s29 = sld [smem:[#allocation3 + $0x9]]  ;;  %s3184_s9 = smov 17  }
  0xba   :  { %575 = vrot.lane.b32.xlu0 %v573_v3, %s3182_s28  ;;  %861 = vrot.lane.b32.xlu1 %v859_v62, %s3182_s28  ;;  %v963_v62 = vrot.slane %v961_v56, 4  ;;  %v481_v3 = vstv %s2919_s18  ;;  %v665_v56 = vstv %s2935_s8  ;;  %v832_v63 = vmul.f32 %v831_v57, %v3286_v49  ;;  %s2964_s18 = sld [smem:[#allocation3 + $0x35]] }
  0xbb   :  { %v482_v9 = vmul.f32 %v481_v3, %v469_v1  ;;  %s3752_s8 = sld [smem:[#allocation3 + $0x2d]] }
  0xbc   :  { %v905_v29 = vstv %s2958_s13  ;;  %s3000_s13 = sld [smem:[#allocation3 + $0x76]] }
  0xbe   :  { %612 = vrot.lane.b32.xlu0 %v610_v6, %s3182_s28  ;;  %622 = vrot.lane.b32.xlu1 %v620_v7, %s3182_s28  ;;  %v964_v6 = vsel %vm111_vm7, %v962_v61, %v963_v62  ;;  %v472_v7 = vmul.f32 %v471_v2, %v469_v1  ;;  %v666_v61 = vmul.f32 %v665_v56, %v3334_v31  ;;  %v702_v62 = vstv %s2938_s10  ;;  %s3808_s10 = sld [smem:[#allocation3 + $0x48]] }
  0xbf   :  { %v746_v2 = vstv %s2944_s11  ;;  %v703_v3 = vmul.f32 %v702_v62, %v3396_v8  ;;  %v906_v8 = vmul.f32 %v905_v29, %v3436_v5  ;;  %s2999_s11 = sld [smem:[#allocation3 + $0x5b]] }
  0xc0   :  { %v747_v31 = vmul.f32 %v746_v2, %v3252_v24  ;;  %v978_v28 = vstv %s2964_s18  ;;  %v116_v2 = vstv %s115_s22  ;;  %s2981_s18 = sld [smem:[#allocation3 + $0x55]]  ;;  %s3008_s22 = sld [smem:[#allocation3 + $0x5e]] }
  0xc2   :  { %685 = vrot.lane.b32.xlu0 %v683_v13, %s3182_s28  ;;  %216 = vrot.lane.b32.xlu1 %v214_v20, %s3179_s0  ;;  %v3462_v13 = vmul.f32 %v964_v6, %v3231_v21  ;;  %v235_v20 = vmul.f32 %v234_v12, %v3403_v10  ;;  %v737_v10 = vmul.f32 %v736_v27, %v3252_v24  ;;  %v868_v6 = vstv %s2955_s12  ;;  %s2972_s12 = sld [smem:[#allocation3 + $0x52]] }
  0xc3   :  { %v808_v12 = vstv %s2950_s14  ;;  %v878_v24 = vstv %s2956_s17  ;;  %s2973_s14 = sld [smem:[#allocation3 + $0x6d]]  ;;  %s2974_s17 = sld [smem:[#allocation3 + $0x88]] }
  0xc4   :  { %v969_v26 = vmul.f32 %v968_v14, %v3462_v13  ;;  %v809_v14 = vmul.f32 %v808_v12, %v3467_v22  ;;  %v879_v27 = vmul.f32 %v878_v24, %v3361_v52 }
  0xc6   :  { %585 = vrot.lane.b32.xlu0 %v583_v34, %s3182_s28  ;;  %382 = vrot.lane.b32.xlu1 %v380_v35, %s3182_s28  ;;  %v197_v34 = vstv %s2893_s23  ;;  %v491_v35 = vstv %s2920_s24  ;;  %s91_s23 = sld [smem:[#allocation5]]  ;;  %s2886_s24 = sld [smem:[#allocation3 + $0x1b]] }
  0xc7   :  { %v198_v37 = vmul.f32 %v197_v34, %v3431_v42  ;;  %v592_v42 = vstv %s2929_s4  ;;  %s3655_s4 = sld [smem:[#allocation5 + $0x2]] }
  0xca   :  { %346 = vrot.lane.b32.xlu0 %v344_v41, %s3182_s28  ;;  %934 = vrot.lane.b32.xlu1 %v932_v39, %s3182_s28  ;;  %v492_v39 = vmul.f32 %v491_v35, %v469_v1  ;;  %v3484_v41 = vpop.permute.xlu1 %131  ;;  %v777_v35 = vstv %s2947_s20  ;;  %s3002_s20 = sld [smem:[#allocation3 + $0x5c]] }
  0xcc   :  { %v120_v29 = vstv %s2886_s24  ;;  %s2977_s24 = sld [smem:[#allocation3 + $0x89]] }
  0xce   :  { %179 = vrot.lane.b32.xlu0 %v177_v45, %s3183_s16  ;;  %190 = vrot.lane.b32.xlu1 %v188_v17, %s3183_s16  ;;  %v512_v45 = vstv %s2922_s30  ;;  %v3491_v17 = vpop.permute.xlu1 %142  ;;  %s3644_s30 = sld [smem:[#allocation3 + $0x36]] }
  0xcf   :  { %v513_v46 = vmul.f32 %v512_v45, %v500_v11  ;;  %v144_v24 = vrot.slane %v3491_v17, 2 }
  0xd2   :  { %898 = vrot.lane.b32.xlu0 %v896_v47, %s3182_s28  ;;  %227 = vrot.lane.b32.xlu1 %v225_v48, %s3179_s0  ;;  %v593_v47 = vmul.f32 %v592_v42, %v3369_v58  ;;  %v767_v48 = vstv %s2946_s5  ;;  %v3502_v58 = vpop.permute.xlu0 %108  ;;  %s3660_s5 = sld [smem:[#allocation3 + $0x24]] }
  0xd3   :  { %v768_v51 = vmul.f32 %v767_v48, %v3482_v40  ;;  %v110_v56 = vrot.slane %v3502_v58, 6 }
  0xd6   :  { %658 = vrot.lane.b32.xlu0 %v656_v54, %s3182_s28  ;;  %695 = vrot.lane.b32.xlu1 %v693_v55, %s3182_s28  ;;  %v3498_v54 = vpop.permute.xlu1 %260  ;;  %v798_v55 = vstv %s2949_s7  ;;  %v3511_v1 = vpop.permute.xlu0 %250  ;;  %s3689_s7 = sld [smem:[#allocation3 + $0x3f]] }
  0xda   :  { %419 = vrot.lane.b32.xlu0 %v417_v0, %s3182_s28  ;;  %463 = vrot.lane.b32.xlu1 %v461_v59, %s3180_s26  ;;  %v799_v59 = vmul.f32 %v798_v55, %v3467_v22  ;;  %v3509_v0 = vpop.permute.xlu1 %152  ;;  %v3520_v11 = vpop.permute.xlu0 %443 }
  0xde   :  { %474 = vrot.lane.b32.xlu0 %v472_v7, %s3183_s16  ;;  %484 = vrot.lane.b32.xlu1 %v482_v9, %s3183_s16  ;;  %v869_v7 = vmul.f32 %v868_v6, %v3361_v52  ;;  %v3518_v9 = vpop.permute.xlu1 %729  ;;  %v3530_v25 = vpop.permute.xlu0 %538  ;;  %v841_v52 = vstv %s2953_s1  ;;  %s2978_s1 = sld [smem:[#allocation3 + $0x54]] }
  0xdf   :  { %v842_v43 = vmul.f32 %v841_v52, %v3286_v49 }
  0xe2   :  { %505 = vrot.lane.b32.xlu0 %v503_v19, %s3179_s0  ;;  %237 = vrot.lane.b32.xlu1 %v235_v20, %s3179_s0  ;;  %v941_v19 = vstv %s2961_s15  ;;  %v3528_v20 = vpop.permute.xlu1 %548  ;;  %s2975_s15 = sld [smem:[#allocation3 + $0x53]] }
  0xe6   :  { %971 = vrot.lane.b32.xlu0 %v969_v26, %s3182_s28  ;;  %791 = vrot.lane.b32.xlu1 %v789_v30, %s3179_s0  ;;  %v942_v26 = vmul.f32 %v941_v19, %v3416_v33  ;;  %v951_v30 = vstv %s2962_s19  ;;  %s3026_s19 = sld [smem:[#allocation3 + $0x64]] }
  0xe7   :  { %v952_v34 = vmul.f32 %v951_v30, %v3416_v33  ;;  %v915_v33 = vstv %s2959_s2  ;;  %s3005_s2 = sld [smem:[#allocation3 + $0x5d]] }
  0xe8   :  { %v916_v42 = vmul.f32 %v915_v33, %v3436_v5 }
  0xea   :  { %739 = vrot.lane.b32.xlu0 %v737_v10, %s3180_s26  ;;  %558 = vrot.lane.b32.xlu1 %v556_v32, %s3182_s28  ;;  %v979_v10 = vmul.f32 %v978_v28, %v3462_v13  ;;  %v3539_v32 = vpop.permute.xlu0 %453 }
  0xee   :  { %200 = vrot.lane.b32.xlu0 %v198_v37, %s3183_s16  ;;  %494 = vrot.lane.b32.xlu1 %v492_v39, %s3183_s16  ;;  %v778_v39 = vmul.f32 %v777_v35, %v3482_v40  ;;  %v3548_v60 = vpop.permute.xlu0 %270 }
  0xf2   :  { %760 = vrot.lane.b32.xlu0 %v758_v38, %s3183_s16  ;;  %525 = vrot.lane.b32.xlu1 %v523_v44, %s3179_s0  ;;  %v3554_v44 = vpop.permute.xlu0 %824 }
  0xf6   :  { %515 = vrot.lane.b32.xlu0 %v513_v46, %s3179_s0  ;;  %595 = vrot.lane.b32.xlu1 %v593_v47, %s3182_s28  ;;  %v988_v46 = vstv %s2965_s21  ;;  %s2976_s21 = sld [smem:[#allocation3 + $0x6e]] }
  0xf7   :  { %v989_v49 = vmul.f32 %v988_v46, %v3462_v13 }
  0xfa   :  { %770 = vrot.lane.b32.xlu0 %v768_v51, %s3183_s16  ;;  %632 = vrot.lane.b32.xlu1 %v630_v53, %s3182_s28 }
  0xfe   :  { %801 = vrot.lane.b32.xlu0 %v799_v59, %s3179_s0  ;;  %668 = vrot.lane.b32.xlu1 %v666_v61, %s3182_s28  ;;  %v3585_v59 = vsel %vm111_vm7, %v110_v56, %v3502_v58  ;;  %v133_v58 = vrot.slane %v3484_v41, 2 }
 0x100   :  { %v135_v19 = vsel %vm134_vm5, %v3484_v41, %v133_v58 }
 0x102   :  { %834 = vrot.lane.b32.xlu0 %v832_v63, %s3182_s28  ;;  %705 = vrot.lane.b32.xlu1 %v703_v3, %s3182_s28  ;;  %v3591_v63 = vmul.f32 %v3585_v59, %v3220_v15 }
 0x104   :  { %v121_v15 = vmul.f32 %v120_v29, %v3591_v63 }
 0x106   :  { %871 = vrot.lane.b32.xlu0 %v869_v7, %s3182_s28  ;;  %749 = vrot.lane.b32.xlu1 %v747_v31, %s3180_s26  ;;  %v117_v31 = vmul.f32 %v116_v2, %v3591_v63  ;;  %v92_v7 = vstv %s91_s23  ;;  %s2979_s23 = sld [smem:[#allocation3 + $0x6f]] }
 0x10a   :  { %908 = vrot.lane.b32.xlu0 %v906_v8, %s3182_s28  ;;  %811 = vrot.lane.b32.xlu1 %v809_v14, %s3179_s0  ;;  %v118_v14 = vadd.f32 %v117_v31, %v92_v7 }
 0x10c   :  { %v137_v35 = vadd.f32 %v135_v19, %v118_v14 }
 0x10e   :  { %944 = vrot.lane.b32.xlu0 %v942_v26, %s3182_s28  ;;  %881 = vrot.lane.b32.xlu1 %v879_v27, %s3182_s28  ;;  %v94_v26 = vstv %s2884_s25  ;;  %s2982_s25 = sld [smem:[#allocation3 + $0x70]] }
 0x10f   :  { %v122_v52 = vadd.f32 %v121_v15, %v94_v26 }
 0x110   :  { %v3536_v22 = vpop.permute.xlu1 %362 }
 0x112   :  { %981 = vrot.lane.b32.xlu0 %v979_v10, %s3182_s28  ;;  %954 = vrot.lane.b32.xlu1 %v952_v34, %s3182_s28 }
 0x114   :  { %v3544_v37 = vpop.permute.xlu1 %372 }
 0x116   :  { %780 = vrot.lane.b32.xlu0 %v778_v39, %s3183_s16  ;;  %v145_v39 = vsel %vm134_vm5, %v3491_v17, %v144_v24 }
 0x117   :  { %v147_v7 = vadd.f32 %v145_v39, %v122_v52 }
 0x118   :  { %v3551_v38 = vpop.permute.xlu1 %288 }
 0x11a   :  { %844 = vrot.lane.b32.xlu0 %v842_v43, %s3182_s28  ;;  %v252_v43 = vrot.slane %v3511_v1, 6 }
 0x11c   :  { %v3556_v45 = vpop.permute.xlu1 %298  ;;  %v253_v17 = vsel %vm111_vm7, %v252_v43, %v3511_v1  ;;  %v3637_v43 = vmul.f32 %v3228_v18, %v3585_v59 }
 0x11e   :  { %918 = vrot.lane.b32.xlu0 %v916_v42, %s3182_s28 }
 0x120   :  { %v3560_v40 = vpop.permute.xlu0 %648  ;;  %v3562_v47 = vpop.permute.xlu1 %336 }
 0x122   :  { %991 = vrot.lane.b32.xlu0 %v989_v49, %s3182_s28  ;;  %v290_v49 = vrot.slane %v3551_v38, 6 }
 0x124   :  { %v3566_v48 = vpop.permute.xlu0 %326  ;;  %v3568_v50 = vpop.permute.xlu1 %409 }
 0x125   :  { %v328_v29 = vrot.slane %v3566_v48, 6 }
 0x127   :  { %v329_v1 = vsel %vm111_vm7, %v328_v29, %v3566_v48  ;;  %v428_v48 = vstv %s2912_s29  ;;  %s3029_s29 = sld [smem:[#allocation3 + $0x65]] }
 0x128   :  { %v3570_v51 = vpop.permute.xlu0 %399  ;;  %v3572_v53 = vpop.permute.xlu1 %308  ;;  %v429_v18 = vmul.f32 %v428_v48, %v3637_v43 }
 0x12c   :  { %v3574_v5 = vpop.permute.xlu0 %575  ;;  %v3576_v55 = vpop.permute.xlu1 %861 }
 0x130   :  { %v3579_v57 = vpop.permute.xlu0 %612  ;;  %v3581_v13 = vpop.permute.xlu1 %622 }
 0x134   :  { %v3587_v61 = vpop.permute.xlu0 %685  ;;  %v217_v62 = vpop.permute.xlu1 %216 }
 0x135   :  { %v218_v30 = vrot.slane %v217_v62, 2 }
 0x137   :  { %v220_v56 = vsel %vm219_vm4, %v217_v62, %v218_v30  ;;  %v262_v62 = vrot.slane %v3498_v54, 6 }
 0x138   :  { %v3593_v3 = vpop.permute.xlu0 %585  ;;  %v3595_v6 = vpop.permute.xlu1 %382 }
 0x13c   :  { %v3599_v12 = vpop.permute.xlu0 %346  ;;  %v3601_v8 = vpop.permute.xlu1 %934 }
 0x140   :  { %v180_v27 = vpop.permute.xlu0 %179  ;;  %v191_v28 = vpop.permute.xlu1 %190 }
 0x141   :  { %v181_v10 = vrot.slane %v180_v27, 2  ;;  %v192_v34 = vrot.slane %v191_v28, 2 }
 0x143   :  { %v183_v33 = vsel %vm182_vm8, %v180_v27, %v181_v10  ;;  %v193_v2 = vsel %vm182_vm8, %v191_v28, %v192_v34  ;;  %v364_v27 = vrot.slane %v3536_v22, 6  ;;  %v291_v28 = vsel %vm111_vm7, %v290_v49, %v3551_v38 }
 0x144   :  { %v185_v42 = vadd.f32 %v183_v33, %v137_v35  ;;  %v3611_v41 = vpop.permute.xlu0 %898  ;;  %v228_v46 = vpop.permute.xlu1 %227  ;;  %v195_v19 = vadd.f32 %v193_v2, %v147_v7  ;;  %v401_v34 = vrot.slane %v3570_v51, 6  ;;  %v263_v33 = vsel %vm111_vm7, %v262_v62, %v3498_v54 }
 0x145   :  { %v229_v31 = vrot.slane %v228_v46, 2  ;;  %v365_v38 = vsel %vm111_vm7, %v364_v27, %v3536_v22  ;;  %v338_v7 = vrot.slane %v3562_v47, 6 }
 0x146   :  { %v222_v58 = vadd.f32 %v220_v56, %v185_v42  ;;  %v300_v42 = vrot.slane %v3556_v45, 6  ;;  %v445_v56 = vrot.slane %v3520_v11, 2  ;;  %v402_v2 = vsel %vm111_vm7, %v401_v34, %v3570_v51 }
 0x147   :  { %v230_v14 = vsel %vm219_vm4, %v228_v46, %v229_v31 }
 0x148   :  { %v255_v15 = vadd.f32 %v253_v17, %v222_v58  ;;  %v3620_v24 = vpop.permute.xlu0 %658  ;;  %v3622_v26 = vpop.permute.xlu1 %695  ;;  %v232_v10 = vadd.f32 %v230_v14, %v195_v19  ;;  %v301_v22 = vsel %vm111_vm7, %v300_v42, %v3556_v45  ;;  %v446_v51 = vsel %vm134_vm5, %v3520_v11, %v445_v56 }
 0x149   :  { %v374_v45 = vrot.slane %v3544_v37, 6  ;;  %v124_v11 = vstv %s3644_s30  ;;  %v614_v56 = vrot.slane %v3579_v57, 6  ;;  %s3003_s30 = sld [smem:[#allocation3 + $0x77]] }
 0x14a   :  { %v293_v30 = vadd.f32 %v291_v28, %v255_v15  ;;  %v265_v46 = vadd.f32 %v263_v33, %v232_v10  ;;  %v540_v15 = vrot.slane %v3530_v25, 6  ;;  %v339_v28 = vsel %vm111_vm7, %v338_v7, %v3562_v47 }
 0x14b   :  { %v650_v7 = vrot.slane %v3560_v40, 6 }
 0x14c   :  { %v331_v35 = vadd.f32 %v329_v1, %v293_v30  ;;  %v3631_v52 = vpop.permute.xlu0 %419  ;;  %v3633_v39 = vpop.permute.xlu1 %463  ;;  %v303_v29 = vadd.f32 %v301_v22, %v265_v46  ;;  %v541_v47 = vsel %vm111_vm7, %v540_v15, %v3530_v25  ;;  %v375_v46 = vsel %vm111_vm7, %v374_v45, %v3544_v37 }
 0x14d   :  { %v154_v22 = vrot.slane %v3509_v0, 2  ;;  %v432_v37 = vstv %s3660_s5  ;;  %v687_v15 = vrot.slane %v3587_v61, 6  ;;  %s2980_s5 = sld [smem:[#allocation3 + $0x8a]] }
 0x14e   :  { %v367_v49 = vadd.f32 %v365_v38, %v331_v35  ;;  %v341_v1 = vadd.f32 %v339_v28, %v303_v29  ;;  %v577_v35 = vrot.slane %v3574_v5, 6 }
 0x150   :  { %v475_v31 = vpop.permute.xlu0 %474  ;;  %v404_v58 = vadd.f32 %v402_v2, %v367_v49  ;;  %v3650_v54 = vpop.permute.xlu1 %484  ;;  %v411_v49 = vrot.slane %v3568_v50, 6  ;;  %v125_v2 = vmul.f32 %v124_v11, %v3591_v63  ;;  %v578_v25 = vsel %vm111_vm7, %v577_v35, %v3574_v5 }
 0x151   :  { %v476_v17 = vrot.slane %v475_v31, 2  ;;  %v433_v11 = vmul.f32 %v432_v37, %v3637_v43 }
 0x152   :  { %v430_v14 = vadd.f32 %v429_v18, %v404_v58  ;;  %v377_v18 = vadd.f32 %v375_v46, %v341_v1  ;;  %v96_v58 = vstv %s3655_s4  ;;  %v412_v63 = vsel %vm111_vm7, %v411_v49, %v3568_v50  ;;  %s3006_s4 = sld [smem:[#allocation3 + $0x78]] }
 0x153   :  { %v477_v30 = vsel %vm182_vm8, %v475_v31, %v476_v17  ;;  %v126_v5 = vadd.f32 %v125_v2, %v96_v58  ;;  %v731_v1 = vrot.slane %v3518_v9, 2  ;;  %v651_v50 = vsel %vm111_vm7, %v650_v7, %v3560_v40 }
 0x154   :  { %v448_v19 = vadd.f32 %v446_v51, %v430_v14  ;;  %v506_v62 = vpop.permute.xlu0 %505  ;;  %v3662_v27 = vpop.permute.xlu1 %237  ;;  %v615_v51 = vsel %vm111_vm7, %v614_v56, %v3579_v57  ;;  %v414_v45 = vadd.f32 %v412_v63, %v377_v18  ;;  %v550_v57 = vrot.slane %v3528_v20, 6 }
 0x155   :  { %v507_v10 = vrot.slane %v506_v62, 2  ;;  %v272_v56 = vrot.slane %v3548_v60, 6  ;;  %v310_v58 = vrot.slane %v3572_v53, 6  ;;  %v436_v7 = vstv %s3689_s7  ;;  %s3032_s7 = sld [smem:[#allocation3 + $0x66]] }
 0x156   :  { %v479_v34 = vadd.f32 %v477_v30, %v448_v19  ;;  %v3145_v19 = vld [vmem:[#allocation2 + $0x10] sm:$0xff]  ;;  %v714_v30 = vstv %s3668_s6  ;;  %v434_v2 = vadd.f32 %v433_v11, %v414_v45  ;;  %s2983_s6 = sld [smem:[#allocation3 + $0x8b]] }
 0x157   :  { %v508_v33 = vsel %vm219_vm4, %v506_v62, %v507_v10  ;;  %v3702_v62 = vmul.f32 %v3145_v19, %v3585_v59  ;;  %v155_v10 = vsel %vm134_vm5, %v3509_v0, %v154_v22  ;;  %v239_v0 = vrot.slane %v3662_v27, 2 }
 0x158   :  { %v510_v38 = vadd.f32 %v508_v33, %v479_v34  ;;  %v3673_v42 = vpop.permute.xlu0 %971  ;;  %v3675_v48 = vpop.permute.xlu1 %791  ;;  %v455_v34 = vrot.slane %v3539_v32, 2  ;;  %v157_v40 = vadd.f32 %v155_v10, %v126_v5  ;;  %v273_v45 = vsel %vm111_vm7, %v272_v56, %v3548_v60 }
 0x159   :  { %v715_v49 = vmul.f32 %v714_v30, %v3702_v62  ;;  %v793_v19 = vrot.slane %v3675_v48, 2  ;;  %v311_v10 = vsel %vm111_vm7, %v310_v58, %v3572_v53 }
 0x15a   :  { %v543_v31 = vadd.f32 %v541_v47, %v510_v38  ;;  %v688_v47 = vsel %vm111_vm7, %v687_v15, %v3587_v61  ;;  %v551_v61 = vsel %vm111_vm7, %v550_v57, %v3528_v20  ;;  %v486_v15 = vrot.slane %v3650_v54, 2 }
 0x15b   :  { %v587_v57 = vrot.slane %v3593_v3, 6  ;;  %v794_v53 = vsel %vm219_vm4, %v3675_v48, %v793_v19 }
 0x15c   :  { %v580_v17 = vadd.f32 %v578_v25, %v543_v31  ;;  %v3692_v29 = vpop.permute.xlu0 %739  ;;  %v3694_v14 = vpop.permute.xlu1 %558  ;;  %v732_v31 = vsel %vm134_vm5, %v3518_v9, %v731_v1  ;;  %v456_v25 = vsel %vm134_vm5, %v3539_v32, %v455_v34  ;;  %v240_v9 = vsel %vm219_vm4, %v3662_v27, %v239_v0 }
 0x15d   :  { %v458_v20 = vadd.f32 %v456_v25, %v434_v2  ;;  %v826_v32 = vrot.slane %v3554_v44, 6  ;;  %v348_v1 = vrot.slane %v3599_v12, 6  ;;  %v863_v27 = vrot.slane %v3576_v55, 6 }
 0x15e   :  { %v617_v28 = vadd.f32 %v615_v51, %v580_v17 }
 0x15f   :  { %v827_v2 = vsel %vm111_vm7, %v826_v32, %v3554_v44  ;;  %v864_v48 = vsel %vm111_vm7, %v863_v27, %v3576_v55  ;;  %v588_v44 = vsel %vm111_vm7, %v587_v57, %v3593_v3  ;;  %v973_v3 = vrot.slane %v3673_v42, 6 }
 0x160   :  { %v201_v35 = vpop.permute.xlu0 %200  ;;  %v3713_v33 = vpop.permute.xlu1 %494  ;;  %v653_v38 = vadd.f32 %v651_v50, %v617_v28  ;;  %v697_v27 = vrot.slane %v3622_v26, 6 }
 0x161   :  { %v202_v46 = vrot.slane %v201_v35, 2 }
 0x162   :  { %v690_v18 = vadd.f32 %v688_v47, %v653_v38  ;;  %v384_v38 = vrot.slane %v3595_v6, 6  ;;  %v487_v47 = vsel %vm182_vm8, %v3650_v54, %v486_v15  ;;  %v936_v15 = vrot.slane %v3601_v8, 6 }
 0x163   :  { %v203_v22 = vsel %vm182_vm8, %v201_v35, %v202_v46  ;;  %v900_v46 = vrot.slane %v3611_v41, 6 }
 0x164   :  { %v205_v37 = vadd.f32 %v203_v22, %v157_v40  ;;  %v761_v17 = vpop.permute.xlu0 %760  ;;  %v716_v63 = vadd.f32 %v715_v49, %v690_v18  ;;  %v3729_v51 = vpop.permute.xlu1 %525  ;;  %v489_v49 = vadd.f32 %v487_v47, %v458_v20  ;;  %v349_v18 = vsel %vm111_vm7, %v348_v1, %v3599_v12 }
 0x165   :  { %v762_v5 = vrot.slane %v761_v17, 2  ;;  %v385_v12 = vsel %vm111_vm7, %v384_v38, %v3595_v6  ;;  %v437_v6 = vmul.f32 %v436_v7, %v3637_v43  ;;  %v527_v38 = vrot.slane %v3729_v51, 2 }
 0x166   :  { %v242_v28 = vadd.f32 %v240_v9, %v205_v37  ;;  %v734_v30 = vadd.f32 %v732_v31, %v716_v63  ;;  %v421_v31 = vrot.slane %v3631_v52, 6  ;;  %v624_v63 = vrot.slane %v3581_v13, 6 }
 0x167   :  { %v763_v50 = vsel %vm182_vm8, %v761_v17, %v762_v5  ;;  %v901_v9 = vsel %vm111_vm7, %v900_v46, %v3611_v41  ;;  %v698_v46 = vsel %vm111_vm7, %v697_v27, %v3622_v26 }
 0x168   :  { %v275_v34 = vadd.f32 %v273_v45, %v242_v28  ;;  %v765_v11 = vadd.f32 %v763_v50, %v734_v30  ;;  %v516_v35 = vpop.permute.xlu0 %515  ;;  %v3744_v60 = vpop.permute.xlu1 %595  ;;  %v660_v45 = vrot.slane %v3620_v24, 6  ;;  %v422_v20 = vsel %vm111_vm7, %v421_v31, %v3631_v52 }
 0x169   :  { %v517_v0 = vrot.slane %v516_v35, 2  ;;  %v465_v28 = vrot.slane %v3633_v39, 2  ;;  %v937_v50 = vsel %vm111_vm7, %v936_v15, %v3601_v8  ;;  %v496_v52 = vrot.slane %v3713_v33, 2 }
 0x16a   :  { %v313_v40 = vadd.f32 %v311_v10, %v275_v34  ;;  %v796_v56 = vadd.f32 %v794_v53, %v765_v11  ;;  %v718_v11 = vstv %s3752_s8  ;;  %v661_v43 = vsel %vm111_vm7, %v660_v45, %v3620_v24  ;;  %s3035_s8 = sld [smem:[#allocation3 + $0x67]] }
 0x16b   :  { %v518_v54 = vsel %vm219_vm4, %v516_v35, %v517_v0  ;;  %v466_v7 = vsel %vm134_vm5, %v3633_v39, %v465_v28  ;;  %v497_v24 = vsel %vm182_vm8, %v3713_v33, %v496_v52  ;;  %v597_v26 = vrot.slane %v3744_v60, 6 }
 0x16c   :  { %v351_v58 = vadd.f32 %v349_v18, %v313_v40  ;;  %v829_v22 = vadd.f32 %v827_v2, %v796_v56  ;;  %v520_v25 = vadd.f32 %v518_v54, %v489_v49  ;;  %v771_v37 = vpop.permute.xlu0 %770  ;;  %v3762_v17 = vpop.permute.xlu1 %632  ;;  %v741_v49 = vrot.slane %v3692_v29, 2 }
 0x16d   :  { %v560_v40 = vrot.slane %v3694_v14, 6  ;;  %v719_v56 = vmul.f32 %v718_v11, %v3702_v62  ;;  %v528_v18 = vsel %vm219_vm4, %v3729_v51, %v527_v38  ;;  %v772_v31 = vrot.slane %v771_v37, 2 }
 0x16e   :  { %v387_v55 = vadd.f32 %v385_v12, %v351_v58  ;;  %v553_v19 = vadd.f32 %v551_v61, %v520_v25  ;;  %v866_v5 = vadd.f32 %v864_v48, %v829_v22  ;;  %v625_v61 = vsel %vm111_vm7, %v624_v63, %v3581_v13 }
 0x16f   :  { %v974_v13 = vsel %vm111_vm7, %v973_v3, %v3673_v42  ;;  %v742_v33 = vsel %vm134_vm5, %v3692_v29, %v741_v49  ;;  %v561_v22 = vsel %vm111_vm7, %v560_v40, %v3694_v14  ;;  %v634_v25 = vrot.slane %v3762_v17, 6 }
 0x170   :  { %v424_v30 = vadd.f32 %v422_v20, %v387_v55  ;;  %v590_v32 = vadd.f32 %v588_v44, %v553_v19  ;;  %v802_v10 = vpop.permute.xlu0 %801  ;;  %v669_v1 = vpop.permute.xlu1 %668  ;;  %v903_v41 = vadd.f32 %v901_v9, %v866_v5  ;;  %v598_v51 = vsel %vm111_vm7, %v597_v26, %v3744_v60 }
 0x171   :  { %v803_v63 = vrot.slane %v802_v10, 2  ;;  %v773_v15 = vsel %vm182_vm8, %v771_v37, %v772_v31  ;;  %v670_v9 = vrot.slane %v669_v1, 6  ;;  %v635_v14 = vsel %vm111_vm7, %v634_v25, %v3762_v17 }
 0x172   :  { %v438_v57 = vadd.f32 %v437_v6, %v424_v30  ;;  %v627_v34 = vadd.f32 %v625_v61, %v590_v32  ;;  %v939_v35 = vadd.f32 %v937_v50, %v903_v41 }
 0x173   :  { %v804_v20 = vsel %vm219_vm4, %v802_v10, %v803_v63  ;;  %v671_v60 = vsel %vm111_vm7, %v670_v9, %v669_v1 }
 0x174   :  { %v468_v8 = vadd.f32 %v466_v7, %v438_v57  ;;  %v663_v47 = vadd.f32 %v661_v43, %v627_v34  ;;  %v835_v53 = vpop.permute.xlu0 %834  ;;  %v976_v0 = vadd.f32 %v974_v13, %v939_v35  ;;  %v706_v2 = vpop.permute.xlu1 %705  ;;  %v722_v57 = vstv %s3808_s10  ;;  %s3009_s10 = sld [smem:[#allocation3 + $0x79]] }
 0x175   :  { %v836_v55 = vrot.slane %v835_v53, 6  ;;  %v707_v28 = vrot.slane %v706_v2, 6  ;;  %v723_v1 = vmul.f32 %v722_v57, %v3702_v62  ;;  %v1040_v57 = vstv %s2972_s12  ;;  %s2991_s12 = sld [smem:[#allocation3 + $0x73]] }
 0x176   :  { %v499_v39 = vadd.f32 %v497_v24, %v468_v8  ;;  %v700_v42 = vadd.f32 %v698_v46, %v663_v47  ;;  %998 = vrot.lane.b32.xlu1 %v976_v0, %s3184_s9 }
 0x177   :  { %v837_v37 = vsel %vm111_vm7, %v836_v55, %v835_v53  ;;  %v708_v27 = vsel %vm111_vm7, %v707_v28, %v706_v2 }
 0x178   :  { %v530_v54 = vadd.f32 %v528_v18, %v499_v39  ;;  %v720_v48 = vadd.f32 %v719_v56, %v700_v42  ;;  %v872_v58 = vpop.permute.xlu0 %871  ;;  %v750_v29 = vpop.permute.xlu1 %749 }
 0x179   :  { %v873_v3 = vrot.slane %v872_v58, 6  ;;  %v751_v35 = vrot.slane %v750_v29, 2 }
 0x17a   :  { %v563_v44 = vadd.f32 %v561_v22, %v530_v54  ;;  %v744_v12 = vadd.f32 %v742_v33, %v720_v48 }
 0x17b   :  { %v874_v52 = vsel %vm111_vm7, %v873_v3, %v872_v58  ;;  %v752_v0 = vsel %vm134_vm5, %v750_v29, %v751_v35 }
 0x17c   :  { %v600_v19 = vadd.f32 %v598_v51, %v563_v44  ;;  %v775_v5 = vadd.f32 %v773_v15, %v744_v12  ;;  %v909_v45 = vpop.permute.xlu0 %908  ;;  %v812_v11 = vpop.permute.xlu1 %811 }
 0x17d   :  { %v910_v32 = vrot.slane %v909_v45, 6  ;;  %v813_v39 = vrot.slane %v812_v11, 2 }
 0x17e   :  { %v637_v30 = vadd.f32 %v635_v14, %v600_v19  ;;  %v806_v6 = vadd.f32 %v804_v20, %v775_v5 }
 0x17f   :  { %v911_v43 = vsel %vm111_vm7, %v910_v32, %v909_v45  ;;  %v814_v26 = vsel %vm219_vm4, %v812_v11, %v813_v39  ;;  %v1050_v11 = vstv %s2973_s14  ;;  %v1357_v39 = vstv %s3002_s20  ;;  %s3017_s14 = sld [smem:[#allocation3 + $0x61]]  ;;  %s3953_s20 = sld [smem:[#allocation3 + $0x57]] }
 0x180   :  { %v673_v41 = vadd.f32 %v671_v60, %v637_v30  ;;  %v839_v61 = vadd.f32 %v837_v37, %v806_v6  ;;  %v945_v50 = vpop.permute.xlu0 %944  ;;  %v882_v49 = vpop.permute.xlu1 %881 }
 0x181   :  { %v946_v17 = vrot.slane %v945_v50, 6  ;;  %v883_v31 = vrot.slane %v882_v49, 6 }
 0x182   :  { %v710_v34 = vadd.f32 %v708_v27, %v673_v41  ;;  %v876_v10 = vadd.f32 %v874_v52, %v839_v61  ;;  %v1326_v52 = vstv %s2999_s11  ;;  %s2990_s11 = sld [smem:[#allocation3 + $0x58]] }
 0x183   :  { %v947_v38 = vsel %vm111_vm7, %v946_v17, %v945_v50  ;;  %v884_v63 = vsel %vm111_vm7, %v883_v31, %v882_v49 }
 0x184   :  { %v913_v7 = vadd.f32 %v911_v43, %v876_v10  ;;  %v982_v13 = vpop.permute.xlu0 %981  ;;  %v724_v47 = vadd.f32 %v723_v1, %v710_v34  ;;  %v955_v48 = vpop.permute.xlu1 %954  ;;  %v1336_v10 = vstv %s3000_s13  ;;  %s2992_s13 = sld [smem:[#allocation3 + $0x8e]] }
 0x185   :  { %v983_v8 = vrot.slane %v982_v13, 6  ;;  %v956_v44 = vrot.slane %v955_v48, 6 }
 0x186   :  { %v949_v53 = vadd.f32 %v947_v38, %v913_v7  ;;  %v754_v42 = vadd.f32 %v752_v0, %v724_v47  ;;  %v1071_v7 = vstv %s2975_s15  ;;  %v1612_v0 = vstv %s3026_s19  ;;  %s3018_s15 = sld [smem:[#allocation3 + $0x7c]]  ;;  %s3951_s19 = sld [smem:[#allocation3 + $0x6a]] }
 0x187   :  { %v984_v46 = vsel %vm111_vm7, %v983_v8, %v982_v13  ;;  %v957_v19 = vsel %vm111_vm7, %v956_v44, %v955_v48  ;;  %v1060_v13 = vstv %s2974_s17  ;;  %v1145_v44 = vstv %s2982_s25  ;;  %s3027_s17 = sld [smem:[#allocation3 + $0x7f]]  ;;  %s3007_s25 = sld [smem:[#allocation3 + $0x93]] }
 0x188   :  { %v781_v40 = vpop.permute.xlu0 %780  ;;  %v986_v24 = vadd.f32 %v984_v46, %v949_v53  ;;  %v1132_v53 = vstv %s2981_s18  ;;  %s3030_s18 = sld [smem:[#allocation3 + $0x80]] }
 0x189   :  { %v782_v56 = vrot.slane %v781_v40, 2 }
 0x18a   :  { %1006 = vrot.lane.b32.xlu0 %v986_v24, %s3184_s9 }
 0x18b   :  { %v783_v62 = vsel %vm182_vm8, %v781_v40, %v782_v56  ;;  %v1102_v56 = vstv %s2978_s1  ;;  %s3959_s1 = sld [smem:[#allocation3 + $0x56]] }
 0x18c   :  { %v785_v2 = vadd.f32 %v783_v62, %v754_v42  ;;  %v845_v18 = vpop.permute.xlu0 %844 }
 0x18d   :  { %v846_v54 = vrot.slane %v845_v18, 6 }
 0x18e   :  { %v816_v58 = vadd.f32 %v814_v26, %v785_v2  ;;  %v1081_v26 = vstv %s2976_s21  ;;  %s3969_s21 = sld [smem:[#allocation3 + $0x91]] }
 0x18f   :  { %v847_v33 = vsel %vm111_vm7, %v846_v54, %v845_v18  ;;  %v1388_v18 = vstv %s3005_s2  ;;  %s2993_s2 = sld [smem:[#allocation3 + $0x59]] }
 0x190   :  { %v849_v22 = vadd.f32 %v847_v33, %v816_v58  ;;  %v919_v25 = vpop.permute.xlu0 %918  ;;  %v1418_v58 = vstv %s3008_s22  ;;  %v1112_v33 = vstv %s2979_s23  ;;  %s3033_s22 = sld [smem:[#allocation3 + $0x81]]  ;;  %s3985_s23 = sld [smem:[#allocation3 + $0x92]] }
 0x191   :  { %v920_v12 = vrot.slane %v919_v25, 6 }
 0x192   :  { %v886_v51 = vadd.f32 %v884_v63, %v849_v22  ;;  %v1091_v63 = vstv %s2977_s24  ;;  %s3011_s24 = sld [smem:[#allocation3 + $0x5f]] }
 0x193   :  { %v921_v15 = vsel %vm111_vm7, %v920_v12, %v919_v25 }
 0x194   :  { %v923_v9 = vadd.f32 %v921_v15, %v886_v51  ;;  %v992_v55 = vpop.permute.xlu0 %991 }
 0x195   :  { %v993_v5 = vrot.slane %v992_v55, 6 }
 0x196   :  { %v959_v29 = vadd.f32 %v957_v19, %v923_v9  ;;  %v1643_v9 = vstv %s3029_s29  ;;  %s3014_s29 = sld [smem:[#allocation3 + $0x60]] }
 0x197   :  { %v994_v45 = vsel %vm111_vm7, %v993_v5, %v992_v55  ;;  %v1367_v55 = vstv %s3003_s30  ;;  %s2985_s30 = sld [smem:[#allocation3 + $0x71]] }
 0x198   :  { %v996_v14 = vadd.f32 %v994_v45, %v959_v29  ;;  %v1398_v29 = vstv %s3006_s4  ;;  %v1122_v45 = vstv %s2980_s5  ;;  %s3020_s4 = sld [smem:[#allocation3 + $0x62]] }
 0x199   :  { %s2988_s5 = sld [smem:[#allocation3 + $0x72]] }
 0x19a   :  { %1013 = vrot.lane.b32.xlu1 %v996_v14, %s3184_s9 }
 0x1e8   :  { %v999_v20 = vpop.permute.xlu1 %998 }
 0x1e9   :  { %v1000_v28 = vrot.slane %v999_v20, 2 }
 0x1eb   :  { %v1002_v3 = vsel %vm1001_vm9, %v999_v20, %v1000_v28 }
 0x1ec   :  { %1004 = vst [vmem:[#allocation2 + $0x2] sm:$0xf] %v1002_v3  ;;  %v1155_v3 = vstv %s2983_s6  ;;  %s3012_s6 = sld [smem:[#allocation3 + $0x7a]] }
 0x1f3   :  { %v3836_v30 = vld [vmem:[#allocation2] sm:$0xff] }
 0x1f4   :  { %1201 = vrot.lane.b32.xlu1 %v3836_v30, %s3181_s27  ;;  %1164 = vrot.lane.b32.xlu0 %v3836_v30, %s3180_s26  ;;  %v1041_v34 = vmul.f32 %v1040_v57, %v3836_v30  ;;  %v1051_v43 = vmul.f32 %v1050_v11, %v3836_v30  ;;  %v1069_v1 = vmul.f32 %v3836_v30, %v3422_v36  ;;  %v3880_v47 = vrot.slane %v3836_v30, 2 }
 0x1f5   :  { %v1061_v8 = vmul.f32 %v1060_v13, %v3836_v30  ;;  %v1100_v24 = vmul.f32 %v3836_v30, %v3385_v4 }
 0x1f6   :  { %v1072_v38 = vmul.f32 %v1071_v7, %v1069_v1  ;;  %v1136_v46 = vmul.f32 %v3880_v47, %v1132_v53  ;;  %v1082_v54 = vmul.f32 %v1081_v26, %v1069_v1  ;;  %v1092_v12 = vmul.f32 %v1091_v63, %v1069_v1 }
 0x1f7   :  { %v1103_v62 = vmul.f32 %v1102_v56, %v1100_v24  ;;  %v1113_v25 = vmul.f32 %v1112_v33, %v1100_v24  ;;  %v1146_v51 = vmul.f32 %v1145_v44, %v3880_v47  ;;  %v1123_v20 = vmul.f32 %v1122_v45, %v1100_v24 }
 0x1f8   :  { %1274 = vrot.lane.b32.xlu1 %v3836_v30, %s3182_s28  ;;  %1240 = vrot.lane.b32.xlu0 %v3836_v30, %s3179_s0  ;;  %v1255_v7 = vstv %s2991_s12  ;;  %s4038_s12 = sld [smem:[#allocation3 + $0x68]] }
 0x1fc   :  { %v1007_v6 = vpop.permute.xlu0 %1006 }
 0x1fd   :  { %v1008_v60 = vrot.slane %v1007_v6, 2 }
 0x1ff   :  { %v1009_v37 = vsel %vm1001_vm9, %v1007_v6, %v1008_v60  ;;  %v1674_v6 = vstv %s3032_s7  ;;  %v1156_v60 = vmul.f32 %v1155_v3, %v3880_v47  ;;  %s4020_s7 = sld [smem:[#allocation3 + $0x8d]] }
 0x200   :  { %1011 = vst [vmem:[#allocation2 + $0xa] sm:$0xf] %v1009_v37 }
 0x207   :  { %v3847_v32 = vld [vmem:[#allocation2 + $0x8] sm:$0xff] }
 0x208   :  { %1487 = vrot.lane.b32.xlu1 %v3847_v32, %s3181_s27  ;;  %1450 = vrot.lane.b32.xlu0 %v3847_v32, %s3180_s26  ;;  %v1327_v17 = vmul.f32 %v1326_v52, %v3847_v32  ;;  %v1337_v35 = vmul.f32 %v1336_v10, %v3847_v32  ;;  %v3888_v40 = vmul.f32 %v3847_v32, %v3422_v36  ;;  %v3903_v48 = vrot.slane %v3847_v32, 2 }
 0x209   :  { %v3897_v2 = vmul.f32 %v3847_v32, %v3385_v4 }
 0x20a   :  { %v1358_v42 = vmul.f32 %v1357_v39, %v3888_v40  ;;  %v1422_v22 = vmul.f32 %v3903_v48, %v1418_v58  ;;  %v1368_v5 = vmul.f32 %v1367_v55, %v3888_v40 }
 0x20b   :  { %v1389_v31 = vmul.f32 %v1388_v18, %v3897_v2  ;;  %v1399_v14 = vmul.f32 %v1398_v29, %v3897_v2  ;;  %v1209_v29 = vstv %s3953_s20  ;;  %s3045_s20 = sld [smem:[#allocation3 + $0x85]] }
 0x20c   :  { %1560 = vrot.lane.b32.xlu1 %v3847_v32, %s3182_s28  ;;  %1526 = vrot.lane.b32.xlu0 %v3847_v32, %s3179_s0  ;;  %v1014_v41 = vpop.permute.xlu1 %1013 }
 0x20d   :  { %v1015_v61 = vrot.slane %v1014_v41, 2 }
 0x20f   :  { %v1016_v50 = vsel %vm1001_vm9, %v1014_v41, %v1015_v61  ;;  %v1704_v61 = vstv %s3035_s8  ;;  %s2994_s8 = sld [smem:[#allocation3 + $0x74]] }
 0x210   :  { %1018 = vst [vmem:[#allocation2 + $0x12] sm:$0xf] %v1016_v50  ;;  %v1431_v50 = vstv %s3009_s10  ;;  %s4026_s10 = sld [smem:[#allocation3 + $0x8c]] }
 0x211   :  { %v1432_v57 = vmul.f32 %v1431_v50, %v3903_v48 }
 0x217   :  { %v3858_v27 = vld [vmem:[#allocation2 + $0x10] sm:$0xff] }
 0x218   :  { %1773 = vrot.lane.b32.xlu1 %v3858_v27, %s3181_s27  ;;  %1736 = vrot.lane.b32.xlu0 %v3858_v27, %s3180_s26  ;;  %v1613_v49 = vmul.f32 %v1612_v0, %v3858_v27  ;;  %v3913_v15 = vmul.f32 %v3858_v27, %v3422_v36  ;;  %v3924_v28 = vmul.f32 %v3858_v27, %v3385_v4  ;;  %v3931_v41 = vrot.slane %v3858_v27, 2 }
 0x21a   :  { %v1644_v19 = vmul.f32 %v1643_v9, %v3913_v15  ;;  %v1675_v37 = vmul.f32 %v1674_v6, %v3924_v28  ;;  %v1708_v52 = vmul.f32 %v3931_v41, %v1704_v61 }
 0x21c   :  { %1846 = vrot.lane.b32.xlu1 %v3858_v27, %s3182_s28  ;;  %1812 = vrot.lane.b32.xlu0 %v3858_v27, %s3179_s0 }
 0x220   :  { %1329 = vrot.lane.b32.xlu1 %v1327_v17, %s3180_s26  ;;  %1043 = vrot.lane.b32.xlu0 %v1041_v34, %s3180_s26 }
 0x224   :  { %1339 = vrot.lane.b32.xlu1 %v1337_v35, %s3180_s26  ;;  %1053 = vrot.lane.b32.xlu0 %v1051_v43, %s3180_s26  ;;  %v1239_v35 = vstv %s2990_s11  ;;  %s4028_s11 = sld [smem:[#allocation3 + $0x69]] }
 0x228   :  { %1074 = vrot.lane.b32.xlu1 %v1072_v38, %s3183_s16  ;;  %1063 = vrot.lane.b32.xlu0 %v1061_v8, %s3180_s26  ;;  %v1265_v38 = vstv %s2992_s13  ;;  %s4040_s13 = sld [smem:[#allocation3 + $0x8f]] }
 0x22c   :  { %1138 = vrot.lane.b32.xlu1 %v1136_v46, %s3182_s28  ;;  %1615 = vrot.lane.b32.xlu0 %v1613_v49, %s3180_s26  ;;  %v1525_v49 = vstv %s3017_s14  ;;  %s3015_s14 = sld [smem:[#allocation3 + $0x7b]] }
 0x230   :  { %1360 = vrot.lane.b32.xlu1 %v1358_v42, %s3183_s16  ;;  %1105 = vrot.lane.b32.xlu0 %v1103_v62, %s3179_s0  ;;  %v1541_v42 = vstv %s3018_s15  ;;  %s3047_s15 = sld [smem:[#allocation3 + $0x6b]] }
 0x234   :  { %1391 = vrot.lane.b32.xlu1 %v1389_v31, %s3179_s0  ;;  %1084 = vrot.lane.b32.xlu0 %v1082_v54, %s3183_s16  ;;  %v1622_v31 = vstv %s3027_s17  ;;  %s3021_s17 = sld [smem:[#allocation3 + $0x7d]] }
 0x238   :  { %1424 = vrot.lane.b32.xlu1 %v1422_v22, %s3182_s28  ;;  %1115 = vrot.lane.b32.xlu0 %v1113_v25, %s3179_s0  ;;  %v1623_v22 = vmul.f32 %v1622_v31, %v3858_v27  ;;  %v1653_v25 = vstv %s3030_s18  ;;  %s3036_s18 = sld [smem:[#allocation3 + $0x82]] }
 0x23c   :  { %1094 = vrot.lane.b32.xlu1 %v1092_v12, %s3183_s16  ;;  %1148 = vrot.lane.b32.xlu0 %v1146_v51, %s3182_s28 }
 0x240   :  { %1646 = vrot.lane.b32.xlu1 %v1644_v19, %s3183_s16  ;;  %1370 = vrot.lane.b32.xlu0 %v1368_v5, %s3183_s16  ;;  %v1654_v19 = vmul.f32 %v1653_v25, %v3913_v15  ;;  %v1811_v5 = vstv %s3951_s19  ;;  %s3010_s19 = sld [smem:[#allocation3 + $0x94]] }
 0x244   :  { %1401 = vrot.lane.b32.xlu1 %v1399_v14, %s3179_s0  ;;  %1125 = vrot.lane.b32.xlu0 %v1123_v20, %s3179_s0 }
 0x248   :  { %1158 = vrot.lane.b32.xlu1 %v1156_v60, %s3182_s28  ;;  %1677 = vrot.lane.b32.xlu0 %v1675_v37, %s3179_s0 }
 0x24c   :  { %1710 = vrot.lane.b32.xlu1 %v1708_v52, %s3182_s28  ;;  %1434 = vrot.lane.b32.xlu0 %v1432_v57, %s3182_s28 }
 0x266   :  { %v1165_v17 = vpop.permute.xlu0 %1164  ;;  %v1202_v39 = vpop.permute.xlu1 %1201 }
 0x267   :  { %v1203_v18 = vrot.slane %v1202_v39, 2  ;;  %v1204_v26 = vrot.slane %v1202_v39, 4  ;;  %v1166_v58 = vrot.slane %v1165_v17, 2  ;;  %v1167_v63 = vrot.slane %v1165_v17, 4 }
 0x269   :  { %v1205_v44 = vsel %vm171_vm6, %v1203_v18, %v1204_v26  ;;  %v1168_v45 = vsel %vm134_vm5, %v1166_v58, %v1167_v63  ;;  %v1495_v58 = vstv %s3014_s29  ;;  %s3031_s29 = sld [smem:[#allocation3 + $0x9b]] }
 0x26a   :  { %v1241_v34 = vpop.permute.xlu0 %1240  ;;  %v1275_v54 = vpop.permute.xlu1 %1274  ;;  %v3964_v9 = vmul.f32 %v1205_v44, %v3240_v23  ;;  %v3978_v60 = vmul.f32 %v1168_v45, %v3231_v21  ;;  %v1568_v44 = vstv %s3020_s4  ;;  %s3037_s4 = sld [smem:[#allocation3 + $0x9d]] }
 0x26b   :  { %v1242_v10 = vrot.slane %v1241_v34, 2  ;;  %v1243_v11 = vrot.slane %v1241_v34, 4  ;;  %v1276_v12 = vrot.slane %v1275_v54, 2  ;;  %v1277_v51 = vrot.slane %v1275_v54, 4 }
 0x26c   :  { %v1210_v52 = vmul.f32 %v1209_v29, %v3964_v9  ;;  %v1172_v34 = vstv %s3959_s1  ;;  %v1408_v54 = vstv %s3007_s25  ;;  %v1468_v29 = vstv %s3012_s6  ;;  %s3019_s1 = sld [smem:[#allocation3 + $0x97]]  ;;  %s3022_s25 = sld [smem:[#allocation3 + $0x98]] }
 0x26d   :  { %v1244_v43 = vsel %vm219_vm4, %v1242_v10, %v1243_v11  ;;  %v1278_v14 = vsel %vm111_vm7, %v1276_v12, %v1277_v51  ;;  %v1282_v10 = vstv %s2993_s2  ;;  %v1173_v11 = vmul.f32 %v1172_v34, %v3978_v60  ;;  %s3039_s2 = sld [smem:[#allocation3 + $0x83]]  ;;  %s3043_s6 = sld [smem:[#allocation3 + $0x9f]] }
 0x26e   :  { %v1246_v1 = vmul.f32 %v1244_v43, %v1239_v35  ;;  %v1256_v13 = vmul.f32 %v1255_v7, %v1244_v43  ;;  %v1266_v8 = vmul.f32 %v1265_v38, %v1244_v43  ;;  %v3981_v37 = vmul.f32 %v1278_v14, %v3231_v21 }
 0x26f   :  { %v1346_v43 = vstv %s3969_s21  ;;  %v1684_v38 = vstv %s3033_s22  ;;  %v1409_v25 = vmul.f32 %v1408_v54, %v3897_v2  ;;  %s3013_s21 = sld [smem:[#allocation3 + $0x95]]  ;;  %s3042_s22 = sld [smem:[#allocation3 + $0x84]] }
 0x270   :  { %1248 = vrot.lane.b32.xlu0 %v1246_v1, %s3182_s28  ;;  %v1283_v35 = vmul.f32 %v1282_v10, %v3981_v37 }
 0x274   :  { %1258 = vrot.lane.b32.xlu0 %v1256_v13, %s3182_s28 }
 0x278   :  { %1268 = vrot.lane.b32.xlu0 %v1266_v8, %s3182_s28 }
 0x27a   :  { %v3943_v47 = vpop.permute.xlu0 %1450  ;;  %v1488_v61 = vpop.permute.xlu1 %1487 }
 0x27b   :  { %v1452_v57 = vrot.slane %v3943_v47, 2  ;;  %v1453_v17 = vrot.slane %v3943_v47, 4  ;;  %v1489_v7 = vrot.slane %v1488_v61, 2  ;;  %v1490_v13 = vrot.slane %v1488_v61, 4 }
 0x27d   :  { %v1454_v1 = vsel %vm134_vm5, %v1452_v57, %v1453_v17  ;;  %v1292_v57 = vstv %s2994_s8  ;;  %s3049_s8 = sld [smem:[#allocation3 + $0xa1]] }
 0x27e   :  { %v1527_v53 = vpop.permute.xlu0 %1526  ;;  %v1561_v8 = vpop.permute.xlu1 %1560  ;;  %v3999_v47 = vmul.f32 %v1454_v1, %v3231_v21  ;;  %v1293_v34 = vmul.f32 %v1292_v57, %v3981_v37  ;;  %v1781_v1 = vstv %s4028_s11  ;;  %s2969_s11 = sld [smem:[#allocation3 + $0x51]] }
 0x27f   :  { %v1528_v0 = vrot.slane %v1527_v53, 2  ;;  %v1529_v46 = vrot.slane %v1527_v53, 4  ;;  %v1347_v53 = vmul.f32 %v1346_v43, %v3847_v32  ;;  %v1562_v39 = vrot.slane %v1561_v8, 2 }
 0x281   :  { %v3946_v24 = vsel %vm219_vm4, %v1528_v0, %v1529_v46  ;;  %v1685_v0 = vmul.f32 %v1684_v38, %v3924_v28  ;;  %v1377_v46 = vstv %s3985_s23  ;;  %s3016_s23 = sld [smem:[#allocation3 + $0x96]] }
 0x282   :  { %v1532_v56 = vmul.f32 %v3946_v24, %v1525_v49  ;;  %v1542_v62 = vmul.f32 %v1541_v42, %v3946_v24  ;;  %v1491_v49 = vsel %vm171_vm6, %v1489_v7, %v1490_v13  ;;  %v1458_v42 = vstv %s3011_s24  ;;  %s3048_s24 = sld [smem:[#allocation3 + $0x86]] }
 0x283   :  { %v1378_v18 = vmul.f32 %v1377_v46, %v3888_v40  ;;  %v1459_v26 = vmul.f32 %v1458_v42, %v3999_v47  ;;  %v1182_v40 = vstv %s2985_s30  ;;  %v1302_v46 = vstv %s4040_s13  ;;  %s3028_s30 = sld [smem:[#allocation3 + $0x9a]]  ;;  %s2970_s13 = sld [smem:[#allocation3 + $0x6c]] }
 0x284   :  { %1534 = vrot.lane.b32.xlu1 %v1532_v56, %s3182_s28  ;;  %v1563_v56 = vrot.slane %v1561_v8, 4  ;;  %v1183_v51 = vmul.f32 %v1182_v40, %v3978_v60  ;;  %v1303_v42 = vmul.f32 %v1302_v46, %v3981_v37 }
 0x286   :  { %v1564_v31 = vsel %vm111_vm7, %v1562_v39, %v1563_v56 }
 0x288   :  { %1544 = vrot.lane.b32.xlu1 %v1542_v62, %s3182_s28  ;;  %v4008_v62 = vmul.f32 %v1491_v49, %v3240_v23 }
 0x28a   :  { %v3956_v33 = vpop.permute.xlu0 %1736  ;;  %v1496_v63 = vmul.f32 %v1495_v58, %v4008_v62  ;;  %v1774_v12 = vpop.permute.xlu1 %1773  ;;  %v1578_v58 = vstv %s3021_s17  ;;  %s4191_s17 = sld [smem:[#allocation5 + $0x4]] }
 0x28b   :  { %v1775_v2 = vrot.slane %v1774_v12, 2  ;;  %v1738_v61 = vrot.slane %v3956_v33, 2 }
 0x28c   :  { %1625 = vrot.lane.b32.xlu1 %v1623_v22, %s3180_s26  ;;  %v4016_v22 = vmul.f32 %v1564_v31, %v3231_v21 }
 0x28e   :  { %v1813_v55 = vpop.permute.xlu0 %1812  ;;  %v1847_v45 = vpop.permute.xlu1 %1846  ;;  %v1579_v37 = vmul.f32 %v1578_v58, %v4016_v22  ;;  %v1874_v58 = vstv %s3049_s8  ;;  %s3112_s8 = sld [smem:[#allocation3 + $0xeb]] }
 0x28f   :  { %v1814_v20 = vrot.slane %v1813_v55, 2  ;;  %v1815_v3 = vrot.slane %v1813_v55, 4  ;;  %v1569_v55 = vmul.f32 %v1568_v44, %v4016_v22  ;;  %v1849_v43 = vrot.slane %v1847_v45, 4 }
 0x290   :  { %1656 = vrot.lane.b32.xlu1 %v1654_v19, %s3183_s16  ;;  %v1776_v19 = vrot.slane %v1774_v12, 4  ;;  %v1441_v12 = vstv %s3010_s19  ;;  %s4202_s19 = sld [smem:[#allocation3 + $0x75]] }
 0x291   :  { %v3975_v6 = vsel %vm219_vm4, %v1814_v20, %v1815_v3  ;;  %v1469_v20 = vmul.f32 %v1468_v29, %v3999_v47  ;;  %v1229_v3 = vstv %s4020_s7  ;;  %v1551_v29 = vstv %s3019_s1  ;;  %s3040_s7 = sld [smem:[#allocation3 + $0x9e]]  ;;  %s4209_s1 = sld [smem:[#allocation3 + $0x90]] }
 0x292   :  { %v1818_v50 = vmul.f32 %v3975_v6, %v1811_v5  ;;  %v1219_v5 = vstv %s2988_s5  ;;  %v1230_v10 = vmul.f32 %v1229_v3, %v3964_v9  ;;  %v4052_v7 = vpop.permute.xlu0 %1043  ;;  %v4054_v13 = vpop.permute.xlu1 %1329  ;;  %v1478_v3 = vstv %s3013_s21  ;;  %s3034_s5 = sld [smem:[#allocation3 + $0x9c]]  ;;  %s4350_s21 = sld [smem:[#allocation3 + $0x99]] }
 0x293   :  { %v1220_v14 = vmul.f32 %v1219_v5, %v3964_v9 }
 0x294   :  { %1820 = vrot.lane.b32.xlu0 %v1818_v50, %s3182_s28  ;;  %1212 = vrot.lane.b32.xlu1 %v1210_v52, %s3182_s28  ;;  %v1739_v50 = vrot.slane %v3956_v33, 4  ;;  %v1777_v52 = vsel %vm171_vm6, %v1775_v2, %v1776_v19  ;;  %v1192_v33 = vstv %s4026_s10  ;;  %v1442_v19 = vmul.f32 %v1441_v12, %v3903_v48  ;;  %s3046_s10 = sld [smem:[#allocation3 + $0xa0]] }
 0x295   :  { %v4045_v17 = vmul.f32 %v1777_v52, %v3240_v23  ;;  %v1193_v38 = vmul.f32 %v1192_v33, %v3978_v60  ;;  %v1479_v52 = vmul.f32 %v1478_v3, %v3999_v47  ;;  %v1663_v47 = vstv %s3031_s29  ;;  %s3111_s29 = sld [smem:[#allocation3 + $0xd0]] }
 0x296   :  { %v4071_v39 = vpop.permute.xlu0 %1053  ;;  %v4073_v56 = vpop.permute.xlu1 %1339 }
 0x297   :  { %v1782_v8 = vmul.f32 %v1781_v1, %v4045_v17 }
 0x298   :  { %1175 = vrot.lane.b32.xlu0 %v1173_v11, %s3182_s28  ;;  %1285 = vrot.lane.b32.xlu1 %v1283_v35, %s3182_s28  ;;  %v1740_v11 = vsel %vm134_vm5, %v1738_v61, %v1739_v50  ;;  %v1848_v35 = vrot.slane %v1847_v45, 2  ;;  %v1754_v45 = vstv %s3039_s2  ;;  %v1791_v61 = vstv %s3042_s22  ;;  %s4302_s2 = sld [smem:[#allocation3 + $0x7e]] }
 0x299   :  { %v4059_v9 = vmul.f32 %v1740_v11, %v3231_v21  ;;  %v1792_v57 = vmul.f32 %v1791_v61, %v4045_v17  ;;  %v1045_v61 = vrot.slane %v4052_v7, 2  ;;  %s3057_s22 = sld [smem:[#allocation3 + $0xbe]] }
 0x29a   :  { %v4083_v40 = vpop.permute.xlu1 %1074 }
 0x29c   :  { %1349 = vrot.lane.b32.xlu0 %v1347_v53, %s3180_s26  ;;  %1687 = vrot.lane.b32.xlu1 %v1685_v0, %s3179_s0  ;;  %v1850_v53 = vsel %vm111_vm7, %v1848_v35, %v1849_v43  ;;  %v1744_v0 = vstv %s4038_s12  ;;  %v1588_v43 = vstv %s3022_s25  ;;  %s2966_s12 = sld [smem:[#allocation5 + $0x3]]  ;;  %s3084_s25 = sld [smem:[#allocation3 + $0xc7]] }
 0x29d   :  { %v4069_v49 = vmul.f32 %v1850_v53, %v3231_v21  ;;  %v1745_v60 = vmul.f32 %v1744_v0, %v4059_v9  ;;  %v1589_v1 = vmul.f32 %v1588_v43, %v4016_v22  ;;  %v1727_v53 = vstv %s3037_s4  ;;  %s3085_s4 = sld [smem:[#allocation3 + $0xe2]] }
 0x29e   :  { %v4093_v2 = vpop.permute.xlu1 %1138  ;;  %v1801_v22 = vstv %s3043_s6  ;;  %s3110_s6 = sld [smem:[#allocation3 + $0xb5]] }
 0x2a0   :  { %1380 = vrot.lane.b32.xlu0 %v1378_v18, %s3183_s16  ;;  %1461 = vrot.lane.b32.xlu1 %v1459_v26, %s3182_s28  ;;  %v1505_v18 = vstv %s3015_s14  ;;  %v1854_v26 = vstv %s3047_s15  ;;  %s4187_s14 = sld [smem:[#allocation3 + $0x5a]]  ;;  %s4189_s15 = sld [smem:[#allocation3 + $0x87]] }
 0x2a1   :  { %v1506_v31 = vmul.f32 %v1505_v18, %v4008_v62  ;;  %v1855_v54 = vmul.f32 %v1854_v26, %v4069_v49 }
 0x2a2   :  { %v4103_v48 = vpop.permute.xlu1 %1360 }
 0x2a4   :  { %1411 = vrot.lane.b32.xlu0 %v1409_v25, %s3179_s0  ;;  %1498 = vrot.lane.b32.xlu1 %v1496_v63, %s3182_s28  ;;  %v1717_v25 = vstv %s3036_s18  ;;  %v4081_v63 = vpop.permute.xlu0 %1063  ;;  %s4196_s18 = sld [smem:[#allocation5 + $0x5]] }
 0x2a5   :  { %v1718_v44 = vmul.f32 %v1717_v25, %v3931_v41  ;;  %v1875_v25 = vmul.f32 %v1874_v58, %v4069_v49 }
 0x2a6   :  { %v4113_v33 = vpop.permute.xlu1 %1391 }
 0x2a8   :  { %1185 = vrot.lane.b32.xlu0 %v1183_v51, %s3182_s28  ;;  %1571 = vrot.lane.b32.xlu1 %v1569_v55, %s3182_s28  ;;  %v1827_v51 = vstv %s3045_s20  ;;  %v4091_v55 = vpop.permute.xlu0 %1615  ;;  %s4207_s20 = sld [smem:[#allocation3 + $0x63]] }
 0x2a9   :  { %v1828_v5 = vmul.f32 %v1827_v51, %v3975_v6 }
 0x2ac   :  { %1222 = vrot.lane.b32.xlu0 %v1220_v14, %s3182_s28  ;;  %1471 = vrot.lane.b32.xlu1 %v1469_v20, %s3182_s28  ;;  %v1552_v14 = vmul.f32 %v1551_v29, %v3946_v24  ;;  %v1755_v20 = vmul.f32 %v1754_v45, %v4059_v9  ;;  %v4101_v50 = vpop.permute.xlu0 %1105  ;;  %v1864_v24 = vstv %s3048_s24  ;;  %s3058_s24 = sld [smem:[#allocation3 + $0xd9]] }
 0x2ad   :  { %v1865_v35 = vmul.f32 %v1864_v24, %v4069_v49  ;;  %v1076_v24 = vrot.slane %v4083_v40, 2 }
 0x2b0   :  { %1295 = vrot.lane.b32.xlu0 %v1293_v34, %s3182_s28  ;;  %1232 = vrot.lane.b32.xlu1 %v1230_v10, %s3182_s28  ;;  %v1515_v34 = vstv %s3016_s23  ;;  %v4111_v10 = vpop.permute.xlu0 %1084  ;;  %s3056_s23 = sld [smem:[#allocation3 + $0xa3]] }
 0x2b1   :  { %v1516_v11 = vmul.f32 %v1515_v34, %v4008_v62  ;;  %v4123_v62 = vpop.permute.xlu1 %1424  ;;  %v1020_v34 = vstv %s2966_s12  ;;  %s3067_s12 = sld [smem:[#allocation3 + $0xdc]] }
 0x2b4   :  { %1195 = vrot.lane.b32.xlu0 %v1193_v38, %s3182_s28  ;;  %1784 = vrot.lane.b32.xlu1 %v1782_v8, %s3182_s28  ;;  %v1664_v38 = vmul.f32 %v1663_v47, %v3913_v15  ;;  %v1632_v8 = vstv %s3028_s30  ;;  %v4121_v0 = vpop.permute.xlu0 %1115  ;;  %s3083_s30 = sld [smem:[#allocation3 + $0xac]] }
 0x2b5   :  { %v1633_v46 = vmul.f32 %v1632_v8, %v3858_v27  ;;  %v4133_v18 = vpop.permute.xlu1 %1094 }
 0x2b8   :  { %1747 = vrot.lane.b32.xlu0 %v1745_v60, %s3182_s28  ;;  %1305 = vrot.lane.b32.xlu1 %v1303_v42, %s3182_s28  ;;  %v1728_v60 = vmul.f32 %v1727_v53, %v3931_v41  ;;  %v1694_v42 = vstv %s3034_s5  ;;  %v4131_v15 = vpop.permute.xlu0 %1148  ;;  %s3062_s5 = sld [smem:[#allocation3 + $0xa5]] }
 0x2b9   :  { %v1695_v26 = vmul.f32 %v1694_v42, %v3924_v28  ;;  %v4143_v12 = vpop.permute.xlu1 %1646 }
 0x2bc   :  { %1508 = vrot.lane.b32.xlu0 %v1506_v31, %s3182_s28  ;;  %1857 = vrot.lane.b32.xlu1 %v1855_v54, %s3182_s28  ;;  %v1802_v31 = vmul.f32 %v1801_v22, %v4045_v17  ;;  %v1764_v54 = vstv %s3040_s7  ;;  %s3061_s7 = sld [smem:[#allocation3 + $0xda]] }
 0x2bd   :  { %v1765_v41 = vmul.f32 %v1764_v54, %v4059_v9  ;;  %v4151_v51 = vpop.permute.xlu1 %1401 }
 0x2c0   :  { %1581 = vrot.lane.b32.xlu0 %v1579_v37, %s3182_s28  ;;  %1720 = vrot.lane.b32.xlu1 %v1718_v44, %s3182_s28  ;;  %v1837_v37 = vstv %s3046_s10  ;;  %v4141_v44 = vpop.permute.xlu0 %1370  ;;  %s3066_s10 = sld [smem:[#allocation3 + $0xc1]] }
 0x2c1   :  { %v1838_v28 = vmul.f32 %v1837_v37, %v3975_v6  ;;  %v4155_v49 = vpop.permute.xlu1 %1158  ;;  %v1026_v6 = vmul.f32 %v3836_v30, %v3585_v59 }
 0x2c4   :  { %1444 = vrot.lane.b32.xlu0 %v1442_v19, %s3182_s28  ;;  %1830 = vrot.lane.b32.xlu1 %v1828_v5, %s3182_s28  ;;  %v4149_v17 = vpop.permute.xlu0 %1125 }
 0x2c5   :  { %v4159_v5 = vpop.permute.xlu1 %1710 }
 0x2c8   :  { %1554 = vrot.lane.b32.xlu0 %v1552_v14, %s3182_s28  ;;  %1757 = vrot.lane.b32.xlu1 %v1755_v20, %s3182_s28  ;;  %v4153_v9 = vpop.permute.xlu0 %1677  ;;  %v1028_v20 = vstv %s2969_s11  ;;  %s3059_s11 = sld [smem:[#allocation3 + $0xa4]] }
 0x2cc   :  { %1481 = vrot.lane.b32.xlu0 %v1479_v52, %s3182_s28  ;;  %1794 = vrot.lane.b32.xlu1 %v1792_v57, %s3182_s28  ;;  %v4157_v19 = vpop.permute.xlu0 %1434  ;;  %v1029_v52 = vmul.f32 %v1028_v20, %v1026_v6  ;;  %v1032_v20 = vstv %s2970_s13  ;;  %s3063_s13 = sld [smem:[#allocation3 + $0xc0]] }
 0x2ce   :  { %v1030_v43 = vadd.f32 %v1029_v52, %v1020_v34  ;;  %v1312_v34 = vmul.f32 %v3847_v32, %v3585_v59  ;;  %v1022_v32 = vstv %s4191_s17  ;;  %s3089_s17 = sld [smem:[#allocation3 + $0xae]] }
 0x2d0   :  { %1518 = vrot.lane.b32.xlu0 %v1516_v11, %s3182_s28  ;;  %1867 = vrot.lane.b32.xlu1 %v1865_v35, %s3182_s28  ;;  %v1046_v11 = vsel %vm134_vm5, %v4052_v7, %v1045_v61  ;;  %v1107_v35 = vrot.slane %v4101_v50, 2  ;;  %v1140_v7 = vrot.slane %v4093_v2, 6 }
 0x2d2   :  { %v1108_v8 = vsel %vm219_vm4, %v4101_v50, %v1107_v35  ;;  %v1314_v35 = vstv %s4187_s14  ;;  %s3087_s14 = sld [smem:[#allocation3 + $0xc8]] }
 0x2d4   :  { %1591 = vrot.lane.b32.xlu0 %v1589_v1, %s3182_s28  ;;  %1666 = vrot.lane.b32.xlu1 %v1664_v38, %s3183_s16  ;;  %v1077_v1 = vsel %vm182_vm8, %v4083_v40, %v1076_v24  ;;  %v1048_v38 = vadd.f32 %v1046_v11, %v1030_v43  ;;  %v1141_v40 = vsel %vm111_vm7, %v1140_v7, %v4093_v2  ;;  %v1055_v24 = vrot.slane %v4071_v39, 2 }
 0x2d5   :  { %v1033_v43 = vmul.f32 %v1032_v20, %v1026_v6  ;;  %v1086_v7 = vrot.slane %v4111_v10, 2 }
 0x2d6   :  { %v1079_v53 = vadd.f32 %v1077_v1, %v1048_v38  ;;  %v1036_v1 = vstv %s4189_s15  ;;  %s3065_s15 = sld [smem:[#allocation3 + $0xa6]] }
 0x2d8   :  { %1635 = vrot.lane.b32.xlu0 %v1633_v46, %s3180_s26  ;;  %1730 = vrot.lane.b32.xlu1 %v1728_v60, %s3182_s28  ;;  %v1110_v42 = vadd.f32 %v1108_v8, %v1079_v53 }
 0x2da   :  { %v1143_v54 = vadd.f32 %v1141_v40, %v1110_v42 }
 0x2dc   :  { %1697 = vrot.lane.b32.xlu0 %v1695_v26, %s3179_s0  ;;  %1804 = vrot.lane.b32.xlu1 %v1802_v31, %s3182_s28 }
 0x2e0   :  { %1767 = vrot.lane.b32.xlu0 %v1765_v41, %s3182_s28  ;;  %1877 = vrot.lane.b32.xlu1 %v1875_v25, %s3182_s28 }
 0x2e2   :  { %v1249_v29 = vpop.permute.xlu0 %1248 }
 0x2e3   :  { %v1250_v58 = vrot.slane %v1249_v29, 6 }
 0x2e4   :  { %1840 = vrot.lane.b32.xlu0 %v1838_v28, %s3182_s28 }
 0x2e5   :  { %v1251_v11 = vsel %vm111_vm7, %v1250_v58, %v1249_v29  ;;  %v1056_v29 = vsel %vm134_vm5, %v4071_v39, %v1055_v24  ;;  %v1034_v58 = vadd.f32 %v1033_v43, %v1022_v32  ;;  %v1087_v39 = vsel %vm182_vm8, %v4111_v10, %v1086_v7 }
 0x2e6   :  { %v4167_v3 = vpop.permute.xlu0 %1258  ;;  %v1322_v43 = vstv %s4209_s1  ;;  %s3090_s1 = sld [smem:[#allocation3 + $0xc9]] }
 0x2e7   :  { %v1058_v24 = vadd.f32 %v1056_v29, %v1034_v58 }
 0x2e9   :  { %v1089_v10 = vadd.f32 %v1087_v39, %v1058_v24 }
 0x2ea   :  { %v4176_v30 = vpop.permute.xlu0 %1268 }
 0x2f6   :  { %v4161_v45 = vpop.permute.xlu1 %1534 }
 0x2fa   :  { %v4165_v14 = vpop.permute.xlu1 %1544 }
 0x2fe   :  { %v4170_v57 = vpop.permute.xlu1 %1625 }
 0x302   :  { %v4178_v47 = vpop.permute.xlu1 %1656 }
 0x306   :  { %v4184_v46 = vpop.permute.xlu0 %1820  ;;  %v1213_v60 = vpop.permute.xlu1 %1212 }
 0x307   :  { %v1214_v50 = vrot.slane %v1213_v60, 6 }
 0x309   :  { %v1215_v2 = vsel %vm111_vm7, %v1214_v50, %v1213_v60  ;;  %v1331_v60 = vrot.slane %v4054_v13, 2  ;;  %v1037_v50 = vmul.f32 %v1036_v1, %v1026_v6  ;;  %v1393_v6 = vrot.slane %v4113_v33, 2 }
 0x30a   :  { %v1176_v22 = vpop.permute.xlu0 %1175  ;;  %v1286_v26 = vpop.permute.xlu1 %1285 }
 0x30b   :  { %v1177_v31 = vrot.slane %v1176_v22, 6  ;;  %v1287_v61 = vrot.slane %v1286_v26, 6  ;;  %v1394_v29 = vsel %vm219_vm4, %v4113_v33, %v1393_v6  ;;  %v4255_v33 = vmul.f32 %v3858_v27, %v3585_v59 }
 0x30c   :  { %v1127_v6 = vrot.slane %v4149_v17, 2  ;;  %v1341_v27 = vrot.slane %v4073_v56, 2 }
 0x30d   :  { %v1178_v41 = vsel %vm111_vm7, %v1177_v31, %v1176_v22  ;;  %v1288_v42 = vsel %vm111_vm7, %v1287_v61, %v1286_v26  ;;  %v1315_v22 = vmul.f32 %v1314_v35, %v1312_v34  ;;  %v1362_v31 = vrot.slane %v4103_v48, 2 }
 0x30e   :  { %v1180_v25 = vadd.f32 %v1178_v41, %v1143_v54  ;;  %v4198_v37 = vpop.permute.xlu0 %1349  ;;  %v4200_v28 = vpop.permute.xlu1 %1687  ;;  %v1117_v54 = vrot.slane %v4121_v0, 2  ;;  %v1024_v41 = vstv %s4196_s18  ;;  %v1332_v26 = vsel %vm134_vm5, %v4054_v13, %v1331_v60  ;;  %s3064_s18 = sld [smem:[#allocation3 + $0xdb]] }
 0x30f   :  { %v1150_v61 = vrot.slane %v4131_v15, 6  ;;  %v1600_v35 = vstv %s4207_s20  ;;  %v1038_v1 = vadd.f32 %v1037_v50, %v1024_v41  ;;  %v1426_v13 = vrot.slane %v4123_v62, 6  ;;  %s3086_s20 = sld [smem:[#allocation3 + $0xad]] }
 0x310   :  { %v1217_v52 = vadd.f32 %v1215_v2, %v1180_v25  ;;  %v1118_v32 = vsel %vm219_vm4, %v4121_v0, %v1117_v54  ;;  %v1065_v60 = vrot.slane %v4081_v63, 2  ;;  %v1096_v0 = vrot.slane %v4133_v18, 2 }
 0x311   :  { %v1151_v50 = vsel %vm111_vm7, %v1150_v61, %v4131_v15  ;;  %v4248_v41 = vmul.f32 %v1322_v43, %v1312_v34 }
 0x312   :  { %v1253_v38 = vadd.f32 %v1251_v11, %v1217_v52  ;;  %v4215_v8 = vpop.permute.xlu0 %1380  ;;  %v1462_v53 = vpop.permute.xlu1 %1461  ;;  %v1318_v52 = vstv %s4202_s19  ;;  %v1066_v15 = vsel %vm134_vm5, %v4081_v63, %v1065_v60  ;;  %v1160_v60 = vrot.slane %v4155_v49, 6  ;;  %s3088_s19 = sld [smem:[#allocation3 + $0xe3]] }
 0x313   :  { %v1463_v58 = vrot.slane %v1462_v53, 6 }
 0x314   :  { %v1290_v40 = vadd.f32 %v1288_v42, %v1253_v38  ;;  %v1363_v38 = vsel %vm182_vm8, %v4103_v48, %v1362_v31  ;;  %v1120_v31 = vadd.f32 %v1118_v32, %v1089_v10  ;;  %v1097_v32 = vsel %vm182_vm8, %v4133_v18, %v1096_v0 }
 0x315   :  { %v1464_v43 = vsel %vm111_vm7, %v1463_v58, %v1462_v53 }
 0x316   :  { %v1316_v25 = vadd.f32 %v1315_v22, %v1290_v40  ;;  %v4226_v20 = vpop.permute.xlu0 %1411  ;;  %v1499_v2 = vpop.permute.xlu1 %1498  ;;  %v1319_v40 = vmul.f32 %v1318_v52, %v1312_v34  ;;  %v1153_v39 = vadd.f32 %v1151_v50, %v1120_v31  ;;  %v1617_v50 = vrot.slane %v4091_v55, 2 }
 0x318   :  { %v1334_v11 = vadd.f32 %v1332_v26, %v1316_v25  ;;  %v1427_v25 = vsel %vm111_vm7, %v1426_v13, %v4123_v62  ;;  %v1500_v26 = vrot.slane %v1499_v2, 6  ;;  %v1536_v62 = vrot.slane %v4161_v45, 6 }
 0x31a   :  { %v1365_v7 = vadd.f32 %v1363_v38, %v1334_v11  ;;  %v1186_v42 = vpop.permute.xlu0 %1185  ;;  %v1572_v22 = vpop.permute.xlu1 %1571  ;;  %v1260_v11 = vrot.slane %v4167_v3, 6  ;;  %v1501_v10 = vsel %vm111_vm7, %v1500_v26, %v1499_v2  ;;  %v1537_v0 = vsel %vm111_vm7, %v1536_v62, %v4161_v45 }
 0x31b   :  { %v1187_v48 = vrot.slane %v1186_v42, 6 }
 0x31c   :  { %v1396_v54 = vadd.f32 %v1394_v29, %v1365_v7  ;;  %v1573_v7 = vrot.slane %v1572_v22, 6  ;;  %v1068_v29 = vadd.f32 %v1066_v15, %v1038_v1  ;;  %v1261_v18 = vsel %vm111_vm7, %v1260_v11, %v4167_v3 }
 0x31d   :  { %v1188_v52 = vsel %vm111_vm7, %v1187_v48, %v1186_v42  ;;  %v1601_v1 = vmul.f32 %v1600_v35, %v4255_v33  ;;  %v1372_v15 = vrot.slane %v4141_v44, 2  ;;  %v1342_v3 = vsel %vm134_vm5, %v4073_v56, %v1341_v27 }
 0x31e   :  { %v1429_v61 = vadd.f32 %v1427_v25, %v1396_v54  ;;  %v1223_v24 = vpop.permute.xlu0 %1222  ;;  %v4260_v34 = vpop.permute.xlu1 %1471  ;;  %v1190_v13 = vadd.f32 %v1188_v52, %v1153_v39  ;;  %v1128_v54 = vsel %vm219_vm4, %v4149_v17, %v1127_v6  ;;  %v1099_v25 = vadd.f32 %v1097_v32, %v1068_v29 }
 0x31f   :  { %v1224_v38 = vrot.slane %v1223_v24, 6  ;;  %v1161_v39 = vsel %vm111_vm7, %v1160_v60, %v4155_v49  ;;  %v1618_v35 = vsel %vm134_vm5, %v4091_v55, %v1617_v50  ;;  %v1403_v49 = vrot.slane %v4151_v51, 2 }
 0x320   :  { %v1466_v63 = vadd.f32 %v1464_v43, %v1429_v61  ;;  %v1574_v61 = vsel %vm111_vm7, %v1573_v7, %v1572_v22  ;;  %v1130_v6 = vadd.f32 %v1128_v54, %v1099_v25  ;;  %v1648_v43 = vrot.slane %v4143_v12, 2 }
 0x321   :  { %v1225_v42 = vsel %vm111_vm7, %v1224_v38, %v1223_v24  ;;  %v1373_v56 = vsel %vm182_vm8, %v4141_v44, %v1372_v15  ;;  %v1679_v27 = vrot.slane %v4153_v9, 2  ;;  %v1270_v60 = vrot.slane %v4176_v30, 6 }
 0x322   :  { %v1503_v48 = vadd.f32 %v1501_v10, %v1466_v63  ;;  %v1227_v53 = vadd.f32 %v1225_v42, %v1190_v13  ;;  %v1296_v58 = vpop.permute.xlu0 %1295  ;;  %v1233_v31 = vpop.permute.xlu1 %1232  ;;  %v1163_v22 = vadd.f32 %v1161_v39, %v1130_v6  ;;  %v1436_v55 = vrot.slane %v4157_v19, 6 }
 0x323   :  { %v1297_v2 = vrot.slane %v1296_v58, 6  ;;  %v1234_v38 = vrot.slane %v1233_v31, 6  ;;  %v1404_v54 = vsel %vm219_vm4, %v4151_v51, %v1403_v49  ;;  %v1680_v25 = vsel %vm219_vm4, %v4153_v9, %v1679_v27 }
 0x324   :  { %v1539_v26 = vadd.f32 %v1537_v0, %v1503_v48  ;;  %v1263_v52 = vadd.f32 %v1261_v18, %v1227_v53  ;;  %v1649_v53 = vsel %vm182_vm8, %v4143_v12, %v1648_v43  ;;  %v1473_v12 = vrot.slane %v4260_v34, 6 }
 0x325   :  { %v1298_v17 = vsel %vm111_vm7, %v1297_v2, %v1296_v58  ;;  %v1235_v44 = vsel %vm111_vm7, %v1234_v38, %v1233_v31  ;;  %v1437_v31 = vsel %vm111_vm7, %v1436_v55, %v4157_v19  ;;  %v1822_v19 = vrot.slane %v4184_v46, 6 }
 0x326   :  { %v1576_v45 = vadd.f32 %v1574_v61, %v1539_v26  ;;  %v1300_v24 = vadd.f32 %v1298_v17, %v1263_v52  ;;  %v1196_v11 = vpop.permute.xlu0 %1195  ;;  %v1785_v62 = vpop.permute.xlu1 %1784  ;;  %v1271_v26 = vsel %vm111_vm7, %v1270_v60, %v4176_v30  ;;  %v1546_v30 = vrot.slane %v4165_v14, 6 }
 0x327   :  { %v1197_v32 = vrot.slane %v1196_v11, 6  ;;  %v1474_v43 = vsel %vm111_vm7, %v1473_v12, %v4260_v34 }
 0x328   :  { %v1602_v63 = vadd.f32 %v1601_v1, %v1576_v45  ;;  %v1320_v13 = vadd.f32 %v1319_v40, %v1300_v24  ;;  %v1712_v40 = vrot.slane %v4159_v5, 6  ;;  %v1547_v34 = vsel %vm111_vm7, %v1546_v30, %v4165_v14 }
 0x329   :  { %v1198_v10 = vsel %vm111_vm7, %v1197_v32, %v1196_v11 }
 0x32a   :  { %v1620_v7 = vadd.f32 %v1618_v35, %v1602_v63  ;;  %v1344_v42 = vadd.f32 %v1342_v3, %v1320_v13  ;;  %v1200_v29 = vadd.f32 %v1198_v10, %v1163_v22  ;;  %v1748_v50 = vpop.permute.xlu0 %1747  ;;  %v1306_v48 = vpop.permute.xlu1 %1305  ;;  %v1713_v17 = vsel %vm111_vm7, %v1712_v40, %v4159_v5 }
 0x32b   :  { %v1307_v58 = vrot.slane %v1306_v48, 6  ;;  %v1749_v1 = vrot.slane %v1748_v50, 6  ;;  %v1786_v3 = vrot.slane %v1785_v62, 6  ;;  %v1351_v35 = vrot.slane %v4198_v37, 2 }
 0x32c   :  { %v1375_v18 = vadd.f32 %v1373_v56, %v1344_v42  ;;  %v1237_v0 = vadd.f32 %v1235_v44, %v1200_v29  ;;  %v1651_v2 = vadd.f32 %v1649_v53, %v1620_v7  ;;  %v1604_v7 = vstv %s4302_s2  ;;  %s3094_s2 = sld [smem:[#allocation3 + $0xe5]] }
 0x32d   :  { %v1308_v9 = vsel %vm111_vm7, %v1307_v58, %v1306_v48  ;;  %v1750_v38 = vsel %vm111_vm7, %v1749_v1, %v1748_v50  ;;  %v1787_v13 = vsel %vm111_vm7, %v1786_v3, %v1785_v62  ;;  %v1823_v42 = vsel %vm111_vm7, %v1822_v19, %v4184_v46 }
 0x32e   :  { %v1682_v52 = vadd.f32 %v1680_v25, %v1651_v2  ;;  %v1273_v15 = vadd.f32 %v1271_v26, %v1237_v0  ;;  %v1509_v51 = vpop.permute.xlu0 %1508  ;;  %v1406_v39 = vadd.f32 %v1404_v54, %v1375_v18  ;;  %v1858_v61 = vpop.permute.xlu1 %1857  ;;  %v1382_v29 = vrot.slane %v4215_v8, 2 }
 0x32f   :  { %v1510_v6 = vrot.slane %v1509_v51, 6  ;;  %v1859_v27 = vrot.slane %v1858_v61, 6  ;;  %v1627_v44 = vrot.slane %v4170_v57, 2  ;;  %v1605_v18 = vmul.f32 %v1604_v7, %v4255_v33 }
 0x330   :  { %v1715_v45 = vadd.f32 %v1713_v17, %v1682_v52  ;;  %v1310_v24 = vadd.f32 %v1308_v9, %v1273_v15  ;;  %v1439_v11 = vadd.f32 %v1437_v31, %v1406_v39  ;;  %v1658_v0 = vrot.slane %v4178_v47, 2 }
 0x331   :  { %v1511_v56 = vsel %vm111_vm7, %v1510_v6, %v1509_v51  ;;  %v1860_v58 = vsel %vm111_vm7, %v1859_v27, %v1858_v61  ;;  %v1413_v2 = vrot.slane %v4226_v20, 2  ;;  %v1628_v31 = vsel %vm134_vm5, %v4170_v57, %v1627_v44 }
 0x332   :  { %v1752_v5 = vadd.f32 %v1750_v38, %v1715_v45  ;;  %v1324_v32 = vadd.f32 %v4248_v41, %v1310_v24  ;;  %v1476_v49 = vadd.f32 %v1474_v43, %v1439_v11  ;;  %v1582_v22 = vpop.permute.xlu0 %1581  ;;  %v1721_v63 = vpop.permute.xlu1 %1720  ;;  %v1352_v41 = vsel %vm134_vm5, %v4198_v37, %v1351_v35 }
 0x333   :  { %v1583_v60 = vrot.slane %v1582_v22, 6  ;;  %v1383_v37 = vsel %vm182_vm8, %v4215_v8, %v1382_v29  ;;  %v1689_v52 = vrot.slane %v4200_v28, 2  ;;  %v1659_v39 = vsel %vm182_vm8, %v4178_v47, %v1658_v0 }
 0x334   :  { %v1789_v10 = vadd.f32 %v1787_v13, %v1752_v5  ;;  %v1513_v55 = vadd.f32 %v1511_v56, %v1476_v49  ;;  %v1354_v50 = vadd.f32 %v1352_v41, %v1324_v32  ;;  %v1414_v8 = vsel %vm219_vm4, %v4226_v20, %v1413_v2 }
 0x335   :  { %v1584_v54 = vsel %vm111_vm7, %v1583_v60, %v1582_v22  ;;  %v1722_v61 = vrot.slane %v1721_v63, 6  ;;  %v1690_v30 = vsel %vm219_vm4, %v4200_v28, %v1689_v52 }
 0x336   :  { %v1825_v62 = vadd.f32 %v1823_v42, %v1789_v10  ;;  %v1549_v48 = vadd.f32 %v1547_v34, %v1513_v55  ;;  %v1445_v53 = vpop.permute.xlu0 %1444  ;;  %v1831_v40 = vpop.permute.xlu1 %1830  ;;  %v1385_v26 = vadd.f32 %v1383_v37, %v1354_v50  ;;  %v1608_v50 = vstv %s4350_s21  ;;  %s3092_s21 = sld [smem:[#allocation3 + $0xaf]] }
 0x337   :  { %v1446_v15 = vrot.slane %v1445_v53, 6  ;;  %v1723_v47 = vsel %vm111_vm7, %v1722_v61, %v1721_v63  ;;  %v1832_v32 = vrot.slane %v1831_v40, 6 }
 0x338   :  { %v1862_v14 = vadd.f32 %v1860_v58, %v1825_v62  ;;  %v1586_v46 = vadd.f32 %v1584_v54, %v1549_v48  ;;  %v1416_v3 = vadd.f32 %v1414_v8, %v1385_v26 }
 0x339   :  { %v1447_v57 = vsel %vm111_vm7, %v1446_v15, %v1445_v53  ;;  %v1833_v42 = vsel %vm111_vm7, %v1832_v32, %v1831_v40 }
 0x33a   :  { %v1606_v25 = vadd.f32 %v1605_v18, %v1586_v46  ;;  %v1555_v12 = vpop.permute.xlu0 %1554  ;;  %1884 = vrot.lane.b32.xlu0 %v1862_v14, %s3184_s9  ;;  %v1758_v1 = vpop.permute.xlu1 %1757  ;;  %v1449_v43 = vadd.f32 %v1447_v57, %v1416_v3  ;;  %v1609_v14 = vmul.f32 %v1608_v50, %v4255_v33 }
 0x33b   :  { %v1759_v45 = vrot.slane %v1758_v1, 6  ;;  %v1556_v49 = vrot.slane %v1555_v12, 6 }
 0x33c   :  { %v1630_v51 = vadd.f32 %v1628_v31, %v1606_v25 }
 0x33d   :  { %v1760_v28 = vsel %vm111_vm7, %v1759_v45, %v1758_v1  ;;  %v1557_v41 = vsel %vm111_vm7, %v1556_v49, %v1555_v12 }
 0x33e   :  { %v1661_v17 = vadd.f32 %v1659_v39, %v1630_v51  ;;  %v1482_v9 = vpop.permute.xlu0 %1481  ;;  %v1795_v6 = vpop.permute.xlu1 %1794 }
 0x33f   :  { %v1483_v24 = vrot.slane %v1482_v9, 6  ;;  %v1796_v20 = vrot.slane %v1795_v6, 6 }
 0x340   :  { %v1692_v11 = vadd.f32 %v1690_v30, %v1661_v17 }
 0x341   :  { %v1484_v19 = vsel %vm111_vm7, %v1483_v24, %v1482_v9  ;;  %v1797_v27 = vsel %vm111_vm7, %v1796_v20, %v1795_v6 }
 0x342   :  { %v1725_v35 = vadd.f32 %v1723_v47, %v1692_v11  ;;  %v1519_v38 = vpop.permute.xlu0 %1518  ;;  %v1868_v5 = vpop.permute.xlu1 %1867  ;;  %v1486_v56 = vadd.f32 %v1484_v19, %v1449_v43 }
 0x343   :  { %v1520_v22 = vrot.slane %v1519_v38, 6  ;;  %v1869_v63 = vrot.slane %v1868_v5, 6 }
 0x344   :  { %v1762_v13 = vadd.f32 %v1760_v28, %v1725_v35 }
 0x345   :  { %v1521_v60 = vsel %vm111_vm7, %v1520_v22, %v1519_v38  ;;  %v1870_v53 = vsel %vm111_vm7, %v1869_v63, %v1868_v5 }
 0x346   :  { %v1799_v10 = vadd.f32 %v1797_v27, %v1762_v13  ;;  %v1523_v55 = vadd.f32 %v1521_v60, %v1486_v56  ;;  %v1592_v7 = vpop.permute.xlu0 %1591  ;;  %v1667_v34 = vpop.permute.xlu1 %1666 }
 0x347   :  { %v1593_v29 = vrot.slane %v1592_v7, 6  ;;  %v1668_v0 = vrot.slane %v1667_v34, 2 }
 0x348   :  { %v1835_v62 = vadd.f32 %v1833_v42, %v1799_v10  ;;  %v1559_v48 = vadd.f32 %v1557_v41, %v1523_v55  ;;  %v1935_v55 = vstv %s3057_s22  ;;  %v1945_v41 = vstv %s3058_s24  ;;  %s3114_s22 = sld [smem:[#allocation3 + $0xd1]]  ;;  %s3116_s24 = sld [smem:[#allocation3 + $0xb7]] }
 0x349   :  { %v1594_v44 = vsel %vm111_vm7, %v1593_v29, %v1592_v7  ;;  %v1669_v1 = vsel %vm182_vm8, %v1667_v34, %v1668_v0  ;;  %v1925_v7 = vstv %s3056_s23  ;;  %v2221_v29 = vstv %s3084_s25  ;;  %s3091_s23 = sld [smem:[#allocation3 + $0xe4]]  ;;  %s3113_s25 = sld [smem:[#allocation3 + $0xb6]] }
 0x34a   :  { %v1872_v58 = vadd.f32 %v1870_v53, %v1835_v62  ;;  %v1596_v54 = vadd.f32 %v1594_v44, %v1559_v48  ;;  %v1636_v18 = vpop.permute.xlu0 %1635  ;;  %v1731_v46 = vpop.permute.xlu1 %1730  ;;  %v2507_v48 = vstv %s3111_s29  ;;  %v2211_v53 = vstv %s3083_s30  ;;  %s3115_s29 = sld [smem:[#allocation3 + $0xec]]  ;;  %s3117_s30 = sld [smem:[#allocation3 + $0xd2]] }
 0x34b   :  { %v1637_v37 = vrot.slane %v1636_v18, 2  ;;  %v1732_v31 = vrot.slane %v1731_v46, 6 }
 0x34c   :  { %v1610_v2 = vadd.f32 %v1609_v14, %v1596_v54  ;;  %1891 = vrot.lane.b32.xlu1 %v1872_v58, %s3184_s9 }
 0x34d   :  { %v1638_v40 = vsel %vm134_vm5, %v1636_v18, %v1637_v37  ;;  %v1733_v8 = vsel %vm111_vm7, %v1732_v31, %v1731_v46  ;;  %v2231_v18 = vstv %s3085_s4  ;;  %s3119_s4 = sld [smem:[#allocation3 + $0xb8]] }
 0x34e   :  { %v1640_v25 = vadd.f32 %v1638_v40, %v1610_v2  ;;  %v1698_v26 = vpop.permute.xlu0 %1697  ;;  %v1805_v12 = vpop.permute.xlu1 %1804  ;;  %v1987_v2 = vstv %s3062_s5  ;;  %v2497_v40 = vstv %s3110_s6  ;;  %s3121_s5 = sld [smem:[#allocation3 + $0xee]]  ;;  %s3118_s6 = sld [smem:[#allocation3 + $0xed]] }
 0x34f   :  { %v1699_v52 = vrot.slane %v1698_v26, 2  ;;  %v1806_v61 = vrot.slane %v1805_v12, 6 }
 0x350   :  { %v1671_v15 = vadd.f32 %v1669_v1, %v1640_v25  ;;  %v2517_v1 = vstv %s3112_s8  ;;  %s3074_s8 = sld [smem:[#allocation3 + $0xa9]] }
 0x351   :  { %v1700_v51 = vsel %vm219_vm4, %v1698_v26, %v1699_v52  ;;  %v1807_v45 = vsel %vm111_vm7, %v1806_v61, %v1805_v12  ;;  %v1976_v12 = vstv %s3061_s7  ;;  %v2040_v61 = vstv %s3067_s12  ;;  %s3075_s7 = sld [smem:[#allocation3 + $0xc4]]  ;;  %s3069_s12 = sld [smem:[#allocation3 + $0xc2]] }
 0x352   :  { %v1702_v33 = vadd.f32 %v1700_v51, %v1671_v15  ;;  %v1768_v39 = vpop.permute.xlu0 %1767  ;;  %v1878_v9 = vpop.permute.xlu1 %1877  ;;  %v2030_v51 = vstv %s3066_s10  ;;  %s3101_s10 = sld [smem:[#allocation3 + $0xb2]] }
 0x353   :  { %v1769_v17 = vrot.slane %v1768_v39, 6  ;;  %v1879_v24 = vrot.slane %v1878_v9, 6 }
 0x354   :  { %v1735_v3 = vadd.f32 %v1733_v8, %v1702_v33  ;;  %v1956_v33 = vstv %s3059_s11  ;;  %s3103_s11 = sld [smem:[#allocation3 + $0xe8]] }
 0x355   :  { %v1770_v6 = vsel %vm111_vm7, %v1769_v17, %v1768_v39  ;;  %v1880_v35 = vsel %vm111_vm7, %v1879_v24, %v1878_v9  ;;  %v1997_v17 = vstv %s3063_s13  ;;  %s3071_s13 = sld [smem:[#allocation3 + $0xa8]] }
 0x356   :  { %v1772_v30 = vadd.f32 %v1770_v6, %v1735_v3  ;;  %v1841_v57 = vpop.permute.xlu0 %1840 }
 0x357   :  { %v1842_v11 = vrot.slane %v1841_v57, 6 }
 0x358   :  { %v1809_v47 = vadd.f32 %v1807_v45, %v1772_v30  ;;  %v2252_v30 = vstv %s3087_s14  ;;  %s4481_s14 = sld [smem:[#allocation3 + $0xbd]] }
 0x359   :  { %v1843_v19 = vsel %vm111_vm7, %v1842_v11, %v1841_v57  ;;  %v2017_v57 = vstv %s3065_s15  ;;  %s4484_s15 = sld [smem:[#allocation3 + $0xdd]] }
 0x35a   :  { %v1845_v20 = vadd.f32 %v1843_v19, %v1809_v47  ;;  %v2273_v47 = vstv %s3089_s17  ;;  %v2007_v19 = vstv %s3064_s18  ;;  %s4486_s17 = sld [smem:[#allocation3 + $0xa2]]  ;;  %s4491_s18 = sld [smem:[#allocation5 + $0x7]] }
 0x35c   :  { %v1882_v43 = vadd.f32 %v1880_v35, %v1845_v20 }
 0x35e   :  { %1898 = vrot.lane.b32.xlu0 %v1882_v43, %s3184_s9  ;;  %v2262_v43 = vstv %s3088_s19  ;;  %s4493_s19 = sld [smem:[#allocation3 + $0xd8]] }
 0x3ac   :  { %v1885_v38 = vpop.permute.xlu0 %1884 }
 0x3ad   :  { %v1886_v5 = vrot.slane %v1885_v38, 2 }
 0x3af   :  { %v1887_v32 = vsel %vm1001_vm9, %v1885_v38, %v1886_v5  ;;  %v2242_v38 = vstv %s3086_s20  ;;  %s4495_s20 = sld [smem:[#allocation3 + $0xbb]] }
 0x3b0   :  { %1889 = vst [vmem:[#allocation2 + $0x2] sm:$0xf] %v1887_v32 }
 0x3b7   :  { %v4374_v49 = vld [vmem:[#allocation2] sm:$0xff] }
 0x3b8   :  { %2049 = vrot.lane.b32.xlu1 %v4374_v49, %s3180_s26  ;;  %2086 = vrot.lane.b32.xlu0 %v4374_v49, %s3181_s27  ;;  %v1936_v34 = vmul.f32 %v1935_v55, %v4374_v49  ;;  %v1926_v42 = vmul.f32 %v1925_v7, %v4374_v49  ;;  %v1946_v50 = vmul.f32 %v1945_v41, %v4374_v49  ;;  %v2019_v15 = vrot.slane %v4374_v49, 2 }
 0x3b9   :  { %v1954_v54 = vmul.f32 %v4374_v49, %v3422_v36  ;;  %v1985_v37 = vmul.f32 %v4374_v49, %v3385_v4  ;;  %v2303_v55 = vstv %s3092_s21  ;;  %v2538_v41 = vstv %s3114_s22  ;;  %s4514_s21 = sld [smem:[#allocation3 + $0xa7]]  ;;  %s4518_s22 = sld [smem:[#allocation3 + $0xd6]] }
 0x3ba   :  { %v2031_v39 = vmul.f32 %v2030_v51, %v2019_v15  ;;  %v2041_v3 = vmul.f32 %v2040_v61, %v2019_v15  ;;  %v2021_v24 = vmul.f32 %v2019_v15, %v2017_v57  ;;  %v2140_v51 = vstv %s3075_s7  ;;  %s4612_s7 = sld [smem:[#allocation3 + $0xd4]] }
 0x3bb   :  { %v1988_v25 = vmul.f32 %v1987_v2, %v1985_v37  ;;  %v1977_v31 = vmul.f32 %v1976_v12, %v1954_v54  ;;  %v1957_v8 = vmul.f32 %v1956_v33, %v1954_v54  ;;  %v1998_v9 = vmul.f32 %v1997_v17, %v1985_v37 }
 0x3bc   :  { %2125 = vrot.lane.b32.xlu1 %v4374_v49, %s3179_s0  ;;  %2159 = vrot.lane.b32.xlu0 %v4374_v49, %s3182_s28  ;;  %v2008_v35 = vmul.f32 %v2007_v19, %v1985_v37  ;;  %v2589_v37 = vstv %s3119_s4  ;;  %v2124_v33 = vstv %s3074_s8  ;;  %s4586_s4 = sld [smem:[#allocation3 + $0xe0]]  ;;  %s4619_s8 = sld [smem:[#allocation3 + $0xcc]] }
 0x3be   :  { %v1892_v28 = vpop.permute.xlu1 %1891 }
 0x3bf   :  { %v1893_v22 = vrot.slane %v1892_v28, 2 }
 0x3c1   :  { %v1894_v13 = vsel %vm1001_vm9, %v1892_v28, %v1893_v22 }
 0x3c2   :  { %1896 = vst [vmem:[#allocation2 + $0xa] sm:$0xf] %v1894_v13  ;;  %v2283_v13 = vstv %s3090_s1  ;;  %s4503_s1 = sld [smem:[#allocation3 + $0xaa]] }
 0x3c9   :  { %v4385_v56 = vld [vmem:[#allocation2 + $0x8] sm:$0xff] }
 0x3ca   :  { %2372 = vrot.lane.b32.xlu0 %v4385_v56, %s3181_s27  ;;  %2335 = vrot.lane.b32.xlu1 %v4385_v56, %s3180_s26  ;;  %v2222_v62 = vmul.f32 %v2221_v29, %v4385_v56  ;;  %v2212_v58 = vmul.f32 %v2211_v53, %v4385_v56  ;;  %v2232_v0 = vmul.f32 %v2231_v18, %v4385_v56  ;;  %v2305_v28 = vrot.slane %v4385_v56, 2 }
 0x3cb   :  { %v2240_v6 = vmul.f32 %v4385_v56, %v3422_v36  ;;  %v2271_v11 = vmul.f32 %v4385_v56, %v3385_v4  ;;  %v2293_v29 = vstv %s3091_s23  ;;  %v2559_v53 = vstv %s3116_s24  ;;  %s4529_s23 = sld [smem:[#allocation3 + $0xc3]] }
 0x3cc   :  { %s4542_s24 = sld [smem:[#allocation3 + $0xcb]] }
 0x3cd   :  { %v2253_v45 = vmul.f32 %v2252_v30, %v2240_v6  ;;  %v2274_v20 = vmul.f32 %v2273_v47, %v2271_v11  ;;  %v2263_v5 = vmul.f32 %v2262_v43, %v2240_v6  ;;  %v2243_v32 = vmul.f32 %v2242_v38, %v2240_v6 }
 0x3ce   :  { %2445 = vrot.lane.b32.xlu0 %v4385_v56, %s3182_s28  ;;  %2411 = vrot.lane.b32.xlu1 %v4385_v56, %s3179_s0 }
 0x3d0   :  { %v1899_v27 = vpop.permute.xlu0 %1898 }
 0x3d1   :  { %v1900_v60 = vrot.slane %v1899_v27, 2 }
 0x3d3   :  { %v1901_v63 = vsel %vm1001_vm9, %v1899_v27, %v1900_v60  ;;  %v2284_v60 = vmul.f32 %v2283_v13, %v2271_v11  ;;  %v2436_v13 = vstv %s3103_s11  ;;  %s4652_s11 = sld [smem:[#allocation3 + $0xce]] }
 0x3d4   :  { %1903 = vst [vmem:[#allocation2 + $0x12] sm:$0xf] %v1901_v63  ;;  %v2326_v63 = vstv %s3094_s2  ;;  %s4510_s2 = sld [smem:[#allocation5 + $0x8]] }
 0x3d5   :  { %v2327_v7 = vmul.f32 %v2326_v63, %v2305_v28 }
 0x3db   :  { %v4396_v10 = vld [vmem:[#allocation2 + $0x10] sm:$0xff] }
 0x3dc   :  { %2658 = vrot.lane.b32.xlu0 %v4396_v10, %s3181_s27  ;;  %2621 = vrot.lane.b32.xlu1 %v4396_v10, %s3180_s26  ;;  %s3060_s27 = sld [smem:[#allocation3 + $0xbf]]  ;;  %v2508_v44 = vmul.f32 %v2507_v48, %v4396_v10  ;;  %v2498_v26 = vmul.f32 %v2497_v40, %v4396_v10  ;;  %v2518_v52 = vmul.f32 %v2517_v1, %v4396_v10 }
 0x3dd   :  { %v2557_v48 = vmul.f32 %v4396_v10, %v3385_v4 }
 0x3e0   :  { %2731 = vrot.lane.b32.xlu0 %v4396_v10, %s3182_s28  ;;  %2697 = vrot.lane.b32.xlu1 %v4396_v10, %s3179_s0 }
 0x3e2   :  { %v1966_v14 = vstv %s3060_s27  ;;  %s3120_s27 = sld [smem:[#allocation3 + $0xd3]] }
 0x3e3   :  { %v1967_v46 = vmul.f32 %v1966_v14, %v1954_v54  ;;  %v2548_v54 = vstv %s3115_s29  ;;  %v2569_v14 = vstv %s3117_s30  ;;  %s4558_s29 = sld [smem:[#allocation3 + $0xb1]]  ;;  %s4567_s30 = sld [smem:[#allocation3 + $0xc5]] }
 0x3e4   :  { %1938 = vrot.lane.b32.xlu0 %v1936_v34, %s3180_s26  ;;  %1928 = vrot.lane.b32.xlu1 %v1926_v42, %s3180_s26  ;;  %v2307_v34 = vmul.f32 %v2305_v28, %v2303_v55  ;;  %v2526_v42 = vmul.f32 %v4396_v10, %v3422_v36  ;;  %v2560_v36 = vmul.f32 %v2559_v53, %v2557_v48  ;;  %v2067_v55 = vstv %s3069_s12  ;;  %s4663_s12 = sld [smem:[#allocation3 + $0xbc]] }
 0x3e5   :  { %v2570_v4 = vmul.f32 %v2569_v14, %v2557_v48  ;;  %v1911_v53 = vmul.f32 %v4374_v49, %v3585_v59  ;;  %v1913_v14 = vstv %s4486_s17  ;;  %v1907_v49 = vstv %s4491_s18  ;;  %s3126_s17 = sld [smem:[#allocation3 + $0xd5]]  ;;  %s3127_s18 = sld [smem:[#allocation3 + $0xf0]] }
 0x3e6   :  { %v2549_v18 = vmul.f32 %v2548_v54, %v2526_v42  ;;  %v2077_v54 = vstv %s4484_s15  ;;  %s4683_s15 = sld [smem:[#allocation3 + $0xb9]] }
 0x3e8   :  { %1948 = vrot.lane.b32.xlu1 %v1946_v50, %s3180_s26  ;;  %2224 = vrot.lane.b32.xlu0 %v2222_v62, %s3180_s26  ;;  %v2539_v50 = vmul.f32 %v2538_v41, %v2526_v42  ;;  %v2294_v62 = vmul.f32 %v2293_v29, %v2271_v11 }
 0x3ec   :  { %2510 = vrot.lane.b32.xlu0 %v2508_v44, %s3180_s26  ;;  %2214 = vrot.lane.b32.xlu1 %v2212_v58, %s3180_s26  ;;  %v2528_v44 = vstv %s3113_s25  ;;  %s4548_s25 = sld [smem:[#allocation3 + $0xde]] }
 0x3ed   :  { %v2529_v58 = vmul.f32 %v2528_v44, %v2526_v42 }
 0x3f0   :  { %1969 = vrot.lane.b32.xlu0 %v1967_v46, %s3183_s16  ;;  %2234 = vrot.lane.b32.xlu1 %v2232_v0, %s3180_s26  ;;  %v2591_v46 = vrot.slane %v4396_v10, 2  ;;  %v2602_v0 = vstv %s3120_s27  ;;  %s4574_s27 = sld [smem:[#allocation3 + $0xe6]] }
 0x3f2   :  { %v2603_v2 = vmul.f32 %v2602_v0, %v2591_v46  ;;  %v2593_v40 = vmul.f32 %v2591_v46, %v2589_v37 }
 0x3f4   :  { %1990 = vrot.lane.b32.xlu0 %v1988_v25, %s3179_s0  ;;  %2500 = vrot.lane.b32.xlu1 %v2498_v26, %s3180_s26  ;;  %v2612_v25 = vstv %s3121_s5  ;;  %v2579_v26 = vstv %s3118_s6  ;;  %s4596_s5 = sld [smem:[#allocation3 + $0xb3]]  ;;  %s4603_s6 = sld [smem:[#allocation3 + $0xb0]] }
 0x3f5   :  { %v2613_v12 = vmul.f32 %v2612_v25, %v2591_v46  ;;  %v2580_v1 = vmul.f32 %v2579_v26, %v2557_v48  ;;  %v1921_v46 = vstv %s4493_s19  ;;  %s3132_s19 = sld [smem:[#allocation3 + $0xd7]] }
 0x3f8   :  { %1979 = vrot.lane.b32.xlu0 %v1977_v31, %s3183_s16  ;;  %2520 = vrot.lane.b32.xlu1 %v2518_v52, %s3180_s26  ;;  %s3093_s26 = sld [smem:[#allocation3 + $0xca]] }
 0x3fc   :  { %2033 = vrot.lane.b32.xlu0 %v2031_v39, %s3182_s28  ;;  %1959 = vrot.lane.b32.xlu1 %v1957_v8, %s3183_s16 }
 0x3fe   :  { %v2316_v22 = vstv %s3093_s26  ;;  %s4501_s26 = sld [smem:[#allocation5 + $0x6]] }
 0x3ff   :  { %v2317_v27 = vmul.f32 %v2316_v22, %v2305_v28 }
 0x400   :  { %2043 = vrot.lane.b32.xlu0 %v2041_v3, %s3182_s28  ;;  %2000 = vrot.lane.b32.xlu1 %v1998_v9, %s3179_s0 }
 0x404   :  { %2255 = vrot.lane.b32.xlu0 %v2253_v45, %s3183_s16  ;;  %2023 = vrot.lane.b32.xlu1 %v2021_v24, %s3182_s28  ;;  %v2410_v24 = vstv %s3101_s10  ;;  %s4647_s10 = sld [smem:[#allocation3 + $0xef]] }
 0x408   :  { %2276 = vrot.lane.b32.xlu0 %v2274_v20, %s3179_s0  ;;  %2010 = vrot.lane.b32.xlu1 %v2008_v35, %s3179_s0 }
 0x40c   :  { %2265 = vrot.lane.b32.xlu0 %v2263_v5, %s3183_s16  ;;  %2245 = vrot.lane.b32.xlu1 %v2243_v32, %s3183_s16 }
 0x410   :  { %2319 = vrot.lane.b32.xlu0 %v2317_v27, %s3182_s28  ;;  %2286 = vrot.lane.b32.xlu1 %v2284_v60, %s3179_s0 }
 0x414   :  { %2329 = vrot.lane.b32.xlu0 %v2327_v7, %s3182_s28  ;;  %2309 = vrot.lane.b32.xlu1 %v2307_v34, %s3182_s28 }
 0x418   :  { %2541 = vrot.lane.b32.xlu0 %v2539_v50, %s3183_s16  ;;  %2296 = vrot.lane.b32.xlu1 %v2294_v62, %s3179_s0  ;;  %v2094_v50 = vstv %s3071_s13  ;;  %s4670_s13 = sld [smem:[#allocation3 + $0xe9]] }
 0x41c   :  { %2562 = vrot.lane.b32.xlu0 %v2560_v36, %s3179_s0  ;;  %2531 = vrot.lane.b32.xlu1 %v2529_v58, %s3183_s16  ;;  %v1917_v36 = vstv %s4481_s14  ;;  %s4677_s14 = sld [smem:[#allocation3 + $0xf1]] }
 0x420   :  { %2551 = vrot.lane.b32.xlu0 %v2549_v18, %s3183_s16  ;;  %2572 = vrot.lane.b32.xlu1 %v2570_v4, %s3179_s0  ;;  %s3076_s16 = sld [smem:[#allocation3 + $0xdf]] }
 0x424   :  { %2605 = vrot.lane.b32.xlu0 %v2603_v2, %s3182_s28  ;;  %2595 = vrot.lane.b32.xlu1 %v2593_v40, %s3182_s28  ;;  %v1918_v2 = vmul.f32 %v1917_v36, %v1911_v53  ;;  %v2696_v40 = vstv %s4495_s20  ;;  %s3133_s20 = sld [smem:[#allocation3 + $0xf2]] }
 0x426   :  { %v2150_v17 = vstv %s3076_s16  ;;  %s4630_s16 = sld [smem:[#allocation3 + $0xba]] }
 0x428   :  { %2615 = vrot.lane.b32.xlu0 %v2613_v12, %s3182_s28  ;;  %2582 = vrot.lane.b32.xlu1 %v2580_v1, %s3179_s0  ;;  %s3102_s0 = sld [smem:[#allocation3 + $0xcd]]  ;;  %v1905_v12 = vstv %s4501_s26  ;;  %v1914_v1 = vmul.f32 %v1913_v14, %v1911_v53  ;;  %s4765_s26 = sld [smem:[#allocation3 + $0xc6]] }
 0x42a   :  { %v2050_v10 = vpop.permute.xlu1 %2049  ;;  %v2087_v9 = vpop.permute.xlu0 %2086 }
 0x42b   :  { %v2051_v11 = vrot.slane %v2050_v10, 2  ;;  %v2052_v47 = vrot.slane %v2050_v10, 4  ;;  %v2088_v32 = vrot.slane %v2087_v9, 2  ;;  %v2089_v28 = vrot.slane %v2087_v9, 4 }
 0x42d   :  { %v2053_v22 = vsel %vm134_vm5, %v2051_v11, %v2052_v47  ;;  %v2090_v63 = vsel %vm171_vm6, %v2088_v32, %v2089_v28 }
 0x42e   :  { %v2126_v31 = vpop.permute.xlu1 %2125  ;;  %v2160_v30 = vpop.permute.xlu0 %2159  ;;  %v2426_v45 = vstv %s3102_s0  ;;  %v4479_v27 = vmul.f32 %v2053_v22, %v3231_v21  ;;  %v4498_v34 = vmul.f32 %v2090_v63, %v3240_v23  ;;  %v2104_v22 = vstv %s4529_s23  ;;  %s4637_s0 = sld [smem:[#allocation3 + $0xe7]] }
 0x42f   :  { %v2127_v52 = vrot.slane %v2126_v31, 2  ;;  %v2128_v15 = vrot.slane %v2126_v31, 4  ;;  %v2161_v41 = vrot.slane %v2160_v30, 2  ;;  %v2162_v29 = vrot.slane %v2160_v30, 4 }
 0x430   :  { %v2068_v42 = vmul.f32 %v2067_v55, %v4479_v27  ;;  %v2095_v44 = vmul.f32 %v2094_v50, %v4498_v34  ;;  %v2078_v26 = vmul.f32 %v2077_v54, %v4479_v27  ;;  %v2057_v30 = vstv %s4514_s21  ;;  %s4834_s21 = sld [smem:[#allocation3 + $0xcf]] }
 0x431   :  { %v2129_v39 = vsel %vm219_vm4, %v2127_v52, %v2128_v15  ;;  %v2163_v58 = vsel %vm111_vm7, %v2161_v41, %v2162_v29  ;;  %v2167_v15 = vstv %s4503_s1  ;;  %v2058_v28 = vmul.f32 %v2057_v30, %v4479_v27  ;;  %s4770_s1 = sld [smem:[#allocation3 + $0xe1]] }
 0x432   :  { %v2141_v8 = vmul.f32 %v2140_v51, %v2129_v39  ;;  %v2131_v61 = vmul.f32 %v2129_v39, %v2124_v33  ;;  %v2151_v3 = vmul.f32 %v2150_v17, %v2129_v39  ;;  %v4532_v25 = vmul.f32 %v2163_v58, %v3231_v21 }
 0x433   :  { %v1919_v17 = vadd.f32 %v1918_v2, %v1907_v49  ;;  %v2177_v2 = vstv %s4567_s30 }
 0x434   :  { %2143 = vrot.lane.b32.xlu1 %v2141_v8, %s3182_s28  ;;  %2133 = vrot.lane.b32.xlu0 %v2131_v61, %s3182_s28  ;;  %v1909_v8 = vstv %s4510_s2  ;;  %v1922_v61 = vmul.f32 %v1921_v46, %v1911_v53  ;;  %v2105_v53 = vmul.f32 %v2104_v22, %v4498_v34  ;;  %s4772_s2 = sld [smem:[#allocation3 + $0xb4]] }
 0x438   :  { %2153 = vrot.lane.b32.xlu1 %v2151_v3, %s3182_s28 }
 0x43c   :  { %v4470_v6 = vpop.permute.xlu1 %2335  ;;  %v4473_v43 = vpop.permute.xlu0 %2372 }
 0x43d   :  { %v2337_v10 = vrot.slane %v4470_v6, 2  ;;  %v2338_v31 = vrot.slane %v4470_v6, 4  ;;  %v2374_v6 = vrot.slane %v4473_v43, 2  ;;  %v2375_v11 = vrot.slane %v4473_v43, 4 }
 0x43f   :  { %v2339_v47 = vsel %vm134_vm5, %v2337_v10, %v2338_v31  ;;  %v2376_v55 = vsel %vm171_vm6, %v2374_v6, %v2375_v11 }
 0x440   :  { %v2412_v57 = vpop.permute.xlu1 %2411  ;;  %v4488_v7 = vpop.permute.xlu0 %2445  ;;  %v4589_v36 = vmul.f32 %v2376_v55, %v3240_v23 }
 0x441   :  { %v2413_v19 = vrot.slane %v2412_v57, 2  ;;  %v2414_v20 = vrot.slane %v2412_v57, 4  ;;  %v1915_v57 = vadd.f32 %v1914_v1, %v1905_v12  ;;  %v2447_v54 = vrot.slane %v4488_v7, 2 }
 0x442   :  { %v2448_v14 = vrot.slane %v4488_v7, 4  ;;  %v2363_v7 = vstv %s4574_s27 }
 0x443   :  { %v2415_v35 = vsel %vm219_vm4, %v2413_v19, %v2414_v20 }
 0x444   :  { %v2427_v38 = vmul.f32 %v2426_v45, %v2415_v35  ;;  %v2417_v5 = vmul.f32 %v2415_v35, %v2410_v24  ;;  %v2437_v60 = vmul.f32 %v2436_v13, %v2415_v35  ;;  %v2168_v45 = vmul.f32 %v2167_v15, %v4532_v25 }
 0x445   :  { %v2712_v24 = vstv %s4518_s22  ;;  %v4570_v13 = vmul.f32 %v2339_v47, %v3231_v21  ;;  %s4840_s22 = sld [smem:[#allocation3 + $0xea]] }
 0x446   :  { %2429 = vrot.lane.b32.xlu1 %v2427_v38, %s3182_s28  ;;  %2419 = vrot.lane.b32.xlu0 %v2417_v5, %s3182_s28 }
 0x44a   :  { %2439 = vrot.lane.b32.xlu1 %v2437_v60, %s3182_s28  ;;  %v1923_v60 = vadd.f32 %v1922_v61, %v1909_v8 }
 0x44e   :  { %v4505_v62 = vpop.permute.xlu0 %2658  ;;  %2070 = vrot.lane.b32.xlu1 %v2068_v42, %s3182_s28  ;;  %v4508_v48 = vpop.permute.xlu1 %2621  ;;  %v2353_v42 = vstv %s4542_s24 }
 0x44f   :  { %v2354_v58 = vmul.f32 %v2353_v42, %v4570_v13  ;;  %v2623_v12 = vrot.slane %v4508_v48, 2  ;;  %v2624_v1 = vrot.slane %v4508_v48, 4  ;;  %v2364_v48 = vmul.f32 %v2363_v7, %v4570_v13 }
 0x450   :  { %v2660_v8 = vrot.slane %v4505_v62, 2  ;;  %v2661_v61 = vrot.slane %v4505_v62, 4  ;;  %v2666_v42 = vstv %s4630_s16 }
 0x452   :  { %v4523_v18 = vpop.permute.xlu0 %2731  ;;  %2097 = vrot.lane.b32.xlu1 %v2095_v44, %s3182_s28  ;;  %v2698_v4 = vpop.permute.xlu1 %2697  ;;  %v2114_v44 = vstv %s4548_s25  ;;  %v2662_v11 = vsel %vm171_vm6, %v2660_v8, %v2661_v61 }
 0x453   :  { %v2699_v0 = vrot.slane %v2698_v4, 2  ;;  %v2700_v37 = vrot.slane %v2698_v4, 4  ;;  %v2380_v4 = vstv %s4558_s29  ;;  %v4655_v22 = vmul.f32 %v2662_v11, %v3240_v23 }
 0x454   :  { %v2733_v55 = vrot.slane %v4523_v18, 2  ;;  %v2629_v11 = vstv %s4683_s15 }
 0x455   :  { %v4539_v52 = vsel %vm219_vm4, %v2699_v0, %v2700_v37  ;;  %v2115_v0 = vmul.f32 %v2114_v44, %v4498_v34 }
 0x456   :  { %v1939_v51 = vpop.permute.xlu0 %1938  ;;  %2080 = vrot.lane.b32.xlu1 %v2078_v26, %s3182_s28  ;;  %v1929_v33 = vpop.permute.xlu1 %1928  ;;  %v2703_v39 = vmul.f32 %v4539_v52, %v2696_v40  ;;  %v2713_v63 = vmul.f32 %v2712_v24, %v4539_v52  ;;  %v2381_v40 = vmul.f32 %v2380_v4, %v4589_v36  ;;  %v2449_v26 = vsel %vm111_vm7, %v2447_v54, %v2448_v14 }
 0x457   :  { %v1940_v3 = vrot.slane %v1939_v51, 2  ;;  %v1930_v9 = vrot.slane %v1929_v33, 2  ;;  %v2400_v14 = vstv %s4637_s0 }
 0x458   :  { %2705 = vrot.lane.b32.xlu0 %v2703_v39, %s3182_s28  ;;  %v4622_v39 = vmul.f32 %v2449_v26, %v3231_v21 }
 0x459   :  { %v1941_v19 = vsel %vm134_vm5, %v1939_v51, %v1940_v3  ;;  %v1931_v20 = vsel %vm134_vm5, %v1929_v33, %v1930_v9  ;;  %v2178_v51 = vmul.f32 %v2177_v2, %v4532_v25  ;;  %v2187_v33 = vstv %s4586_s4 }
 0x45a   :  { %v1943_v35 = vadd.f32 %v1941_v19, %v1919_v17  ;;  %v4560_v38 = vadd.f32 %v1931_v20, %v1915_v57  ;;  %v4562_v5 = vpop.permute.xlu0 %2224  ;;  %2170 = vrot.lane.b32.xlu1 %v2168_v45, %s3182_s28  ;;  %v1949_v32 = vpop.permute.xlu1 %1948  ;;  %v2625_v17 = vsel %vm134_vm5, %v2623_v12, %v2624_v1  ;;  %v2453_v3 = vstv %s4596_s5 }
 0x45b   :  { %v1950_v43 = vrot.slane %v1949_v32, 2  ;;  %v2188_v6 = vmul.f32 %v2187_v33, %v4532_v25  ;;  %v2343_v45 = vstv %s4603_s6  ;;  %v4640_v62 = vmul.f32 %v2625_v17, %v3231_v21 }
 0x45c   :  { %2060 = vrot.lane.b32.xlu0 %v2058_v28, %s3182_s28  ;;  %v2454_v24 = vmul.f32 %v2453_v3, %v4622_v39  ;;  %v2639_v19 = vstv %s4612_s7  ;;  %v2463_v12 = vstv %s4652_s11  ;;  %v2473_v17 = vstv %s4670_s13 }
 0x45d   :  { %v1951_v27 = vsel %vm134_vm5, %v1949_v32, %v1950_v43  ;;  %v2390_v43 = vstv %s4619_s8  ;;  %v2464_v8 = vmul.f32 %v2463_v12, %v4622_v39 }
 0x45e   :  { %v1953_v41 = vadd.f32 %v1951_v27, %v1923_v60  ;;  %v4579_v29 = vpop.permute.xlu0 %2510  ;;  %2715 = vrot.lane.b32.xlu1 %v2713_v63, %s3182_s28  ;;  %v4582_v50 = vpop.permute.xlu1 %2214  ;;  %v2640_v63 = vmul.f32 %v2639_v19, %v4640_v62  ;;  %v2734_v27 = vrot.slane %v4523_v18, 4  ;;  %v2667_v18 = vmul.f32 %v2666_v42, %v4655_v22 }
 0x460   :  { %2107 = vrot.lane.b32.xlu0 %v2105_v53, %s3182_s28  ;;  %v2391_v53 = vmul.f32 %v2390_v43, %v4589_v36 }
 0x462   :  { %v1970_v49 = vpop.permute.xlu0 %1969  ;;  %2356 = vrot.lane.b32.xlu1 %v2354_v58, %s3182_s28  ;;  %v4599_v46 = vpop.permute.xlu1 %2234 }
 0x463   :  { %v1971_v37 = vrot.slane %v1970_v49, 2 }
 0x464   :  { %2117 = vrot.lane.b32.xlu0 %v2115_v0, %s3182_s28  ;;  %v2649_v0 = vstv %s4647_s10 }
 0x465   :  { %v1972_v10 = vsel %vm182_vm8, %v1970_v49, %v1971_v37 }
 0x466   :  { %v1974_v34 = vadd.f32 %v1972_v10, %v1943_v35  ;;  %v1991_v31 = vpop.permute.xlu0 %1990  ;;  %2383 = vrot.lane.b32.xlu1 %v2381_v40, %s3182_s28  ;;  %v4615_v15 = vpop.permute.xlu1 %2500  ;;  %v2344_v35 = vmul.f32 %v2343_v45, %v4570_v13  ;;  %v2401_v40 = vmul.f32 %v2400_v14, %v4589_v36  ;;  %v2739_v36 = vstv %s4663_s12 }
 0x467   :  { %v1992_v32 = vrot.slane %v1991_v31, 2  ;;  %v2474_v45 = vmul.f32 %v2473_v17, %v4622_v39 }
 0x468   :  { %2180 = vrot.lane.b32.xlu0 %v2178_v51, %s3182_s28 }
 0x469   :  { %v1993_v44 = vsel %vm219_vm4, %v1991_v31, %v1992_v32 }
 0x46a   :  { %v1980_v9 = vpop.permute.xlu0 %1979  ;;  %2366 = vrot.lane.b32.xlu1 %v2364_v48, %s3182_s28  ;;  %v4633_v30 = vpop.permute.xlu1 %2520 }
 0x46b   :  { %v1981_v57 = vrot.slane %v1980_v9, 2 }
 0x46c   :  { %2190 = vrot.lane.b32.xlu0 %v2188_v6, %s3182_s28  ;;  %v2722_v6 = vstv %s4677_s14 }
 0x46d   :  { %v1982_v47 = vsel %vm182_vm8, %v1980_v9, %v1981_v57  ;;  %v2723_v19 = vmul.f32 %v2722_v6, %v4539_v52 }
 0x46e   :  { %v1984_v25 = vadd.f32 %v1982_v47, %v1953_v41  ;;  %2456 = vrot.lane.b32.xlu1 %v2454_v24, %s3182_s28  ;;  %v1960_v20 = vpop.permute.xlu1 %1959  ;;  %v2034_v60 = vpop.permute.xlu0 %2033 }
 0x46f   :  { %v1961_v28 = vrot.slane %v1960_v20, 2  ;;  %v2035_v58 = vrot.slane %v2034_v60, 6 }
 0x470   :  { %2346 = vrot.lane.b32.xlu0 %v2344_v35, %s3182_s28  ;;  %v2676_v35 = vstv %s3126_s17 }
 0x471   :  { %v1962_v13 = vsel %vm182_vm8, %v1960_v20, %v1961_v28  ;;  %v2036_v7 = vsel %vm111_vm7, %v2035_v58, %v2034_v60  ;;  %v2677_v32 = vmul.f32 %v2676_v35, %v4655_v22  ;;  %v2686_v28 = vstv %s3127_s18 }
 0x472   :  { %v1964_v41 = vadd.f32 %v1962_v13, %v4560_v38  ;;  %2642 = vrot.lane.b32.xlu1 %v2640_v63, %s3182_s28  ;;  %v2001_v23 = vpop.permute.xlu1 %2000  ;;  %v2735_v38 = vsel %vm111_vm7, %v2733_v55, %v2734_v27  ;;  %v2044_v10 = vpop.permute.xlu0 %2043  ;;  %v2687_v52 = vmul.f32 %v2686_v28, %v4655_v22  ;;  %v2749_v60 = vstv %s3132_s19 }
 0x473   :  { %v2002_v54 = vrot.slane %v2001_v23, 2  ;;  %v2737_v1 = vmul.f32 %v2735_v38, %v3231_v21  ;;  %v2045_v21 = vrot.slane %v2044_v10, 6  ;;  %v2759_v27 = vstv %s3133_s20 }
 0x474   :  { %2393 = vrot.lane.b32.xlu0 %v2391_v53, %s3182_s28  ;;  %v1995_v4 = vadd.f32 %v1993_v44, %v1964_v41 }
 0x475   :  { %v2003_v49 = vsel %vm219_vm4, %v2001_v23, %v2002_v54  ;;  %v2740_v3 = vmul.f32 %v2739_v36, %v2737_v1  ;;  %v2046_v24 = vsel %vm111_vm7, %v2045_v21, %v2044_v10  ;;  %v2750_v55 = vmul.f32 %v2749_v60, %v2737_v1 }
 0x476   :  { %v2005_v37 = vadd.f32 %v2003_v49, %v1974_v34  ;;  %2669 = vrot.lane.b32.xlu1 %v2667_v18, %s3182_s28  ;;  %v2024_v2 = vpop.permute.xlu1 %2023  ;;  %v2650_v34 = vmul.f32 %v2649_v0, %v4640_v62  ;;  %v4716_v43 = vpop.permute.xlu0 %2255  ;;  %v2760_v42 = vmul.f32 %v2759_v27, %v2737_v1 }
 0x477   :  { %v2025_v26 = vrot.slane %v2024_v2, 6 }
 0x478   :  { %2403 = vrot.lane.b32.xlu0 %v2401_v40, %s3182_s28  ;;  %v4688_v31 = vadd.f32 %v2036_v7, %v2005_v37 }
 0x479   :  { %v2026_v51 = vsel %vm111_vm7, %v2025_v26, %v2024_v2 }
 0x47a   :  { %v4692_v33 = vadd.f32 %v2026_v51, %v1995_v4  ;;  %2652 = vrot.lane.b32.xlu1 %v2650_v34, %s3182_s28  ;;  %v2011_v48 = vpop.permute.xlu1 %2010 }
 0x47b   :  { %v2012_v61 = vrot.slane %v2011_v48, 2 }
 0x47c   :  { %2466 = vrot.lane.b32.xlu0 %v2464_v8, %s3182_s28 }
 0x47d   :  { %v2013_v9 = vsel %vm219_vm4, %v2011_v48, %v2012_v61 }
 0x47e   :  { %v2015_v57 = vadd.f32 %v2013_v9, %v1984_v25  ;;  %2742 = vrot.lane.b32.xlu1 %v2740_v3, %s3182_s28  ;;  %v4704_v47 = vpop.permute.xlu1 %2245  ;;  %v2630_v25 = vmul.f32 %v2629_v11, %v4640_v62  ;;  %v4723_v62 = vpop.permute.xlu0 %2276 }
 0x480   :  { %2476 = vrot.lane.b32.xlu0 %v2474_v45, %s3182_s28  ;;  %v4708_v20 = vadd.f32 %v2046_v24, %v2015_v57 }
 0x482   :  { %2725 = vrot.lane.b32.xlu1 %v2723_v19, %s3182_s28  ;;  %v4713_v39 = vpop.permute.xlu1 %2286  ;;  %v4728_v41 = vpop.permute.xlu0 %2265 }
 0x484   :  { %2632 = vrot.lane.b32.xlu0 %v2630_v25, %s3182_s28  ;;  %v2197_v25 = vmul.f32 %v4385_v56, %v3585_v59 }
 0x486   :  { %v4720_v63 = vpop.permute.xlu1 %2309  ;;  %v4733_v22 = vpop.permute.xlu0 %2319 }
 0x488   :  { %2679 = vrot.lane.b32.xlu0 %v2677_v32, %s3182_s28 }
 0x48a   :  { %v4726_v13 = vpop.permute.xlu1 %2296  ;;  %v4737_v44 = vpop.permute.xlu0 %2329 }
 0x48c   :  { %2689 = vrot.lane.b32.xlu0 %v2687_v52, %s3182_s28 }
 0x48e   :  { %v4731_v23 = vpop.permute.xlu1 %2531  ;;  %v4741_v54 = vpop.permute.xlu0 %2541 }
 0x490   :  { %2752 = vrot.lane.b32.xlu0 %v2750_v55, %s3182_s28 }
 0x492   :  { %v4735_v53 = vpop.permute.xlu1 %2572  ;;  %v4745_v18 = vpop.permute.xlu0 %2562 }
 0x494   :  { %2762 = vrot.lane.b32.xlu0 %v2760_v42, %s3182_s28  ;;  %s4763_s28 = sld [smem:[#allocation3 + $0xab]] }
 0x496   :  { %v4739_v58 = vpop.permute.xlu1 %2595  ;;  %v4747_v38 = vpop.permute.xlu0 %2551 }
 0x49a   :  { %v4743_v14 = vpop.permute.xlu1 %2582  ;;  %v4751_v0 = vpop.permute.xlu0 %2605  ;;  %v2199_v52 = vstv %s4763_s28 }
 0x49e   :  { %v4757_v40 = vpop.permute.xlu0 %2615 }
 0x4a6   :  { %v2144_v4 = vpop.permute.xlu1 %2143  ;;  %v2134_v26 = vpop.permute.xlu0 %2133 }
 0x4a7   :  { %v2135_v17 = vrot.slane %v2134_v26, 6 }
 0x4a9   :  { %v2136_v28 = vsel %vm111_vm7, %v2135_v17, %v2134_v26 }
 0x4aa   :  { %v4749_v49 = vpop.permute.xlu1 %2153 }
 0x4b8   :  { %v4753_v37 = vpop.permute.xlu1 %2429  ;;  %v4759_v1 = vpop.permute.xlu0 %2419 }
 0x4bc   :  { %v4755_v2 = vpop.permute.xlu1 %2439 }
 0x4c0   :  { %v2071_v7 = vpop.permute.xlu1 %2070 }
 0x4c1   :  { %v2072_v36 = vrot.slane %v2071_v7, 6 }
 0x4c3   :  { %v2073_v9 = vsel %vm111_vm7, %v2072_v36, %v2071_v7  ;;  %v2203_v7 = vstv %s4765_s26 }
 0x4c4   :  { %v2098_v12 = vpop.permute.xlu1 %2097  ;;  %v2075_v55 = vadd.f32 %v2073_v9, %v4688_v31  ;;  %v2485_v31 = vstv %s4772_s2 }
 0x4c5   :  { %v2099_v8 = vrot.slane %v2098_v12, 6 }
 0x4c7   :  { %v2100_v45 = vsel %vm111_vm7, %v2099_v8, %v2098_v12  ;;  %v2145_v12 = vrot.slane %v2144_v4, 6  ;;  %v2200_v8 = vmul.f32 %v2199_v52, %v2197_v25 }
 0x4c8   :  { %v2081_v10 = vpop.permute.xlu1 %2080 }
 0x4c9   :  { %v2082_v24 = vrot.slane %v2081_v10, 6 }
 0x4ca   :  { %v4761_v34 = vpop.permute.xlu0 %2705 }
 0x4cb   :  { %v2083_v56 = vsel %vm111_vm7, %v2082_v24, %v2081_v10  ;;  %v2204_v24 = vmul.f32 %v2203_v7, %v2197_v25 }
 0x4cc   :  { %v2171_v51 = vpop.permute.xlu1 %2170 }
 0x4cd   :  { %v2172_v11 = vrot.slane %v2171_v51, 6 }
 0x4ce   :  { %v2061_v48 = vpop.permute.xlu0 %2060 }
 0x4cf   :  { %v2062_v21 = vrot.slane %v2061_v48, 6  ;;  %v2173_v36 = vsel %vm111_vm7, %v2172_v11, %v2171_v51  ;;  %v2278_v11 = vrot.slane %v4723_v62, 2 }
 0x4d0   :  { %v4767_v61 = vpop.permute.xlu1 %2715 }
 0x4d1   :  { %v2063_v3 = vsel %vm111_vm7, %v2062_v21, %v2061_v48 }
 0x4d2   :  { %v2065_v6 = vadd.f32 %v2063_v3, %v4692_v33  ;;  %v2108_v57 = vpop.permute.xlu0 %2107  ;;  %v2216_v33 = vrot.slane %v4582_v50, 2  ;;  %v2247_v3 = vrot.slane %v4704_v47, 2 }
 0x4d3   :  { %v2109_v19 = vrot.slane %v2108_v57, 6 }
 0x4d4   :  { %v2102_v35 = vadd.f32 %v2100_v45, %v2065_v6  ;;  %v4779_v32 = vpop.permute.xlu1 %2356  ;;  %v2217_v9 = vsel %vm134_vm5, %v4582_v50, %v2216_v33  ;;  %v2085_v45 = vadd.f32 %v2083_v56, %v4708_v20  ;;  %v2226_v50 = vrot.slane %v4562_v5, 2 }
 0x4d5   :  { %v2110_v60 = vsel %vm111_vm7, %v2109_v19, %v2108_v57  ;;  %v2207_v57 = vstv %s4770_s1  ;;  %v2146_v19 = vsel %vm111_vm7, %v2145_v12, %v2144_v4  ;;  %v2248_v20 = vsel %vm182_vm8, %v4704_v47, %v2247_v3 }
 0x4d6   :  { %v2138_v27 = vadd.f32 %v2136_v28, %v2102_v35  ;;  %v2118_v42 = vpop.permute.xlu0 %2117  ;;  %v2112_v21 = vadd.f32 %v2110_v60, %v2075_v55  ;;  %v2155_v35 = vrot.slane %v4749_v49, 6  ;;  %v2311_v33 = vrot.slane %v4720_v63, 6 }
 0x4d7   :  { %v2119_v48 = vrot.slane %v2118_v42, 6  ;;  %v2236_v4 = vrot.slane %v4599_v46, 2  ;;  %v2257_v12 = vrot.slane %v4716_v43, 2 }
 0x4d8   :  { %v2175_v26 = vadd.f32 %v2173_v36, %v2138_v27  ;;  %v4789_v17 = vpop.permute.xlu1 %2383  ;;  %v2148_v60 = vadd.f32 %v2146_v19, %v2112_v21  ;;  %v2208_v27 = vmul.f32 %v2207_v57, %v2197_v25  ;;  %v2279_v25 = vsel %vm219_vm4, %v4723_v62, %v2278_v11 }
 0x4d9   :  { %v2120_v6 = vsel %vm111_vm7, %v2119_v48, %v2118_v42  ;;  %v2288_v21 = vrot.slane %v4713_v39, 2 }
 0x4da   :  { %v2201_v10 = vadd.f32 %v2200_v8, %v2175_v26  ;;  %v2181_v51 = vpop.permute.xlu0 %2180  ;;  %v2122_v52 = vadd.f32 %v2120_v6, %v2085_v45  ;;  %v2267_v8 = vrot.slane %v4728_v41, 2  ;;  %v2156_v26 = vsel %vm111_vm7, %v2155_v35, %v4749_v49 }
 0x4db   :  { %v2182_v28 = vrot.slane %v2181_v51, 6  ;;  %v2227_v45 = vsel %vm134_vm5, %v4562_v5, %v2226_v50  ;;  %v2237_v49 = vsel %vm134_vm5, %v4599_v46, %v2236_v4  ;;  %v2321_v5 = vrot.slane %v4733_v22, 6 }
 0x4dc   :  { %v4801_v55 = vpop.permute.xlu1 %2366  ;;  %v2219_v42 = vadd.f32 %v2217_v9, %v2201_v10  ;;  %v2158_v6 = vadd.f32 %v2156_v26, %v2122_v52  ;;  %v2312_v10 = vsel %vm111_vm7, %v2311_v33, %v4720_v63  ;;  %v2258_v52 = vsel %vm182_vm8, %v4716_v43, %v2257_v12 }
 0x4dd   :  { %v2183_v7 = vsel %vm111_vm7, %v2182_v28, %v2181_v51  ;;  %v3146_v51 = vld [vmem:[#allocation2 + $0x10] sm:$0xff]  ;;  %v2385_v63 = vrot.slane %v4789_v17, 6  ;;  %v2421_v33 = vrot.slane %v4759_v1, 6  ;;  %v2358_v43 = vrot.slane %v4779_v32, 6 }
 0x4de   :  { %v2185_v56 = vadd.f32 %v2183_v7, %v2148_v60  ;;  %v2191_v36 = vpop.permute.xlu0 %2190  ;;  %v2250_v48 = vadd.f32 %v2248_v20, %v2219_v42  ;;  %v4822_v11 = vmul.f32 %v3146_v51, %v3585_v59  ;;  %v2268_v42 = vsel %vm182_vm8, %v4728_v41, %v2267_v8 }
 0x4df   :  { %v2192_v47 = vrot.slane %v2191_v36, 6  ;;  %v2289_v59 = vsel %vm219_vm4, %v4713_v39, %v2288_v21  ;;  %v2298_v20 = vrot.slane %v4726_v13, 2  ;;  %v2331_v4 = vrot.slane %v4737_v44, 6 }
 0x4e0   :  { %v2205_v3 = vadd.f32 %v2204_v24, %v2185_v56  ;;  %v2457_v57 = vpop.permute.xlu1 %2456  ;;  %v2281_v9 = vadd.f32 %v2279_v25, %v2250_v48  ;;  %v2386_v48 = vsel %vm111_vm7, %v2385_v63, %v4789_v17  ;;  %v2502_v26 = vrot.slane %v4615_v15, 2 }
 0x4e1   :  { %v2193_v62 = vsel %vm111_vm7, %v2192_v47, %v2191_v36  ;;  %v2322_v36 = vsel %vm111_vm7, %v2321_v5, %v4733_v22  ;;  %v2458_v25 = vrot.slane %v2457_v57, 6  ;;  %v2359_v22 = vsel %vm111_vm7, %v2358_v43, %v4779_v32 }
 0x4e2   :  { %v2229_v19 = vadd.f32 %v2227_v45, %v2205_v3  ;;  %v2195_v24 = vadd.f32 %v2193_v62, %v2158_v6  ;;  %v2347_v35 = vpop.permute.xlu0 %2346  ;;  %v2314_v28 = vadd.f32 %v2312_v10, %v2281_v9  ;;  %v2299_v6 = vsel %vm219_vm4, %v4726_v13, %v2298_v20 }
 0x4e3   :  { %v2348_v60 = vrot.slane %v2347_v35, 6  ;;  %v2422_v9 = vsel %vm111_vm7, %v2421_v33, %v4759_v1  ;;  %v2368_v45 = vrot.slane %v4801_v55, 6  ;;  %v2332_v17 = vsel %vm111_vm7, %v2331_v4, %v4737_v44 }
 0x4e4   :  { %v2260_v50 = vadd.f32 %v2258_v52, %v2229_v19  ;;  %v2209_v46 = vadd.f32 %v2208_v27, %v2195_v24  ;;  %v4843_v56 = vpop.permute.xlu1 %2642  ;;  %v2431_v19 = vrot.slane %v4753_v37, 6  ;;  %v2459_v13 = vsel %vm111_vm7, %v2458_v25, %v2457_v57 }
 0x4e5   :  { %v2349_v7 = vsel %vm111_vm7, %v2348_v60, %v2347_v35  ;;  %v2486_v32 = vmul.f32 %v2485_v31, %v4822_v11  ;;  %v2533_v5 = vrot.slane %v4731_v23, 2  ;;  %v2369_v63 = vsel %vm111_vm7, %v2368_v45, %v4801_v55 }
 0x4e6   :  { %v2239_v41 = vadd.f32 %v2237_v49, %v2209_v46  ;;  %v2351_v12 = vadd.f32 %v2349_v7, %v2314_v28  ;;  %v2394_v39 = vpop.permute.xlu0 %2393  ;;  %v2291_v27 = vadd.f32 %v2289_v59, %v2260_v50  ;;  %v2489_v60 = vstv %s4834_s21 }
 0x4e7   :  { %v2395_v8 = vrot.slane %v2394_v39, 6  ;;  %v2503_v57 = vsel %vm134_vm5, %v4615_v15, %v2502_v26  ;;  %v2564_v59 = vrot.slane %v4745_v18, 2  ;;  %v2432_v20 = vsel %vm111_vm7, %v2431_v19, %v4753_v37 }
 0x4e8   :  { %v2270_v47 = vadd.f32 %v2268_v42, %v2239_v41  ;;  %v2388_v21 = vadd.f32 %v2386_v48, %v2351_v12  ;;  %v2324_v3 = vadd.f32 %v2322_v36, %v2291_v27  ;;  %v4865_v52 = vpop.permute.xlu1 %2669  ;;  %v2493_v42 = vstv %s4840_s22 }
 0x4e9   :  { %v2396_v1 = vsel %vm111_vm7, %v2395_v8, %v2394_v39  ;;  %v2441_v33 = vrot.slane %v4755_v2, 6  ;;  %v2490_v55 = vmul.f32 %v2489_v60, %v4822_v11  ;;  %v2512_v15 = vrot.slane %v4579_v29, 2 }
 0x4ea   :  { %v2424_v10 = vadd.f32 %v2422_v9, %v2388_v21  ;;  %v2361_v62 = vadd.f32 %v2359_v22, %v2324_v3  ;;  %v2404_v51 = vpop.permute.xlu0 %2403  ;;  %v2301_v49 = vadd.f32 %v2299_v6, %v2270_v47  ;;  %v2534_v39 = vsel %vm182_vm8, %v4731_v23, %v2533_v5 }
 0x4eb   :  { %v2405_v24 = vrot.slane %v2404_v51, 6  ;;  %v2597_v27 = vrot.slane %v4739_v58, 6  ;;  %v2522_v37 = vrot.slane %v4633_v30, 2  ;;  %v2543_v48 = vrot.slane %v4741_v54, 2 }
 0x4ec   :  { %v2461_v35 = vadd.f32 %v2459_v13, %v2424_v10  ;;  %v2398_v28 = vadd.f32 %v2396_v1, %v2361_v62  ;;  %v2334_v44 = vadd.f32 %v2332_v17, %v2301_v49  ;;  %v4887_v25 = vpop.permute.xlu1 %2652  ;;  %v2565_v21 = vsel %vm219_vm4, %v4745_v18, %v2564_v59 }
 0x4ed   :  { %v2406_v43 = vsel %vm111_vm7, %v2405_v24, %v2404_v51  ;;  %v2553_v3 = vrot.slane %v4747_v38, 2  ;;  %v2442_v23 = vsel %vm111_vm7, %v2441_v33, %v4755_v2  ;;  %v2574_v9 = vrot.slane %v4735_v53, 2 }
 0x4ee   :  { %v2487_v50 = vadd.f32 %v2486_v32, %v2461_v35  ;;  %v2371_v46 = vadd.f32 %v2369_v63, %v2334_v44  ;;  %v2467_v31 = vpop.permute.xlu0 %2466  ;;  %v2434_v41 = vadd.f32 %v2432_v20, %v2398_v28  ;;  %v2513_v10 = vsel %vm134_vm5, %v4579_v29, %v2512_v15 }
 0x4ef   :  { %v2468_v7 = vrot.slane %v2467_v31, 6  ;;  %v2598_v62 = vsel %vm111_vm7, %v2597_v27, %v4739_v58  ;;  %v2494_v51 = vmul.f32 %v2493_v42, %v4822_v11  ;;  %v2523_v49 = vsel %vm134_vm5, %v4633_v30, %v2522_v37 }
 0x4f0   :  { %v2408_v4 = vadd.f32 %v2406_v43, %v2371_v46  ;;  %v2505_v12 = vadd.f32 %v2503_v57, %v2487_v50  ;;  %v2544_v24 = vsel %vm182_vm8, %v4741_v54, %v2543_v48  ;;  %v2607_v32 = vrot.slane %v4751_v0, 6  ;;  %v2743_v30 = vpop.permute.xlu1 %2742 }
 0x4f1   :  { %v2469_v36 = vsel %vm111_vm7, %v2468_v7, %v2467_v31  ;;  %v2671_v29 = vrot.slane %v4865_v52, 6  ;;  %v2554_v58 = vsel %vm182_vm8, %v4747_v38, %v2553_v3  ;;  %v2575_v11 = vsel %vm219_vm4, %v4735_v53, %v2574_v9 }
 0x4f2   :  { %v2471_v8 = vadd.f32 %v2469_v36, %v2434_v41  ;;  %v2477_v26 = vpop.permute.xlu0 %2476  ;;  %v2536_v47 = vadd.f32 %v2534_v39, %v2505_v12  ;;  %v2444_v45 = vadd.f32 %v2442_v23, %v2408_v4  ;;  %v2584_v5 = vrot.slane %v4743_v14, 2 }
 0x4f3   :  { %v2478_v6 = vrot.slane %v2477_v26, 6  ;;  %v2707_v63 = vrot.slane %v4761_v34, 6  ;;  %v2644_v54 = vrot.slane %v4843_v56, 6  ;;  %v2617_v42 = vrot.slane %v4757_v40, 6 }
 0x4f4   :  { %v2491_v22 = vadd.f32 %v2490_v55, %v2471_v8  ;;  %v2567_v17 = vadd.f32 %v2565_v21, %v2536_v47  ;;  %v2608_v53 = vsel %vm111_vm7, %v2607_v32, %v4751_v0  ;;  %v2672_v46 = vsel %vm111_vm7, %v2671_v29, %v4865_v52 }
 0x4f5   :  { %v2479_v18 = vsel %vm111_vm7, %v2478_v6, %v2477_v26  ;;  %v2744_v31 = vrot.slane %v2743_v30, 6  ;;  %v2585_v4 = vsel %vm219_vm4, %v4743_v14, %v2584_v5  ;;  %v2708_v55 = vsel %vm111_vm7, %v2707_v63, %v4761_v34  ;;  %v2726_v34 = vpop.permute.xlu1 %2725 }
 0x4f6   :  { %v2515_v2 = vadd.f32 %v2513_v10, %v2491_v22  ;;  %v2481_v19 = vadd.f32 %v2479_v18, %v2444_v45  ;;  %v2633_v13 = vpop.permute.xlu0 %2632  ;;  %v2600_v1 = vadd.f32 %v2598_v62, %v2567_v17  ;;  %v2645_v41 = vsel %vm111_vm7, %v2644_v54, %v4843_v56 }
 0x4f7   :  { %v2634_v35 = vrot.slane %v2633_v13, 6  ;;  %v2654_v12 = vrot.slane %v4887_v25, 6  ;;  %v2618_v0 = vsel %vm111_vm7, %v2617_v42, %v4757_v40  ;;  %v2717_v36 = vrot.slane %v4767_v61, 6 }
 0x4f8   :  { %v2546_v28 = vadd.f32 %v2544_v24, %v2515_v2  ;;  %v2495_v44 = vadd.f32 %v2494_v51, %v2481_v19  ;;  %v2745_v37 = vsel %vm111_vm7, %v2744_v31, %v2743_v30  ;;  %v2727_v6 = vrot.slane %v2726_v34, 6 }
 0x4f9   :  { %v2635_v60 = vsel %vm111_vm7, %v2634_v35, %v2633_v13  ;;  %v2655_v47 = vsel %vm111_vm7, %v2654_v12, %v4887_v25  ;;  %v2718_v23 = vsel %vm111_vm7, %v2717_v36, %v4767_v61 }
 0x4fa   :  { %v2525_v57 = vadd.f32 %v2523_v49, %v2495_v44  ;;  %v2637_v59 = vadd.f32 %v2635_v60, %v2600_v1  ;;  %v2680_v50 = vpop.permute.xlu0 %2679  ;;  %v2577_v38 = vadd.f32 %v2575_v11, %v2546_v28  ;;  %v2728_v25 = vsel %vm111_vm7, %v2727_v6, %v2726_v34 }
 0x4fb   :  { %v2681_v20 = vrot.slane %v2680_v50, 6 }
 0x4fc   :  { %v2556_v33 = vadd.f32 %v2554_v58, %v2525_v57  ;;  %v2674_v43 = vadd.f32 %v2672_v46, %v2637_v59  ;;  %v2610_v7 = vadd.f32 %v2608_v53, %v2577_v38 }
 0x4fd   :  { %v2682_v14 = vsel %vm111_vm7, %v2681_v20, %v2680_v50 }
 0x4fe   :  { %v2710_v52 = vadd.f32 %v2708_v55, %v2674_v43  ;;  %v2647_v15 = vadd.f32 %v2645_v41, %v2610_v7  ;;  %v2690_v39 = vpop.permute.xlu0 %2689  ;;  %v2587_v27 = vadd.f32 %v2585_v4, %v2556_v33 }
 0x4ff   :  { %v2691_v48 = vrot.slane %v2690_v39, 6 }
 0x500   :  { %v2747_v8 = vadd.f32 %v2745_v37, %v2710_v52  ;;  %v2684_v26 = vadd.f32 %v2682_v14, %v2647_v15  ;;  %v2620_v56 = vadd.f32 %v2618_v0, %v2587_v27 }
 0x501   :  { %v2692_v9 = vsel %vm111_vm7, %v2691_v48, %v2690_v39 }
 0x502   :  { %v2657_v21 = vadd.f32 %v2655_v47, %v2620_v56  ;;  %v2753_v40 = vpop.permute.xlu0 %2752  ;;  %v2776_v3 = vrot.slane %v2747_v8, %v3222_v16  ;;  %v2720_v17 = vadd.f32 %v2718_v23, %v2684_v26  ;;  %v2769_v32 = vcombine.high %v2747_v8, %v2747_v8 }
 0x503   :  { %v2754_v22 = vrot.slane %v2753_v40, 6 }
 0x504   :  { %v2694_v45 = vadd.f32 %v2692_v9, %v2657_v21  ;;  %2785 = vrot.lane.b32.xlu1 %v2776_v3, %s3184_s9  ;;  %v2784_v24 = vcombine.high %v2776_v3, %v2776_v3  ;;  %v2783_v35 = vrot.slane %v2769_v32, %v3222_v16 }
 0x505   :  { %v2755_v10 = vsel %vm111_vm7, %v2754_v22, %v2753_v40 }
 0x506   :  { %v2757_v62 = vadd.f32 %v2755_v10, %v2720_v17  ;;  %v2763_v51 = vpop.permute.xlu0 %2762  ;;  %v2730_v2 = vadd.f32 %v2728_v25, %v2694_v45 }
 0x507   :  { %v2764_v18 = vrot.slane %v2763_v51, 6 }
 0x508   :  { %v2801_v49 = vrot.slane %v2757_v62, %v3222_v16  ;;  %v2794_v13 = vcombine.high %v2757_v62, %v2757_v62 }
 0x509   :  { %v2765_v61 = vsel %vm111_vm7, %v2764_v18, %v2763_v51 }
 0x50a   :  { %v2767_v19 = vadd.f32 %v2765_v61, %v2730_v2  ;;  %2810 = vrot.lane.b32.xlu0 %v2801_v49, %s3184_s9  ;;  %v2808_v29 = vrot.slane %v2794_v13, %v3222_v16  ;;  %v2809_v58 = vcombine.high %v2801_v49, %v2801_v49 }
 0x50c   :  { %v2826_v1 = vrot.slane %v2767_v19, %v3222_v16  ;;  %v2819_v11 = vcombine.high %v2767_v19, %v2767_v19 }
 0x50e   :  { %2787 = vrot.lane.b32.xlu0 %v2784_v24, %s3184_s9  ;;  %2835 = vrot.lane.b32.xlu1 %v2826_v1, %s3184_s9  ;;  %v2834_v28 = vcombine.high %v2826_v1, %v2826_v1  ;;  %v2833_v30 = vrot.slane %v2819_v11, %v3222_v16 }
 0x512   :  { %2814 = vrot.lane.b32.xlu0 %v2808_v29, %s3184_s9  ;;  %2789 = vrot.lane.b32.xlu1 %v2783_v35, %s3184_s9 }
 0x516   :  { %2812 = vrot.lane.b32.xlu1 %v2809_v58, %s3184_s9  ;;  %2837 = vrot.lane.b32.xlu0 %v2834_v28, %s3184_s9 }
 0x51a   :  { %2839 = vrot.lane.b32.xlu1 %v2833_v30, %s3184_s9 }
 0x576   :  { %v2786_v44 = vpop.permute.xlu1 %2785 }
 0x57c   :  { %v2811_v5 = vpop.permute.xlu0 %2810 }
 0x580   :  { %v2788_v63 = vpop.permute.xlu0 %2787  ;;  %v2836_v54 = vpop.permute.xlu1 %2835 }
 0x581   :  { %v2791_v59 = vsel %vm1001_vm9, %v2786_v44, %v2788_v63 }
 0x584   :  { %v2815_v60 = vpop.permute.xlu0 %2814  ;;  %v2790_v42 = vpop.permute.xlu1 %2789 }
 0x585   :  { %v2792_v57 = vsel %vm1001_vm9, %v2788_v63, %v2790_v42 }
 0x586   :  { %v2843_v50 = vcombine.low %v2791_v59, %v2792_v57 }
 0x588   :  { %v2813_v38 = vpop.permute.xlu1 %2812  ;;  %v2838_v31 = vpop.permute.xlu0 %2837  ;;  %v2851_v33 = vrot.slane %v2843_v50, %v3222_v16 }
 0x589   :  { %v2816_v53 = vsel %vm1001_vm9, %v2811_v5, %v2813_v38  ;;  %v2817_v46 = vsel %vm1001_vm9, %v2813_v38, %v2815_v60  ;;  %v2841_v4 = vsel %vm1001_vm9, %v2836_v54, %v2838_v31 }
 0x58a   :  { %v2844_v20 = vcombine.low %v2816_v53, %v2817_v46 }
 0x58c   :  { %v2858_v43 = vrot.slane %v2844_v20, %v3222_v16  ;;  %v2840_v7 = vpop.permute.xlu1 %2839 }
 0x58d   :  { %v2842_v55 = vsel %vm1001_vm9, %v2838_v31, %v2840_v7 }
 0x58e   :  { %v2859_v41 = vcombine.low %v2851_v33, %v2858_v43  ;;  %v2860_v12 = vcombine.low %v2841_v4, %v2842_v55 }
 0x590   :  { %2870 = vst [vmem:[%s4972_s3] sm:$0xff] %v2859_v41  ;;  %3134 = vst.sshfl [vmem:[%s4972_s3 + $0x8] sm:$0x33 pattern:$0x76325410] %v2860_v12 }
 0x591   :  { %2876 = vsyncpa [#allocation4], 1 }
 0x592   :  { %2877 = vsyncpa [#allocation6], 1 }

</bundles_post_ra>
